<compile_context>
chip_gen: v6e
topology: v6e:2x2x1
jax: 0.10.0
libtpu: 0.0.40
codegen_flags: <defaults>
</compile_context>

<pallas_src>
import functools

import numpy as np

import jax
import jax.numpy as jnp
from jax import lax
from jax.experimental import pallas as pl
from jax.experimental.pallas import tpu as pltpu


# ----------------------------------------------------------------------------
# Fused kernel
# ----------------------------------------------------------------------------
def _crnn_kernel(x_ref,
                 b1, s1, b2, s2, b3, s3, b4, s4, b5, s5, b6, s6,
                 m1, m2, m3, m4,
                 p1r, p2r, p3r, p4r, p1c, p2c,
                 se7, b7, s7, hw, hb,
                 o_ref, *, c_pool1, c_pool2):
    f32, bf16 = jnp.float32, jnp.bfloat16

    def conv3x3(a, w_ref, s_ref, m_ref):
        # 3x3 'same' conv as ONE matmul against the column-stacked banded
        # weight (w*cin, 3*wout*cout); the three kernel-row contributions are
        # recombined with XLU row-rolls + precomputed boundary masks
        # (= vertical zero padding), then bias/BN shift + ReLU.
        rows = a.shape[0]
        nc = s_ref.shape[1]
        mm = m_ref[...]                                       # (rows, 2) f32
        z = jnp.dot(a.astype(bf16), w_ref[...], preferred_element_type=f32)
        y = (z[:, nc:2 * nc]
             + pltpu.roll(z[:, :nc], shift=1, axis=0) * mm[:, 0:1]
             + pltpu.roll(z[:, 2 * nc:], shift=rows - 1, axis=0) * mm[:, 1:2])
        return jnp.maximum(y + s_ref[...], 0.0)

    def pool_h(a, se_ref):
        # MaxPool over H (stride 2): pair rows with an XLU roll + max, then
        # compact even rows with one precomputed 0/1 matmul.
        rows = a.shape[0]
        m = jnp.maximum(a, pltpu.roll(a, shift=rows - 1, axis=0))
        return jnp.dot(se_ref[...], m.astype(bf16), preferred_element_type=f32)

    def pool_w(a, te_ref, cch):
        # MaxPool over W (stride 2): pair (w, c) column groups with a lane
        # roll + max, then compact with one precomputed 0/1 matmul.
        cols = a.shape[1]
        m = jnp.maximum(a, pltpu.roll(a, shift=cols - cch, axis=1))
        return jnp.dot(m.astype(bf16), te_ref[...], preferred_element_type=f32)

    # ---- VGG_FeatureExtractor -------------------------------------------
    a = x_ref[...].astype(f32)                    # (nb*H, W*Cin)
    a = conv3x3(a, b1, s1, m1)                    # conv1 + ReLU
    a = pool_w(pool_h(a, p1r), p1c, c_pool1)      # MaxPool(2, 2)
    a = conv3x3(a, b2, s2, m2)                    # conv2 + ReLU
    a = pool_w(pool_h(a, p2r), p2c, c_pool2)      # MaxPool(2, 2)
    a = conv3x3(a, b3, s3, m3)                    # conv3 + ReLU
    a = conv3x3(a, b4, s4, m3)                    # conv4 + ReLU
    a = pool_h(a, p3r)                            # MaxPool((2,1),(2,1))
    a = conv3x3(a, b5, s5, m4)                    # conv5 (+BN eval) + ReLU
    a = conv3x3(a, b6, s6, m4)                    # conv6 (+BN eval) + ReLU
    a = pool_h(a, p4r)                            # MaxPool((2,1),(2,1))

    # conv7 (2x2, valid): exactly one output row per image.  Pair each
    # image's two rows along lanes (256-lane aligned concat), extract the
    # even rows with a 0/1 matmul, then one matmul with the row-stacked
    # banded weight.
    rows = a.shape[0]
    pair = jnp.concatenate([a, pltpu.roll(a, shift=rows - 1, axis=0)], axis=1)
    top = jnp.dot(se7[...], pair.astype(bf16), preferred_element_type=f32)
    feat = jnp.maximum(jnp.dot(top.astype(bf16), b7[...],
                               preferred_element_type=f32) + s7[...], 0.0)

    # permute + AdaptiveAvgPool2d((None,1)) + squeeze is the identity here
    # (feature height == 1).  CTC Linear head = lane-dense (128-lane padded)
    # block-diagonal matmul over the (w, c) columns.
    o_ref[...] = (jnp.dot(feat.astype(bf16), hw[...],
                          preferred_element_type=f32) + hb[...])


# ----------------------------------------------------------------------------
# Host-side (numpy) weight preprocessing -- done ONCE, outside the step.
# ----------------------------------------------------------------------------
def _band_conv_weights(w, scale, width, pad):
    """w: (kh, kw, cin, cout) -> (kh, width*cin, wout*cout) banded matrices.

    B_d[(wi, c), (wo, o)] = scale[o] * w[d, wi-wo+pad, c, o] (0 off-band):
    horizontal taps + horizontal zero padding + per-channel scale folded in.
    """
    kh, kw, cin, cout = w.shape
    wout = width + 2 * pad - kw + 1
    ws = w.astype(np.float32) * scale.astype(np.float32).reshape(1, 1, 1, cout)
    b = np.zeros((kh, width, cin, wout, cout), np.float32)
    for dj in range(kw):
        for wo in range(wout):
            wi = wo + dj - pad
            if 0 <= wi < width:
                b[:, wi, :, wo, :] += ws[:, dj, :, :]
    return b.reshape(kh, width * cin, wout * cout), wout


def _boundary_mask(nb, h):
    """(nb*h, 2) f32: col 0 zero on each image's top row, col 1 on its bottom."""
    rows = nb * h
    r = np.arange(rows) % h
    m = np.ones((rows, 2), np.float32)
    m[r == 0, 0] = 0.0
    m[r == h - 1, 1] = 0.0
    return m


def _even_row_select(rows_in):
    rows_out = rows_in // 2
    se = np.zeros((rows_out, rows_in), np.float32)
    se[np.arange(rows_out), 2 * np.arange(rows_out)] = 1.0
    return se


def _col_pool_select(w, c):
    cols_out = (w // 2) * c
    te = np.zeros((w * c, cols_out), np.float32)
    j = np.arange(cols_out)
    te[2 * (j // c) * c + (j % c), j] = 1.0
    return te


def _head_matrices(pred_w, pred_b, seq_len, lane=128):
    cdim, k = pred_w.shape
    cols = seq_len * k
    cols_pad = max(lane, -(-cols // lane) * lane)          # lane-dense output
    hw = np.zeros((seq_len * cdim, cols_pad), np.float32)
    hb = np.zeros((1, cols_pad), np.float32)
    for t in range(seq_len):
        hw[t * cdim:(t + 1) * cdim, t * k:(t + 1) * k] = pred_w
        hb[0, t * k:(t + 1) * k] = pred_b
    return hw, hb


def _pick_block_batch(n):
    # Two batch blocks (one per TensorCore on v7x) when the halves keep every
    # block shape sublane-aligned; otherwise one block.
    if n % 2 == 0 and (n // 2) % 8 == 0:
        return n // 2
    return n


def prepare_kernel_inputs(params, image_shape, block_batch=None):
    """Pure host/numpy weight prep.  Call once and reuse (hoisted off step)."""
    N, cin, H, W = image_shape
    assert H == 32, 'fused head assumes feature height collapses to 1 (imgH=32)'
    assert W % 4 == 0 and W >= 8
    nb = _pick_block_batch(N) if block_batch is None else block_batch
    assert N % nb == 0 and (nb == N or nb % 8 == 0), (N, nb)
    assert nb % 4 == 0, 'per-block batch must keep row counts sublane-aligned'

    f32 = np.float32
    kin = {}

    conv_names = ('conv1', 'conv2', 'conv3', 'conv4', 'conv5', 'conv6')
    widths = (W, W // 2, W // 4, W // 4, W // 4, W // 4)
    for idx, (name, width) in enumerate(zip(conv_names, widths), start=1):
        w, scale, shift = (np.asarray(t, f32) for t in params[name])
        b, wout = _band_conv_weights(w, scale, width, pad=1)
        # kernel rows side by side along columns: (width*cin, 3*wout*cout)
        kin[f'b{idx}'] = jnp.asarray(
            b.transpose(1, 0, 2).reshape(b.shape[1], -1), jnp.bfloat16)
        kin[f's{idx}'] = jnp.asarray(np.tile(shift, wout)[None, :], jnp.float32)

    heights = (H, H // 2, H // 4, H // 8)
    for idx, h in enumerate(heights, start=1):
        kin[f'm{idx}'] = jnp.asarray(_boundary_mask(nb, h), jnp.float32)
        kin[f'p{idx}r'] = jnp.asarray(_even_row_select(nb * h), jnp.bfloat16)

    oc1 = np.asarray(params['conv1'][0]).shape[-1]
    oc2 = np.asarray(params['conv2'][0]).shape[-1]
    kin['p1c'] = jnp.asarray(_col_pool_select(W, oc1), jnp.bfloat16)
    kin['p2c'] = jnp.asarray(_col_pool_select(W // 2, oc2), jnp.bfloat16)

    # conv7 (2x2 valid): even-row extractor + row-stacked banded weight.
    w7, scale7, shift7 = (np.asarray(t, f32) for t in params['conv7'])
    b7, wout7 = _band_conv_weights(w7, scale7, W // 4, pad=0)
    kin['se7'] = jnp.asarray(_even_row_select(nb * 2), jnp.bfloat16)
    kin['b7'] = jnp.asarray(b7.reshape(-1, b7.shape[2]), jnp.bfloat16)
    kin['s7'] = jnp.asarray(np.tile(shift7, wout7)[None, :], jnp.float32)

    hw, hb = _head_matrices(np.asarray(params['pred_w'], f32),
                            np.asarray(params['pred_b'], f32), wout7)
    kin['hw'] = jnp.asarray(hw, jnp.bfloat16)
    kin['hb'] = jnp.asarray(hb, jnp.float32)
    return kin


# ----------------------------------------------------------------------------
# Fused forward (single pallas_call)
# ----------------------------------------------------------------------------
_ARG_ORDER = ('b1', 's1', 'b2', 's2', 'b3', 's3', 'b4', 's4', 'b5', 's5',
              'b6', 's6', 'm1', 'm2', 'm3', 'm4',
              'p1r', 'p2r', 'p3r', 'p4r', 'p1c', 'p2c',
              'se7', 'b7', 's7', 'hw', 'hb')


def _const_map(ndim):
    zeros = (0,) * ndim
    return lambda i: zeros


def fused_forward(image_nchw, kin):
    N, cin, H, W = image_nchw.shape
    nb = kin['se7'].shape[0]                    # per-block batch (static)
    assert N % nb == 0
    c_pool1 = kin['s1'].shape[1] // W           # conv1 out channels
    c_pool2 = kin['s2'].shape[1] // (W // 2)    # conv2 out channels
    out_cols = kin['hb'].shape[1]               # lane-dense head width (128)

    # NCHW -> batched row-matrix layout: row = (n, h), column = (w, c)
    x_rm = jnp.transpose(image_nchw.astype(jnp.float32),
                         (0, 2, 3, 1)).reshape(N * H, W * cin)

    args = [x_rm] + [kin[k] for k in _ARG_ORDER]
    in_specs = [pl.BlockSpec((nb * H, W * cin), lambda i: (i, 0))]
    in_specs += [pl.BlockSpec(kin[k].shape, _const_map(kin[k].ndim))
                 for k in _ARG_ORDER]

    kernel = functools.partial(_crnn_kernel, c_pool1=c_pool1, c_pool2=c_pool2)
    return pl.pallas_call(
        kernel,
        out_shape=jax.ShapeDtypeStruct((N, out_cols), jnp.float32),
        grid_spec=pltpu.PrefetchScalarGridSpec(
            num_scalar_prefetch=0,
            grid=(N // nb,),
            in_specs=in_specs,
            out_specs=pl.BlockSpec((nb, out_cols), lambda i: (i, 0)),
        ),
        compiler_params=pltpu.CompilerParams(
            dimension_semantics=("parallel",)),
    )(*args)


def model_forward(image_nchw, kin, *, num_class):
    """Model.forward for Trans='None', Feat='VGG', Seq='None', Pred='CTC'."""
    N, _, _, W = image_nchw.shape
    seq_len = W // 4 - 1
    out = fused_forward(image_nchw, kin)
    return out[:, :seq_len * num_class].reshape(N, seq_len, num_class)


# ----------------------------------------------------------------------------
# Parameters (deterministic synthetic init; shapes follow VGG_FeatureExtractor)
# ----------------------------------------------------------------------------
def init_params(key, input_channel=1, output_channel=32, num_class=10):
    oc = [output_channel // 8, output_channel // 4,
          output_channel // 2, output_channel]            # [4, 8, 16, 32]
    layer_defs = [
        # name, ksize, cin, cout, has_bias (False => conv + BN)
        ('conv1', 3, input_channel, oc[0], True),
        ('conv2', 3, oc[0], oc[1], True),
        ('conv3', 3, oc[1], oc[2], True),
        ('conv4', 3, oc[2], oc[2], True),
        ('conv5', 3, oc[2], oc[3], False),
        ('conv6', 3, oc[3], oc[3], False),
        ('conv7', 2, oc[3], oc[3], True),
    ]
    params = {}
    keys = jax.random.split(key, len(layer_defs) + 2)
    bn_scale = 1.0 / jnp.sqrt(jnp.float32(1.0 + 1e-5))     # eval-mode BN at init
    for k, (name, ksz, cin, cout, has_bias) in zip(keys[:-2], layer_defs):
        wk, bk = jax.random.split(k)
        fan_in = ksz * ksz * cin
        w = jax.random.normal(wk, (ksz, ksz, cin, cout),
                              jnp.float32) * jnp.sqrt(2.0 / fan_in)
        if has_bias:
            scale = jnp.ones((cout,), jnp.float32)
            shift = 0.01 * jax.random.normal(bk, (cout,), jnp.float32)   # bias
        else:
            scale = jnp.full((cout,), bn_scale, jnp.float32)   # gamma/sqrt(var+eps)
            shift = jnp.zeros((cout,), jnp.float32)            # beta - mean*scale
        params[name] = (w, scale, shift)
    params['pred_w'] = jax.random.normal(
        keys[-2], (oc[3], num_class), jnp.float32) / jnp.sqrt(jnp.float32(oc[3]))
    params['pred_b'] = 0.01 * jax.random.normal(keys[-1], (num_class,), jnp.float32)
    return params


# ----------------------------------------------------------------------------
# Plain-JAX (XLA) reference of the same forward pass, for verification only
# ----------------------------------------------------------------------------
def reference_forward(image_nchw, params):
    hp = lax.Precision.HIGHEST

    def conv(x, w, scale, shift, pad, relu=True):
        y = lax.conv_general_dilated(
            x, w, window_strides=(1, 1), padding=[(pad, pad), (pad, pad)],
            dimension_numbers=('NHWC', 'HWIO', 'NHWC'), precision=hp)
        y = y * scale + shift
        return jnp.maximum(y, 0.0) if relu else y

    def maxpool(x, ph, pw):
        return lax.reduce_window(x, -jnp.inf, lax.max,
                                 (1, ph, pw, 1), (1, ph, pw, 1), 'VALID')

    x = jnp.transpose(image_nchw, (0, 2, 3, 1)).astype(jnp.float32)
    p = params
    x = conv(x, *p['conv1'], 1); x = maxpool(x, 2, 2)
    x = conv(x, *p['conv2'], 1); x = maxpool(x, 2, 2)
    x = conv(x, *p['conv3'], 1)
    x = conv(x, *p['conv4'], 1); x = maxpool(x, 2, 1)
    x = conv(x, *p['conv5'], 1)
    x = conv(x, *p['conv6'], 1); x = maxpool(x, 2, 1)
    x = conv(x, *p['conv7'], 0)
    feat = jnp.mean(x, axis=1)          # permute + AdaptiveAvgPool + squeeze
    return jnp.dot(feat, p['pred_w'], precision=hp) + p['pred_b']


if __name__ == "__main__":
    key = jax.random.PRNGKey(0)
    pkey, xkey = jax.random.split(key)

    # args: input_channel=1, output_channel=32, imgH=32, imgW=32, num_class=10.
    # Batch raised to 16 (perf review) and split into two "parallel" blocks
    # of 8 rows-of-images each so both TensorCores are used on v7x.
    num_class = 10
    params = init_params(pkey, input_channel=1, output_channel=32,
                         num_class=num_class)
    image = jax.random.normal(xkey, (16, 1, 32, 32), jnp.float32)   # NCHW

    # Weight prep hoisted out of the jitted per-step path (done once).
    kin = prepare_kernel_inputs(params, image.shape)

    fwd = jax.jit(functools.partial(model_forward, num_class=num_class))
    out = jax.block_until_ready(fwd(image, kin))

    assert out.shape == (16, 7, num_class), out.shape   # (batch, seq, classes)
    assert out.dtype == jnp.float32

    # Numerical check against a plain-XLA f32 reference of the same forward.
    ref = jax.block_until_ready(jax.jit(reference_forward)(image, params))
    err = float(jnp.max(jnp.abs(out - ref)))
    scale = float(jnp.max(jnp.abs(ref))) + 1e-6
    # Kernel matmuls use bf16 operands (f32 accumulation): allow bf16-level
    # error; structural bugs would show up as O(1)-relative differences.
    assert err <= 1e-3 + 5e-2 * scale, (
        f"kernel/reference mismatch: max|diff|={err}, max|ref|={scale}")

    print("KERNEL_OK")
</pallas_src>

<mosaic_0001>
module attributes {stable_mosaic.version = 11 : i64} {
  func.func @_crnn_kernel(%arg0: i32, %arg1: memref<256x32xf32, #tpu.memory_space<vmem>>, %arg2: memref<32x384xbf16, #tpu.memory_space<vmem>>, %arg3: memref<1x128xf32, #tpu.memory_space<vmem>>, %arg4: memref<64x384xbf16, #tpu.memory_space<vmem>>, %arg5: memref<1x128xf32, #tpu.memory_space<vmem>>, %arg6: memref<64x384xbf16, #tpu.memory_space<vmem>>, %arg7: memref<1x128xf32, #tpu.memory_space<vmem>>, %arg8: memref<128x384xbf16, #tpu.memory_space<vmem>>, %arg9: memref<1x128xf32, #tpu.memory_space<vmem>>, %arg10: memref<128x768xbf16, #tpu.memory_space<vmem>>, %arg11: memref<1x256xf32, #tpu.memory_space<vmem>>, %arg12: memref<256x768xbf16, #tpu.memory_space<vmem>>, %arg13: memref<1x256xf32, #tpu.memory_space<vmem>>, %arg14: memref<256x2xf32, #tpu.memory_space<vmem>>, %arg15: memref<128x2xf32, #tpu.memory_space<vmem>>, %arg16: memref<64x2xf32, #tpu.memory_space<vmem>>, %arg17: memref<32x2xf32, #tpu.memory_space<vmem>>, %arg18: memref<128x256xbf16, #tpu.memory_space<vmem>>, %arg19: memref<64x128xbf16, #tpu.memory_space<vmem>>, %arg20: memref<32x64xbf16, #tpu.memory_space<vmem>>, %arg21: memref<16x32xbf16, #tpu.memory_space<vmem>>, %arg22: memref<128x64xbf16, #tpu.memory_space<vmem>>, %arg23: memref<128x64xbf16, #tpu.memory_space<vmem>>, %arg24: memref<8x16xbf16, #tpu.memory_space<vmem>>, %arg25: memref<512x224xbf16, #tpu.memory_space<vmem>>, %arg26: memref<1x224xf32, #tpu.memory_space<vmem>>, %arg27: memref<224x128xbf16, #tpu.memory_space<vmem>>, %arg28: memref<1x128xf32, #tpu.memory_space<vmem>>, %arg29: memref<8x128xf32, #tpu.memory_space<vmem>>) attributes {dimension_semantics = [#tpu.dimension_semantics<parallel>], iteration_bounds = array<i64: 2>, scalar_prefetch = 0 : i64, scratch_operands = 0 : i64, tpu.core_type = #tpu.core_type<tc>, window_params = [{transform_indices = @transform_0, window_bounds = array<i64: 256, 32>}, {pipeline_mode = #tpu.pipeline_mode<synchronous>, transform_indices = @transform_1, window_bounds = array<i64: 32, 384>}, {pipeline_mode = #tpu.pipeline_mode<synchronous>, transform_indices = @transform_2, window_bounds = array<i64: 1, 128>}, {pipeline_mode = #tpu.pipeline_mode<synchronous>, transform_indices = @transform_3, window_bounds = array<i64: 64, 384>}, {pipeline_mode = #tpu.pipeline_mode<synchronous>, transform_indices = @transform_4, window_bounds = array<i64: 1, 128>}, {pipeline_mode = #tpu.pipeline_mode<synchronous>, transform_indices = @transform_5, window_bounds = array<i64: 64, 384>}, {pipeline_mode = #tpu.pipeline_mode<synchronous>, transform_indices = @transform_6, window_bounds = array<i64: 1, 128>}, {pipeline_mode = #tpu.pipeline_mode<synchronous>, transform_indices = @transform_7, window_bounds = array<i64: 128, 384>}, {pipeline_mode = #tpu.pipeline_mode<synchronous>, transform_indices = @transform_8, window_bounds = array<i64: 1, 128>}, {pipeline_mode = #tpu.pipeline_mode<synchronous>, transform_indices = @transform_9, window_bounds = array<i64: 128, 768>}, {pipeline_mode = #tpu.pipeline_mode<synchronous>, transform_indices = @transform_10, window_bounds = array<i64: 1, 256>}, {pipeline_mode = #tpu.pipeline_mode<synchronous>, transform_indices = @transform_11, window_bounds = array<i64: 256, 768>}, {pipeline_mode = #tpu.pipeline_mode<synchronous>, transform_indices = @transform_12, window_bounds = array<i64: 1, 256>}, {pipeline_mode = #tpu.pipeline_mode<synchronous>, transform_indices = @transform_13, window_bounds = array<i64: 256, 2>}, {pipeline_mode = #tpu.pipeline_mode<synchronous>, transform_indices = @transform_14, window_bounds = array<i64: 128, 2>}, {pipeline_mode = #tpu.pipeline_mode<synchronous>, transform_indices = @transform_15, window_bounds = array<i64: 64, 2>}, {pipeline_mode = #tpu.pipeline_mode<synchronous>, transform_indices = @transform_16, window_bounds = array<i64: 32, 2>}, {pipeline_mode = #tpu.pipeline_mode<synchronous>, transform_indices = @transform_17, window_bounds = array<i64: 128, 256>}, {pipeline_mode = #tpu.pipeline_mode<synchronous>, transform_indices = @transform_18, window_bounds = array<i64: 64, 128>}, {pipeline_mode = #tpu.pipeline_mode<synchronous>, transform_indices = @transform_19, window_bounds = array<i64: 32, 64>}, {pipeline_mode = #tpu.pipeline_mode<synchronous>, transform_indices = @transform_20, window_bounds = array<i64: 16, 32>}, {pipeline_mode = #tpu.pipeline_mode<synchronous>, transform_indices = @transform_21, window_bounds = array<i64: 128, 64>}, {pipeline_mode = #tpu.pipeline_mode<synchronous>, transform_indices = @transform_22, window_bounds = array<i64: 128, 64>}, {pipeline_mode = #tpu.pipeline_mode<synchronous>, transform_indices = @transform_23, window_bounds = array<i64: 8, 16>}, {pipeline_mode = #tpu.pipeline_mode<synchronous>, transform_indices = @transform_24, window_bounds = array<i64: 512, 224>}, {pipeline_mode = #tpu.pipeline_mode<synchronous>, transform_indices = @transform_25, window_bounds = array<i64: 1, 224>}, {pipeline_mode = #tpu.pipeline_mode<synchronous>, transform_indices = @transform_26, window_bounds = array<i64: 224, 128>}, {pipeline_mode = #tpu.pipeline_mode<synchronous>, transform_indices = @transform_27, window_bounds = array<i64: 1, 128>}, {transform_indices = @transform_28, window_bounds = array<i64: 8, 128>}]} {
    %c0 = arith.constant 0 : index
    %c0_0 = arith.constant 0 : index
    %0 = vector.load %arg1[%c0, %c0_0] : memref<256x32xf32, #tpu.memory_space<vmem>>, vector<256x32xf32>
    %c0_1 = arith.constant 0 : index
    %c0_2 = arith.constant 0 : index
    %1 = vector.load %arg14[%c0_1, %c0_2] : memref<256x2xf32, #tpu.memory_space<vmem>>, vector<256x2xf32>
    %2 = arith.truncf %0 : vector<256x32xf32> to vector<256x32xbf16>
    %c0_3 = arith.constant 0 : index
    %c0_4 = arith.constant 0 : index
    %3 = vector.load %arg2[%c0_3, %c0_4] : memref<32x384xbf16, #tpu.memory_space<vmem>>, vector<32x384xbf16>
    %cst = arith.constant dense<0.000000e+00> : vector<256x384xf32>
    %4 = tpu.matmul %2, %3, %cst {dimension_numbers = #tpu.dot_dimension_numbers<[1], [0], [0], [1], [0, 0, 1, 1], [], []>} : vector<256x32xbf16>, vector<32x384xbf16>, vector<256x384xf32> -> vector<256x384xf32>
    %5 = vector.extract_strided_slice %4 {offsets = [0, 128], sizes = [256, 128], strides = [1, 1]} : vector<256x384xf32> to vector<256x128xf32>
    %6 = vector.extract_strided_slice %4 {offsets = [0, 0], sizes = [256, 128], strides = [1, 1]} : vector<256x384xf32> to vector<256x128xf32>
    %c1_i32 = arith.constant 1 : i32
    %7 = tpu.dynamic_rotate %6 by %c1_i32 dim 0 : vector<256x128xf32>, i32 -> vector<256x128xf32>
    %8 = vector.extract_strided_slice %1 {offsets = [0, 0], sizes = [256, 1], strides = [1, 1]} : vector<256x2xf32> to vector<256x1xf32>
    %9 = vector.broadcast %8 : vector<256x1xf32> to vector<256x128xf32>
    %10 = arith.mulf %7, %9 : vector<256x128xf32>
    %11 = arith.addf %5, %10 : vector<256x128xf32>
    %12 = vector.extract_strided_slice %4 {offsets = [0, 256], sizes = [256, 128], strides = [1, 1]} : vector<256x384xf32> to vector<256x128xf32>
    %c255_i32 = arith.constant 255 : i32
    %13 = tpu.dynamic_rotate %12 by %c255_i32 dim 0 : vector<256x128xf32>, i32 -> vector<256x128xf32>
    %14 = vector.extract_strided_slice %1 {offsets = [0, 1], sizes = [256, 1], strides = [1, 1]} : vector<256x2xf32> to vector<256x1xf32>
    %15 = vector.broadcast %14 : vector<256x1xf32> to vector<256x128xf32>
    %16 = arith.mulf %13, %15 : vector<256x128xf32>
    %17 = arith.addf %11, %16 : vector<256x128xf32>
    %c0_5 = arith.constant 0 : index
    %c0_6 = arith.constant 0 : index
    %18 = vector.load %arg3[%c0_5, %c0_6] : memref<1x128xf32, #tpu.memory_space<vmem>>, vector<1x128xf32>
    %19 = vector.broadcast %18 : vector<1x128xf32> to vector<256x128xf32>
    %20 = arith.addf %17, %19 : vector<256x128xf32>
    %cst_7 = arith.constant 0.000000e+00 : f32
    %21 = vector.broadcast %cst_7 : f32 to vector<256x128xf32>
    %22 = arith.maximumf %20, %21 : vector<256x128xf32>
    %c255_i32_8 = arith.constant 255 : i32
    %23 = tpu.dynamic_rotate %22 by %c255_i32_8 dim 0 : vector<256x128xf32>, i32 -> vector<256x128xf32>
    %24 = arith.maximumf %22, %23 : vector<256x128xf32>
    %c0_9 = arith.constant 0 : index
    %c0_10 = arith.constant 0 : index
    %25 = vector.load %arg18[%c0_9, %c0_10] : memref<128x256xbf16, #tpu.memory_space<vmem>>, vector<128x256xbf16>
    %26 = arith.truncf %24 : vector<256x128xf32> to vector<256x128xbf16>
    %cst_11 = arith.constant dense<0.000000e+00> : vector<128x128xf32>
    %27 = tpu.matmul %25, %26, %cst_11 {dimension_numbers = #tpu.dot_dimension_numbers<[1], [0], [0], [1], [0, 0, 1, 1], [], []>} : vector<128x256xbf16>, vector<256x128xbf16>, vector<128x128xf32> -> vector<128x128xf32>
    %c124_i32 = arith.constant 124 : i32
    %28 = tpu.dynamic_rotate %27 by %c124_i32 dim 1 : vector<128x128xf32>, i32 -> vector<128x128xf32>
    %29 = arith.maximumf %27, %28 : vector<128x128xf32>
    %30 = arith.truncf %29 : vector<128x128xf32> to vector<128x128xbf16>
    %c0_12 = arith.constant 0 : index
    %c0_13 = arith.constant 0 : index
    %31 = vector.load %arg22[%c0_12, %c0_13] : memref<128x64xbf16, #tpu.memory_space<vmem>>, vector<128x64xbf16>
    %cst_14 = arith.constant dense<0.000000e+00> : vector<128x64xf32>
    %32 = tpu.matmul %30, %31, %cst_14 {dimension_numbers = #tpu.dot_dimension_numbers<[1], [0], [0], [1], [0, 0, 1, 1], [], []>} : vector<128x128xbf16>, vector<128x64xbf16>, vector<128x64xf32> -> vector<128x64xf32>
    %c0_15 = arith.constant 0 : index
    %c0_16 = arith.constant 0 : index
    %33 = vector.load %arg15[%c0_15, %c0_16] : memref<128x2xf32, #tpu.memory_space<vmem>>, vector<128x2xf32>
    %34 = arith.truncf %32 : vector<128x64xf32> to vector<128x64xbf16>
    %c0_17 = arith.constant 0 : index
    %c0_18 = arith.constant 0 : index
    %35 = vector.load %arg4[%c0_17, %c0_18] : memref<64x384xbf16, #tpu.memory_space<vmem>>, vector<64x384xbf16>
    %cst_19 = arith.constant dense<0.000000e+00> : vector<128x384xf32>
    %36 = tpu.matmul %34, %35, %cst_19 {dimension_numbers = #tpu.dot_dimension_numbers<[1], [0], [0], [1], [0, 0, 1, 1], [], []>} : vector<128x64xbf16>, vector<64x384xbf16>, vector<128x384xf32> -> vector<128x384xf32>
    %37 = vector.extract_strided_slice %36 {offsets = [0, 128], sizes = [128, 128], strides = [1, 1]} : vector<128x384xf32> to vector<128x128xf32>
    %38 = vector.extract_strided_slice %36 {offsets = [0, 0], sizes = [128, 128], strides = [1, 1]} : vector<128x384xf32> to vector<128x128xf32>
    %c1_i32_20 = arith.constant 1 : i32
    %39 = tpu.dynamic_rotate %38 by %c1_i32_20 dim 0 : vector<128x128xf32>, i32 -> vector<128x128xf32>
    %40 = vector.extract_strided_slice %33 {offsets = [0, 0], sizes = [128, 1], strides = [1, 1]} : vector<128x2xf32> to vector<128x1xf32>
    %41 = vector.broadcast %40 : vector<128x1xf32> to vector<128x128xf32>
    %42 = arith.mulf %39, %41 : vector<128x128xf32>
    %43 = arith.addf %37, %42 : vector<128x128xf32>
    %44 = vector.extract_strided_slice %36 {offsets = [0, 256], sizes = [128, 128], strides = [1, 1]} : vector<128x384xf32> to vector<128x128xf32>
    %c127_i32 = arith.constant 127 : i32
    %45 = tpu.dynamic_rotate %44 by %c127_i32 dim 0 : vector<128x128xf32>, i32 -> vector<128x128xf32>
    %46 = vector.extract_strided_slice %33 {offsets = [0, 1], sizes = [128, 1], strides = [1, 1]} : vector<128x2xf32> to vector<128x1xf32>
    %47 = vector.broadcast %46 : vector<128x1xf32> to vector<128x128xf32>
    %48 = arith.mulf %45, %47 : vector<128x128xf32>
    %49 = arith.addf %43, %48 : vector<128x128xf32>
    %c0_21 = arith.constant 0 : index
    %c0_22 = arith.constant 0 : index
    %50 = vector.load %arg5[%c0_21, %c0_22] : memref<1x128xf32, #tpu.memory_space<vmem>>, vector<1x128xf32>
    %51 = vector.broadcast %50 : vector<1x128xf32> to vector<128x128xf32>
    %52 = arith.addf %49, %51 : vector<128x128xf32>
    %cst_23 = arith.constant 0.000000e+00 : f32
    %53 = vector.broadcast %cst_23 : f32 to vector<128x128xf32>
    %54 = arith.maximumf %52, %53 : vector<128x128xf32>
    %c127_i32_24 = arith.constant 127 : i32
    %55 = tpu.dynamic_rotate %54 by %c127_i32_24 dim 0 : vector<128x128xf32>, i32 -> vector<128x128xf32>
    %56 = arith.maximumf %54, %55 : vector<128x128xf32>
    %c0_25 = arith.constant 0 : index
    %c0_26 = arith.constant 0 : index
    %57 = vector.load %arg19[%c0_25, %c0_26] : memref<64x128xbf16, #tpu.memory_space<vmem>>, vector<64x128xbf16>
    %58 = arith.truncf %56 : vector<128x128xf32> to vector<128x128xbf16>
    %cst_27 = arith.constant dense<0.000000e+00> : vector<64x128xf32>
    %59 = tpu.matmul %57, %58, %cst_27 {dimension_numbers = #tpu.dot_dimension_numbers<[1], [0], [0], [1], [0, 0, 1, 1], [], []>} : vector<64x128xbf16>, vector<128x128xbf16>, vector<64x128xf32> -> vector<64x128xf32>
    %c120_i32 = arith.constant 120 : i32
    %60 = tpu.dynamic_rotate %59 by %c120_i32 dim 1 : vector<64x128xf32>, i32 -> vector<64x128xf32>
    %61 = arith.maximumf %59, %60 : vector<64x128xf32>
    %62 = arith.truncf %61 : vector<64x128xf32> to vector<64x128xbf16>
    %c0_28 = arith.constant 0 : index
    %c0_29 = arith.constant 0 : index
    %63 = vector.load %arg23[%c0_28, %c0_29] : memref<128x64xbf16, #tpu.memory_space<vmem>>, vector<128x64xbf16>
    %cst_30 = arith.constant dense<0.000000e+00> : vector<64x64xf32>
    %64 = tpu.matmul %62, %63, %cst_30 {dimension_numbers = #tpu.dot_dimension_numbers<[1], [0], [0], [1], [0, 0, 1, 1], [], []>} : vector<64x128xbf16>, vector<128x64xbf16>, vector<64x64xf32> -> vector<64x64xf32>
    %c0_31 = arith.constant 0 : index
    %c0_32 = arith.constant 0 : index
    %65 = vector.load %arg16[%c0_31, %c0_32] : memref<64x2xf32, #tpu.memory_space<vmem>>, vector<64x2xf32>
    %66 = arith.truncf %64 : vector<64x64xf32> to vector<64x64xbf16>
    %c0_33 = arith.constant 0 : index
    %c0_34 = arith.constant 0 : index
    %67 = vector.load %arg6[%c0_33, %c0_34] : memref<64x384xbf16, #tpu.memory_space<vmem>>, vector<64x384xbf16>
    %cst_35 = arith.constant dense<0.000000e+00> : vector<64x384xf32>
    %68 = tpu.matmul %66, %67, %cst_35 {dimension_numbers = #tpu.dot_dimension_numbers<[1], [0], [0], [1], [0, 0, 1, 1], [], []>} : vector<64x64xbf16>, vector<64x384xbf16>, vector<64x384xf32> -> vector<64x384xf32>
    %69 = vector.extract_strided_slice %68 {offsets = [0, 128], sizes = [64, 128], strides = [1, 1]} : vector<64x384xf32> to vector<64x128xf32>
    %70 = vector.extract_strided_slice %68 {offsets = [0, 0], sizes = [64, 128], strides = [1, 1]} : vector<64x384xf32> to vector<64x128xf32>
    %c1_i32_36 = arith.constant 1 : i32
    %71 = tpu.dynamic_rotate %70 by %c1_i32_36 dim 0 : vector<64x128xf32>, i32 -> vector<64x128xf32>
    %72 = vector.extract_strided_slice %65 {offsets = [0, 0], sizes = [64, 1], strides = [1, 1]} : vector<64x2xf32> to vector<64x1xf32>
    %73 = vector.broadcast %72 : vector<64x1xf32> to vector<64x128xf32>
    %74 = arith.mulf %71, %73 : vector<64x128xf32>
    %75 = arith.addf %69, %74 : vector<64x128xf32>
    %76 = vector.extract_strided_slice %68 {offsets = [0, 256], sizes = [64, 128], strides = [1, 1]} : vector<64x384xf32> to vector<64x128xf32>
    %c63_i32 = arith.constant 63 : i32
    %77 = tpu.dynamic_rotate %76 by %c63_i32 dim 0 : vector<64x128xf32>, i32 -> vector<64x128xf32>
    %78 = vector.extract_strided_slice %65 {offsets = [0, 1], sizes = [64, 1], strides = [1, 1]} : vector<64x2xf32> to vector<64x1xf32>
    %79 = vector.broadcast %78 : vector<64x1xf32> to vector<64x128xf32>
    %80 = arith.mulf %77, %79 : vector<64x128xf32>
    %81 = arith.addf %75, %80 : vector<64x128xf32>
    %c0_37 = arith.constant 0 : index
    %c0_38 = arith.constant 0 : index
    %82 = vector.load %arg7[%c0_37, %c0_38] : memref<1x128xf32, #tpu.memory_space<vmem>>, vector<1x128xf32>
    %83 = vector.broadcast %82 : vector<1x128xf32> to vector<64x128xf32>
    %84 = arith.addf %81, %83 : vector<64x128xf32>
    %cst_39 = arith.constant 0.000000e+00 : f32
    %85 = vector.broadcast %cst_39 : f32 to vector<64x128xf32>
    %86 = arith.maximumf %84, %85 : vector<64x128xf32>
    %c0_40 = arith.constant 0 : index
    %c0_41 = arith.constant 0 : index
    %87 = vector.load %arg16[%c0_40, %c0_41] : memref<64x2xf32, #tpu.memory_space<vmem>>, vector<64x2xf32>
    %88 = arith.truncf %86 : vector<64x128xf32> to vector<64x128xbf16>
    %c0_42 = arith.constant 0 : index
    %c0_43 = arith.constant 0 : index
    %89 = vector.load %arg8[%c0_42, %c0_43] : memref<128x384xbf16, #tpu.memory_space<vmem>>, vector<128x384xbf16>
    %cst_44 = arith.constant dense<0.000000e+00> : vector<64x384xf32>
    %90 = tpu.matmul %88, %89, %cst_44 {dimension_numbers = #tpu.dot_dimension_numbers<[1], [0], [0], [1], [0, 0, 1, 1], [], []>} : vector<64x128xbf16>, vector<128x384xbf16>, vector<64x384xf32> -> vector<64x384xf32>
    %91 = vector.extract_strided_slice %90 {offsets = [0, 128], sizes = [64, 128], strides = [1, 1]} : vector<64x384xf32> to vector<64x128xf32>
    %92 = vector.extract_strided_slice %90 {offsets = [0, 0], sizes = [64, 128], strides = [1, 1]} : vector<64x384xf32> to vector<64x128xf32>
    %c1_i32_45 = arith.constant 1 : i32
    %93 = tpu.dynamic_rotate %92 by %c1_i32_45 dim 0 : vector<64x128xf32>, i32 -> vector<64x128xf32>
    %94 = vector.extract_strided_slice %87 {offsets = [0, 0], sizes = [64, 1], strides = [1, 1]} : vector<64x2xf32> to vector<64x1xf32>
    %95 = vector.broadcast %94 : vector<64x1xf32> to vector<64x128xf32>
    %96 = arith.mulf %93, %95 : vector<64x128xf32>
    %97 = arith.addf %91, %96 : vector<64x128xf32>
    %98 = vector.extract_strided_slice %90 {offsets = [0, 256], sizes = [64, 128], strides = [1, 1]} : vector<64x384xf32> to vector<64x128xf32>
    %c63_i32_46 = arith.constant 63 : i32
    %99 = tpu.dynamic_rotate %98 by %c63_i32_46 dim 0 : vector<64x128xf32>, i32 -> vector<64x128xf32>
    %100 = vector.extract_strided_slice %87 {offsets = [0, 1], sizes = [64, 1], strides = [1, 1]} : vector<64x2xf32> to vector<64x1xf32>
    %101 = vector.broadcast %100 : vector<64x1xf32> to vector<64x128xf32>
    %102 = arith.mulf %99, %101 : vector<64x128xf32>
    %103 = arith.addf %97, %102 : vector<64x128xf32>
    %c0_47 = arith.constant 0 : index
    %c0_48 = arith.constant 0 : index
    %104 = vector.load %arg9[%c0_47, %c0_48] : memref<1x128xf32, #tpu.memory_space<vmem>>, vector<1x128xf32>
    %105 = vector.broadcast %104 : vector<1x128xf32> to vector<64x128xf32>
    %106 = arith.addf %103, %105 : vector<64x128xf32>
    %cst_49 = arith.constant 0.000000e+00 : f32
    %107 = vector.broadcast %cst_49 : f32 to vector<64x128xf32>
    %108 = arith.maximumf %106, %107 : vector<64x128xf32>
    %c63_i32_50 = arith.constant 63 : i32
    %109 = tpu.dynamic_rotate %108 by %c63_i32_50 dim 0 : vector<64x128xf32>, i32 -> vector<64x128xf32>
    %110 = arith.maximumf %108, %109 : vector<64x128xf32>
    %c0_51 = arith.constant 0 : index
    %c0_52 = arith.constant 0 : index
    %111 = vector.load %arg20[%c0_51, %c0_52] : memref<32x64xbf16, #tpu.memory_space<vmem>>, vector<32x64xbf16>
    %112 = arith.truncf %110 : vector<64x128xf32> to vector<64x128xbf16>
    %cst_53 = arith.constant dense<0.000000e+00> : vector<32x128xf32>
    %113 = tpu.matmul %111, %112, %cst_53 {dimension_numbers = #tpu.dot_dimension_numbers<[1], [0], [0], [1], [0, 0, 1, 1], [], []>} : vector<32x64xbf16>, vector<64x128xbf16>, vector<32x128xf32> -> vector<32x128xf32>
    %c0_54 = arith.constant 0 : index
    %c0_55 = arith.constant 0 : index
    %114 = vector.load %arg17[%c0_54, %c0_55] : memref<32x2xf32, #tpu.memory_space<vmem>>, vector<32x2xf32>
    %115 = arith.truncf %113 : vector<32x128xf32> to vector<32x128xbf16>
    %c0_56 = arith.constant 0 : index
    %c0_57 = arith.constant 0 : index
    %116 = vector.load %arg10[%c0_56, %c0_57] : memref<128x768xbf16, #tpu.memory_space<vmem>>, vector<128x768xbf16>
    %cst_58 = arith.constant dense<0.000000e+00> : vector<32x768xf32>
    %117 = tpu.matmul %115, %116, %cst_58 {dimension_numbers = #tpu.dot_dimension_numbers<[1], [0], [0], [1], [0, 0, 1, 1], [], []>} : vector<32x128xbf16>, vector<128x768xbf16>, vector<32x768xf32> -> vector<32x768xf32>
    %118 = vector.extract_strided_slice %117 {offsets = [0, 256], sizes = [32, 256], strides = [1, 1]} : vector<32x768xf32> to vector<32x256xf32>
    %119 = vector.extract_strided_slice %117 {offsets = [0, 0], sizes = [32, 256], strides = [1, 1]} : vector<32x768xf32> to vector<32x256xf32>
    %c1_i32_59 = arith.constant 1 : i32
    %120 = tpu.dynamic_rotate %119 by %c1_i32_59 dim 0 : vector<32x256xf32>, i32 -> vector<32x256xf32>
    %121 = vector.extract_strided_slice %114 {offsets = [0, 0], sizes = [32, 1], strides = [1, 1]} : vector<32x2xf32> to vector<32x1xf32>
    %122 = vector.broadcast %121 : vector<32x1xf32> to vector<32x256xf32>
    %123 = arith.mulf %120, %122 : vector<32x256xf32>
    %124 = arith.addf %118, %123 : vector<32x256xf32>
    %125 = vector.extract_strided_slice %117 {offsets = [0, 512], sizes = [32, 256], strides = [1, 1]} : vector<32x768xf32> to vector<32x256xf32>
    %c31_i32 = arith.constant 31 : i32
    %126 = tpu.dynamic_rotate %125 by %c31_i32 dim 0 : vector<32x256xf32>, i32 -> vector<32x256xf32>
    %127 = vector.extract_strided_slice %114 {offsets = [0, 1], sizes = [32, 1], strides = [1, 1]} : vector<32x2xf32> to vector<32x1xf32>
    %128 = vector.broadcast %127 : vector<32x1xf32> to vector<32x256xf32>
    %129 = arith.mulf %126, %128 : vector<32x256xf32>
    %130 = arith.addf %124, %129 : vector<32x256xf32>
    %c0_60 = arith.constant 0 : index
    %c0_61 = arith.constant 0 : index
    %131 = vector.load %arg11[%c0_60, %c0_61] : memref<1x256xf32, #tpu.memory_space<vmem>>, vector<1x256xf32>
    %132 = vector.broadcast %131 : vector<1x256xf32> to vector<32x256xf32>
    %133 = arith.addf %130, %132 : vector<32x256xf32>
    %cst_62 = arith.constant 0.000000e+00 : f32
    %134 = vector.broadcast %cst_62 : f32 to vector<32x256xf32>
    %135 = arith.maximumf %133, %134 : vector<32x256xf32>
    %c0_63 = arith.constant 0 : index
    %c0_64 = arith.constant 0 : index
    %136 = vector.load %arg17[%c0_63, %c0_64] : memref<32x2xf32, #tpu.memory_space<vmem>>, vector<32x2xf32>
    %137 = arith.truncf %135 : vector<32x256xf32> to vector<32x256xbf16>
    %c0_65 = arith.constant 0 : index
    %c0_66 = arith.constant 0 : index
    %138 = vector.load %arg12[%c0_65, %c0_66] : memref<256x768xbf16, #tpu.memory_space<vmem>>, vector<256x768xbf16>
    %cst_67 = arith.constant dense<0.000000e+00> : vector<32x768xf32>
    %139 = tpu.matmul %137, %138, %cst_67 {dimension_numbers = #tpu.dot_dimension_numbers<[1], [0], [0], [1], [0, 0, 1, 1], [], []>} : vector<32x256xbf16>, vector<256x768xbf16>, vector<32x768xf32> -> vector<32x768xf32>
    %140 = vector.extract_strided_slice %139 {offsets = [0, 256], sizes = [32, 256], strides = [1, 1]} : vector<32x768xf32> to vector<32x256xf32>
    %141 = vector.extract_strided_slice %139 {offsets = [0, 0], sizes = [32, 256], strides = [1, 1]} : vector<32x768xf32> to vector<32x256xf32>
    %c1_i32_68 = arith.constant 1 : i32
    %142 = tpu.dynamic_rotate %141 by %c1_i32_68 dim 0 : vector<32x256xf32>, i32 -> vector<32x256xf32>
    %143 = vector.extract_strided_slice %136 {offsets = [0, 0], sizes = [32, 1], strides = [1, 1]} : vector<32x2xf32> to vector<32x1xf32>
    %144 = vector.broadcast %143 : vector<32x1xf32> to vector<32x256xf32>
    %145 = arith.mulf %142, %144 : vector<32x256xf32>
    %146 = arith.addf %140, %145 : vector<32x256xf32>
    %147 = vector.extract_strided_slice %139 {offsets = [0, 512], sizes = [32, 256], strides = [1, 1]} : vector<32x768xf32> to vector<32x256xf32>
    %c31_i32_69 = arith.constant 31 : i32
    %148 = tpu.dynamic_rotate %147 by %c31_i32_69 dim 0 : vector<32x256xf32>, i32 -> vector<32x256xf32>
    %149 = vector.extract_strided_slice %136 {offsets = [0, 1], sizes = [32, 1], strides = [1, 1]} : vector<32x2xf32> to vector<32x1xf32>
    %150 = vector.broadcast %149 : vector<32x1xf32> to vector<32x256xf32>
    %151 = arith.mulf %148, %150 : vector<32x256xf32>
    %152 = arith.addf %146, %151 : vector<32x256xf32>
    %c0_70 = arith.constant 0 : index
    %c0_71 = arith.constant 0 : index
    %153 = vector.load %arg13[%c0_70, %c0_71] : memref<1x256xf32, #tpu.memory_space<vmem>>, vector<1x256xf32>
    %154 = vector.broadcast %153 : vector<1x256xf32> to vector<32x256xf32>
    %155 = arith.addf %152, %154 : vector<32x256xf32>
    %cst_72 = arith.constant 0.000000e+00 : f32
    %156 = vector.broadcast %cst_72 : f32 to vector<32x256xf32>
    %157 = arith.maximumf %155, %156 : vector<32x256xf32>
    %c31_i32_73 = arith.constant 31 : i32
    %158 = tpu.dynamic_rotate %157 by %c31_i32_73 dim 0 : vector<32x256xf32>, i32 -> vector<32x256xf32>
    %159 = arith.maximumf %157, %158 : vector<32x256xf32>
    %c0_74 = arith.constant 0 : index
    %c0_75 = arith.constant 0 : index
    %160 = vector.load %arg21[%c0_74, %c0_75] : memref<16x32xbf16, #tpu.memory_space<vmem>>, vector<16x32xbf16>
    %161 = arith.truncf %159 : vector<32x256xf32> to vector<32x256xbf16>
    %cst_76 = arith.constant dense<0.000000e+00> : vector<16x256xf32>
    %162 = tpu.matmul %160, %161, %cst_76 {dimension_numbers = #tpu.dot_dimension_numbers<[1], [0], [0], [1], [0, 0, 1, 1], [], []>} : vector<16x32xbf16>, vector<32x256xbf16>, vector<16x256xf32> -> vector<16x256xf32>
    %c15_i32 = arith.constant 15 : i32
    %163 = tpu.dynamic_rotate %162 by %c15_i32 dim 0 : vector<16x256xf32>, i32 -> vector<16x256xf32>
    %164 = tpu.concatenate %162, %163 in 1 : vector<16x256xf32>, vector<16x256xf32> -> vector<16x512xf32>
    %c0_77 = arith.constant 0 : index
    %c0_78 = arith.constant 0 : index
    %165 = vector.load %arg24[%c0_77, %c0_78] : memref<8x16xbf16, #tpu.memory_space<vmem>>, vector<8x16xbf16>
    %166 = arith.truncf %164 : vector<16x512xf32> to vector<16x512xbf16>
    %cst_79 = arith.constant dense<0.000000e+00> : vector<8x512xf32>
    %167 = tpu.matmul %165, %166, %cst_79 {dimension_numbers = #tpu.dot_dimension_numbers<[1], [0], [0], [1], [0, 0, 1, 1], [], []>} : vector<8x16xbf16>, vector<16x512xbf16>, vector<8x512xf32> -> vector<8x512xf32>
    %168 = arith.truncf %167 : vector<8x512xf32> to vector<8x512xbf16>
    %c0_80 = arith.constant 0 : index
    %c0_81 = arith.constant 0 : index
    %169 = vector.load %arg25[%c0_80, %c0_81] : memref<512x224xbf16, #tpu.memory_space<vmem>>, vector<512x224xbf16>
    %cst_82 = arith.constant dense<0.000000e+00> : vector<8x224xf32>
    %170 = tpu.matmul %168, %169, %cst_82 {dimension_numbers = #tpu.dot_dimension_numbers<[1], [0], [0], [1], [0, 0, 1, 1], [], []>} : vector<8x512xbf16>, vector<512x224xbf16>, vector<8x224xf32> -> vector<8x224xf32>
    %c0_83 = arith.constant 0 : index
    %c0_84 = arith.constant 0 : index
    %171 = vector.load %arg26[%c0_83, %c0_84] : memref<1x224xf32, #tpu.memory_space<vmem>>, vector<1x224xf32>
    %172 = vector.broadcast %171 : vector<1x224xf32> to vector<8x224xf32>
    %173 = arith.addf %170, %172 : vector<8x224xf32>
    %cst_85 = arith.constant 0.000000e+00 : f32
    %174 = vector.broadcast %cst_85 : f32 to vector<8x224xf32>
    %175 = arith.maximumf %173, %174 : vector<8x224xf32>
    %176 = arith.truncf %175 : vector<8x224xf32> to vector<8x224xbf16>
    %c0_86 = arith.constant 0 : index
    %c0_87 = arith.constant 0 : index
    %177 = vector.load %arg27[%c0_86, %c0_87] : memref<224x128xbf16, #tpu.memory_space<vmem>>, vector<224x128xbf16>
    %cst_88 = arith.constant dense<0.000000e+00> : vector<8x128xf32>
    %178 = tpu.matmul %176, %177, %cst_88 {dimension_numbers = #tpu.dot_dimension_numbers<[1], [0], [0], [1], [0, 0, 1, 1], [], []>} : vector<8x224xbf16>, vector<224x128xbf16>, vector<8x128xf32> -> vector<8x128xf32>
    %c0_89 = arith.constant 0 : index
    %c0_90 = arith.constant 0 : index
    %179 = vector.load %arg28[%c0_89, %c0_90] : memref<1x128xf32, #tpu.memory_space<vmem>>, vector<1x128xf32>
    %180 = vector.broadcast %179 : vector<1x128xf32> to vector<8x128xf32>
    %181 = arith.addf %178, %180 : vector<8x128xf32>
    %c0_91 = arith.constant 0 : index
    %c0_92 = arith.constant 0 : index
    %182 = vector.load %arg29[%c0_91, %c0_92] : memref<8x128xf32, #tpu.memory_space<vmem>>, vector<8x128xf32>
    tpu.vector_store %arg29[%c0_91, %c0_92], %181 {strides = array<i32>} : memref<8x128xf32, #tpu.memory_space<vmem>>, vector<8x128xf32>,
    return
  }
  func.func @transform_0(%arg0: i32) -> (i32, i32) {
    %c0_i32 = arith.constant 0 : i32
    %c0_i32_0 = arith.constant 0 : i32
    return %arg0, %c0_i32 : i32, i32
  }
  func.func @transform_1(%arg0: i32) -> (i32, i32) {
    %c0_i32 = arith.constant 0 : i32
    %c0_i32_0 = arith.constant 0 : i32
    %c0_i32_1 = arith.constant 0 : i32
    return %c0_i32, %c0_i32_0 : i32, i32
  }
  func.func @transform_2(%arg0: i32) -> (i32, i32) {
    %c0_i32 = arith.constant 0 : i32
    %c0_i32_0 = arith.constant 0 : i32
    %c0_i32_1 = arith.constant 0 : i32
    return %c0_i32, %c0_i32_0 : i32, i32
  }
  func.func @transform_3(%arg0: i32) -> (i32, i32) {
    %c0_i32 = arith.constant 0 : i32
    %c0_i32_0 = arith.constant 0 : i32
    %c0_i32_1 = arith.constant 0 : i32
    return %c0_i32, %c0_i32_0 : i32, i32
  }
  func.func @transform_4(%arg0: i32) -> (i32, i32) {
    %c0_i32 = arith.constant 0 : i32
    %c0_i32_0 = arith.constant 0 : i32
    %c0_i32_1 = arith.constant 0 : i32
    return %c0_i32, %c0_i32_0 : i32, i32
  }
  func.func @transform_5(%arg0: i32) -> (i32, i32) {
    %c0_i32 = arith.constant 0 : i32
    %c0_i32_0 = arith.constant 0 : i32
    %c0_i32_1 = arith.constant 0 : i32
    return %c0_i32, %c0_i32_0 : i32, i32
  }
  func.func @transform_6(%arg0: i32) -> (i32, i32) {
    %c0_i32 = arith.constant 0 : i32
    %c0_i32_0 = arith.constant 0 : i32
    %c0_i32_1 = arith.constant 0 : i32
    return %c0_i32, %c0_i32_0 : i32, i32
  }
  func.func @transform_7(%arg0: i32) -> (i32, i32) {
    %c0_i32 = arith.constant 0 : i32
    %c0_i32_0 = arith.constant 0 : i32
    %c0_i32_1 = arith.constant 0 : i32
    return %c0_i32, %c0_i32_0 : i32, i32
  }
  func.func @transform_8(%arg0: i32) -> (i32, i32) {
    %c0_i32 = arith.constant 0 : i32
    %c0_i32_0 = arith.constant 0 : i32
    %c0_i32_1 = arith.constant 0 : i32
    return %c0_i32, %c0_i32_0 : i32, i32
  }
  func.func @transform_9(%arg0: i32) -> (i32, i32) {
    %c0_i32 = arith.constant 0 : i32
    %c0_i32_0 = arith.constant 0 : i32
    %c0_i32_1 = arith.constant 0 : i32
    return %c0_i32, %c0_i32_0 : i32, i32
  }
  func.func @transform_10(%arg0: i32) -> (i32, i32) {
    %c0_i32 = arith.constant 0 : i32
    %c0_i32_0 = arith.constant 0 : i32
    %c0_i32_1 = arith.constant 0 : i32
    return %c0_i32, %c0_i32_0 : i32, i32
  }
  func.func @transform_11(%arg0: i32) -> (i32, i32) {
    %c0_i32 = arith.constant 0 : i32
    %c0_i32_0 = arith.constant 0 : i32
    %c0_i32_1 = arith.constant 0 : i32
    return %c0_i32, %c0_i32_0 : i32, i32
  }
  func.func @transform_12(%arg0: i32) -> (i32, i32) {
    %c0_i32 = arith.constant 0 : i32
    %c0_i32_0 = arith.constant 0 : i32
    %c0_i32_1 = arith.constant 0 : i32
    return %c0_i32, %c0_i32_0 : i32, i32
  }
  func.func @transform_13(%arg0: i32) -> (i32, i32) {
    %c0_i32 = arith.constant 0 : i32
    %c0_i32_0 = arith.constant 0 : i32
    %c0_i32_1 = arith.constant 0 : i32
    return %c0_i32, %c0_i32_0 : i32, i32
  }
  func.func @transform_14(%arg0: i32) -> (i32, i32) {
    %c0_i32 = arith.constant 0 : i32
    %c0_i32_0 = arith.constant 0 : i32
    %c0_i32_1 = arith.constant 0 : i32
    return %c0_i32, %c0_i32_0 : i32, i32
  }
  func.func @transform_15(%arg0: i32) -> (i32, i32) {
    %c0_i32 = arith.constant 0 : i32
    %c0_i32_0 = arith.constant 0 : i32
    %c0_i32_1 = arith.constant 0 : i32
    return %c0_i32, %c0_i32_0 : i32, i32
  }
  func.func @transform_16(%arg0: i32) -> (i32, i32) {
    %c0_i32 = arith.constant 0 : i32
    %c0_i32_0 = arith.constant 0 : i32
    %c0_i32_1 = arith.constant 0 : i32
    return %c0_i32, %c0_i32_0 : i32, i32
  }
  func.func @transform_17(%arg0: i32) -> (i32, i32) {
    %c0_i32 = arith.constant 0 : i32
    %c0_i32_0 = arith.constant 0 : i32
    %c0_i32_1 = arith.constant 0 : i32
    return %c0_i32, %c0_i32_0 : i32, i32
  }
  func.func @transform_18(%arg0: i32) -> (i32, i32) {
    %c0_i32 = arith.constant 0 : i32
    %c0_i32_0 = arith.constant 0 : i32
    %c0_i32_1 = arith.constant 0 : i32
    return %c0_i32, %c0_i32_0 : i32, i32
  }
  func.func @transform_19(%arg0: i32) -> (i32, i32) {
    %c0_i32 = arith.constant 0 : i32
    %c0_i32_0 = arith.constant 0 : i32
    %c0_i32_1 = arith.constant 0 : i32
    return %c0_i32, %c0_i32_0 : i32, i32
  }
  func.func @transform_20(%arg0: i32) -> (i32, i32) {
    %c0_i32 = arith.constant 0 : i32
    %c0_i32_0 = arith.constant 0 : i32
    %c0_i32_1 = arith.constant 0 : i32
    return %c0_i32, %c0_i32_0 : i32, i32
  }
  func.func @transform_21(%arg0: i32) -> (i32, i32) {
    %c0_i32 = arith.constant 0 : i32
    %c0_i32_0 = arith.constant 0 : i32
    %c0_i32_1 = arith.constant 0 : i32
    return %c0_i32, %c0_i32_0 : i32, i32
  }
  func.func @transform_22(%arg0: i32) -> (i32, i32) {
    %c0_i32 = arith.constant 0 : i32
    %c0_i32_0 = arith.constant 0 : i32
    %c0_i32_1 = arith.constant 0 : i32
    return %c0_i32, %c0_i32_0 : i32, i32
  }
  func.func @transform_23(%arg0: i32) -> (i32, i32) {
    %c0_i32 = arith.constant 0 : i32
    %c0_i32_0 = arith.constant 0 : i32
    %c0_i32_1 = arith.constant 0 : i32
    return %c0_i32, %c0_i32_0 : i32, i32
  }
  func.func @transform_24(%arg0: i32) -> (i32, i32) {
    %c0_i32 = arith.constant 0 : i32
    %c0_i32_0 = arith.constant 0 : i32
    %c0_i32_1 = arith.constant 0 : i32
    return %c0_i32, %c0_i32_0 : i32, i32
  }
  func.func @transform_25(%arg0: i32) -> (i32, i32) {
    %c0_i32 = arith.constant 0 : i32
    %c0_i32_0 = arith.constant 0 : i32
    %c0_i32_1 = arith.constant 0 : i32
    return %c0_i32, %c0_i32_0 : i32, i32
  }
  func.func @transform_26(%arg0: i32) -> (i32, i32) {
    %c0_i32 = arith.constant 0 : i32
    %c0_i32_0 = arith.constant 0 : i32
    %c0_i32_1 = arith.constant 0 : i32
    return %c0_i32, %c0_i32_0 : i32, i32
  }
  func.func @transform_27(%arg0: i32) -> (i32, i32) {
    %c0_i32 = arith.constant 0 : i32
    %c0_i32_0 = arith.constant 0 : i32
    %c0_i32_1 = arith.constant 0 : i32
    return %c0_i32, %c0_i32_0 : i32, i32
  }
  func.func @transform_28(%arg0: i32) -> (i32, i32) {
    %c0_i32 = arith.constant 0 : i32
    %c0_i32_0 = arith.constant 0 : i32
    return %arg0, %c0_i32 : i32, i32
  }
}

</mosaic_0001>

<bundles_post_ra>
// kernel: model_forward.1
= control target key start
LH: loop header
LB: loop body
LE: loop exit
PB: predicated region body
PF: predicated region fallthrough
CT: control target
= control target key end

     0   :  { %s11992_s0 = inlined_call_operand.vmem [shape: f32[512,32], index: 0, kind: input, shape index: {}]   ;;  %s11993_s1 = inlined_call_operand.hbm [shape: bf16[32,384], index: 1, kind: input, shape index: {}]   ;;  %s11994_s2 = inlined_call_operand.hbm [shape: f32[1,128], index: 2, kind: input, shape index: {}]   ;;  %s11995_s3 = inlined_call_operand.hbm [shape: bf16[64,384], index: 3, kind: input, shape index: {}]   ;;  %s11996_s4 = inlined_call_operand.hbm [shape: f32[1,128], index: 4, kind: input, shape index: {}]   ;;  %s11997_s5 = inlined_call_operand.hbm [shape: bf16[64,384], index: 5, kind: input, shape index: {}]   ;;  %s11998_s6 = inlined_call_operand.hbm [shape: f32[1,128], index: 6, kind: input, shape index: {}]   ;;  %s11999_s7 = inlined_call_operand.vmem [shape: bf16[128,384], index: 7, kind: input, shape index: {}]   ;;  %s12000_s8 = inlined_call_operand.hbm [shape: f32[1,128], index: 8, kind: input, shape index: {}]   ;;  %s12001_s9 = inlined_call_operand.hbm [shape: bf16[128,768], index: 9, kind: input, shape index: {}]   ;;  %s12002_s10 = inlined_call_operand.hbm [shape: f32[1,256], index: 10, kind: input, shape index: {}]   ;;  %s12003_s11 = inlined_call_operand.vmem [shape: bf16[256,768], index: 11, kind: input, shape index: {}]   ;;  %s12004_s12 = inlined_call_operand.hbm [shape: f32[1,256], index: 12, kind: input, shape index: {}]   ;;  %s12005_s13 = inlined_call_operand.vmem [shape: f32[256,2], index: 13, kind: input, shape index: {}]   ;;  %s12006_s14 = inlined_call_operand.vmem [shape: f32[128,2], index: 14, kind: input, shape index: {}]   ;;  %s12007_s15 = inlined_call_operand.vmem [shape: f32[64,2], index: 15, kind: input, shape index: {}]   ;;  %s12008_s16 = inlined_call_operand.vmem [shape: f32[32,2], index: 16, kind: input, shape index: {}]   ;;  %s12009_s17 = inlined_call_operand.vmem [shape: bf16[128,256], index: 17, kind: input, shape index: {}]   ;;  %s12010_s18 = inlined_call_operand.hbm [shape: bf16[64,128], index: 18, kind: input, shape index: {}]   ;;  %s12011_s19 = inlined_call_operand.hbm [shape: bf16[32,64], index: 19, kind: input, shape index: {}]   ;;  %s12012_s20 = inlined_call_operand.vmem [shape: bf16[16,32], index: 20, kind: input, shape index: {}]   ;;  %s12013_s21 = inlined_call_operand.vmem [shape: bf16[128,64], index: 21, kind: input, shape index: {}]   ;;  %s12014_s22 = inlined_call_operand.vmem [shape: bf16[128,64], index: 22, kind: input, shape index: {}]   ;;  %s12015_s23 = inlined_call_operand.vmem [shape: bf16[8,16], index: 23, kind: input, shape index: {}]   ;;  %s12016_s24 = inlined_call_operand.vmem [shape: bf16[512,224], index: 24, kind: input, shape index: {}]   ;;  %s12017_s25 = inlined_call_operand.hbm [shape: f32[1,224], index: 25, kind: input, shape index: {}]   ;;  %s12018_s26 = inlined_call_operand.hbm [shape: bf16[224,128], index: 26, kind: input, shape index: {}]   ;;  %s12019_s27 = inlined_call_operand.hbm [shape: f32[1,128], index: 27, kind: input, shape index: {}]   ;;  %s12020_s28 = inlined_call_operand.vmem [shape: f32[16,128], index: 28, kind: output, shape index: {}]  }
   0x1   :  { %12074 = sst [smem:[#allocation78_spill]] %s11992_s0 }
   0x2   :  { %12075 = sst [smem:[#allocation79_spill]] %s11993_s1 }
   0x3   :  { %12076 = sst [smem:[#allocation80_spill]] %s11994_s2 }
   0x4   :  { %12077 = sst [smem:[#allocation81_spill]] %s11995_s3 }
   0x5   :  { %12078 = sst [smem:[#allocation82_spill]] %s11996_s4 }
   0x6   :  { %12079 = sst [smem:[#allocation83_spill]] %s11997_s5 }
   0x7   :  { %12080 = sst [smem:[#allocation84_spill]] %s11998_s6 }
   0x8   :  { %12081 = sst [smem:[#allocation85_spill]] %s11999_s7 }
   0x9   :  { %12082 = sst [smem:[#allocation86_spill]] %s12000_s8 }
   0xa   :  { %12083 = sst [smem:[#allocation87_spill]] %s12001_s9 }
   0xb   :  { %12084 = sst [smem:[#allocation88_spill]] %s12002_s10 }
   0xc   :  { %12085 = sst [smem:[#allocation89_spill]] %s12003_s11 }
   0xd   :  { %12086 = sst [smem:[#allocation90_spill]] %s12004_s12 }
   0xe   :  { %12087 = sst [smem:[#allocation91_spill]] %s12020_s28 }
   0xf   :  { %33 = vsyncpa [#allocation3], 0 }
  0x10   :  { %34 = vsyncpa [#allocation5], 0 }
  0x11   :  { %35 = vsyncpa [#allocation8], 0 }
  0x12   :  { %36 = vsyncpa [#allocation11], 0 }
  0x13   :  { %37 = vsyncpa [#allocation14], 0 }
  0x14   :  { %38 = vsyncpa [#allocation17], 0 }
  0x15   :  { %39 = vsyncpa [#allocation20], 0 }
  0x16   :  { %40 = vsyncpa [#allocation23], 0  ;;  %s9107_s8 = smov 0  }
  0x17 LB: > { %12088 = sst [smem:[#allocation33_spill]] %s8935_s8  ;;  %s8937_s5 = smov [#allocation4]   ;;  %s8935_s8 = sphi %s9107_s8, %s46_s8  }
  0x18   : > { %s696_s9 = sshll.u32 %s8937_s5, 4  ;;  %s9113_s30 = sadd.s32 4294967295, %s8935_s8   ;;  %s697_s9 = int_to_ptr.vmem [resolvable:$true] %s696_s9 }
  0x19   : > { %p7002_p0 = scmp.ge.s32.totalorder %s8935_s8, 1  ;;  %p670_p1 = scmp.lt.s32.totalorder %s8935_s8, 3 }
  0x1a   : > { %p12026_p2 = scmp.eq.s32.totalorder %s9113_s30, 0  ;;  %s8938_s6 = smov [#allocation7]  }
  0x1b   : > { %p9118_p3 = pnand %p7002_p0, %p670_p1  ;;  %s720_s10 = sshll.u32 %s8938_s6, 4  ;;  %s9124_s10 = int_to_ptr.vmem [resolvable:$true] %s720_s10 }
  0x1c   : > { %s8939_s0 = smov [#allocation10]   ;;  %s8940_s2 = smov [#allocation13]  }
  0x1d   : > { %s12089_s3 = scalar_select %p9118_p3, 1, 0 }
  0x1e   : > { %p7838_p4 = pneg %p9118_p3  ;;  %s744_s11 = sshll.u32 %s8939_s0, 4  ;;  %s9132_s11 = int_to_ptr.vmem [resolvable:$true] %s744_s11 }
  0x1f   : > { %s768_s7 = sshll.u32 %s8940_s2, 4  ;;  %s8518_s1 = scalar_lea.vmem %s697_s9, 16  ;;  %s9134_s7 = int_to_ptr.vmem [resolvable:$true] %s768_s7 }
  0x20   : > { %p9128_p5 = pnand %p12026_p2, %p7838_p4  ;;  %p8519_p7 = scmp.ne.s32.totalorder %s697_s9, %s8518_s1 }
  0x21   : > { %s8525_s4 = scalar_lea.vmem %s697_s9, 32  ;;  %p8526_p10 = scmp.lt.s32.totalorder %s697_s9, %s697_s9 }
  0x22   : > { %p9138_p6 = pneg %p9128_p5  ;;  %p8527_p11 = scmp.lt.s32.totalorder %s8525_s4, %s8518_s1 }
  0x24   : > { %p8521_p8 = pnand %p8519_p7, %p9138_p6  ;;  %p8528_p12 = por %p8527_p11, %p8526_p10 }
  0x26   : > { %p8522_p9 = pneg %p8521_p8 }
  0x28   : > { %p8529_p13 = pnand %p8528_p12, %p8522_p9 }
  0x2a   : > { %8532 = shalt.err (!%p8529_p13)
}
  0x2b   : > { %s12092_s0 = sld [smem:[#allocation80_spill]]  ;;  %s8544_s2 = scalar_lea.vmem %s9124_s10, 16 }
  0x2c   : > { %p8545_p0 = scmp.ne.s32.totalorder %s9124_s10, %s8544_s2  ;;  %s8551_s1 = scalar_lea.vmem %s9124_s10, 32 }
  0x2d   : > { %p8552_p7 = scmp.lt.s32.totalorder %s9124_s10, %s9124_s10  ;;  %p8553_p8 = scmp.lt.s32.totalorder %s8551_s1, %s8544_s2 }
  0x2e   : > { %p8547_p1 = pnand %p8545_p0, %p9138_p6 }
  0x2f   : > { %p8554_p9 = por %p8553_p8, %p8552_p7 }
  0x30   : > { %p8548_p4 = pneg %p8547_p1 }
  0x31   : > { %7844 = dma.hbm_to_vmem [thread:$0]  (!%p9128_p5), %s12092_s0, 16, %s697_s9, [#allocation5]  }
  0x32   : > { %p8555_p10 = pnand %p8554_p9, %p8548_p4 }
  0x34   : > { %8558 = shalt.err (!%p8555_p10)
}
  0x35   : > { %s12093_s6 = sld [smem:[#allocation82_spill]]  ;;  %s8570_s9 = scalar_lea.vmem %s9132_s11, 16 }
  0x36   : > { %p8571_p11 = scmp.ne.s32.totalorder %s9132_s11, %s8570_s9  ;;  %s8577_s0 = scalar_lea.vmem %s9132_s11, 32 }
  0x37   : > { %p8578_p0 = scmp.lt.s32.totalorder %s9132_s11, %s9132_s11  ;;  %p8579_p1 = scmp.lt.s32.totalorder %s8577_s0, %s8570_s9 }
  0x38   : > { %p8573_p12 = pnand %p8571_p11, %p9138_p6 }
  0x39   : > { %p8580_p4 = por %p8579_p1, %p8578_p0 }
  0x3a   : > { %p8574_p13 = pneg %p8573_p12 }
  0x3b   : > { %7850 = dma.hbm_to_vmem [thread:$0]  (!%p9128_p5), %s12093_s6, 16, %s9124_s10, [#allocation8]  }
  0x3c   : > { %p8581_p7 = pnand %p8580_p4, %p8574_p13 }
  0x3e   : > { %8584 = shalt.err (!%p8581_p7)
}
  0x3f   : > { %s12094_s4 = sld [smem:[#allocation84_spill]]  ;;  %s8596_s10 = scalar_lea.vmem %s9134_s7, 6144 }
  0x40   : > { %p8597_p8 = scmp.ne.s32.totalorder %s9134_s7, %s8596_s10  ;;  %p8604_p11 = scmp.lt.s32.totalorder %s9134_s7, %s9134_s7 }
  0x41   : > { %p8605_p12 = scmp.lt.s32.totalorder %s8596_s10, %s8596_s10 }
  0x42   : > { %p8599_p9 = pnand %p8597_p8, %p9138_p6 }
  0x43   : > { %p8606_p13 = por %p8605_p12, %p8604_p11 }
  0x44   : > { %p8600_p10 = pneg %p8599_p9 }
  0x45   : > { %7856 = dma.hbm_to_vmem [thread:$0]  (!%p9128_p5), %s12094_s4, 16, %s9132_s11, [#allocation11]  }
  0x46   : > { %p8607_p0 = pnand %p8606_p13, %p8600_p10 }
  0x48   : > { %8610 = shalt.err (!%p8607_p0)
}
  0x49   : > { %s8941_s5 = smov 384   ;;  %s8942_s6 = smov 24  }
  0x4a   : > { %s12095_s11 = sld [smem:[#allocation87_spill]]  ;;  %s8943_s2 = smov [#allocation16]  }
  0x4b   : > { %s796_s1 = sshll.u32 %s8943_s2, 4  ;;  %s797_s1 = int_to_ptr.vmem [resolvable:$true] %s796_s1 }
  0x4c   : > { %s8622_s4 = scalar_lea.vmem %s797_s1, 32  ;;  %p8630_p8 = scmp.lt.s32.totalorder %s797_s1, %s797_s1 }
  0x4d   : > { %p8623_p1 = scmp.ne.s32.totalorder %s797_s1, %s8622_s4  ;;  %p8631_p9 = scmp.lt.s32.totalorder %s8622_s4, %s8622_s4 }
  0x4f   : > { %p8625_p4 = pnand %p8623_p1, %p9138_p6  ;;  %p8632_p10 = por %p8631_p9, %p8630_p8 }
  0x50   : > { %7862 = dma.hbm_to_vmem [thread:$0]  (!%p9128_p5), %s12095_s11, 6144, %s9134_s7, [#allocation14], %s8941_s5, %s8941_s5, %s8942_s6  }
  0x51   : > { %p8626_p7 = pneg %p8625_p4 }
  0x53   : > { %p8633_p11 = pnand %p8632_p10, %p8626_p7 }
  0x55   : > { %8636 = shalt.err (!%p8633_p11)
}
  0x56   : > { %s12096_s28 = sld [smem:[#allocation90_spill]]  ;;  %s8944_s7 = smov [#allocation19]  }
  0x57   : > { %s834_s5 = sshll.u32 %s8944_s7, 4  ;;  %s8945_s6 = smov [#allocation22]   ;;  %s835_s5 = int_to_ptr.vmem [resolvable:$true] %s834_s5 }
  0x58   : > { %s873_s9 = sshll.u32 %s8945_s6, 4  ;;  %s8648_s0 = scalar_lea.vmem %s835_s5, 256  ;;  %s874_s9 = int_to_ptr.vmem [resolvable:$true] %s873_s9 }
  0x59   : > { %p8649_p12 = scmp.ne.s32.totalorder %s835_s5, %s8648_s0  ;;  %p8656_p1 = scmp.lt.s32.totalorder %s835_s5, %s835_s5 }
  0x5a   : > { %p8657_p4 = scmp.lt.s32.totalorder %s8648_s0, %s8648_s0 }
  0x5b   : > { %p8651_p13 = pnand %p8649_p12, %p9138_p6 }
  0x5c   : > { %7868 = dma.hbm_to_vmem [thread:$0]  (!%p9128_p5), %s12096_s28, 32, %s797_s1, [#allocation17]  }
  0x5d   : > { %p8652_p0 = pneg %p8651_p13  ;;  %p8658_p7 = por %p8657_p4, %p8656_p1 }
  0x5f   : > { %p8659_p8 = pnand %p8658_p7, %p8652_p0 }
  0x61   : > { %8662 = shalt.err (!%p8659_p8)
}
  0x62   : > { %s12024_s11 = smov 64   ;;  %s12025_s28 = smov 4  }
  0x63   : > { %7874 = dma.hbm_to_vmem [thread:$0]  (!%p9128_p5), %s12011_s19, 256, %s835_s5, [#allocation20], %s12024_s11, %s12024_s11, %s12025_s28  }
  0x64   : > { %s8674_s1 = scalar_lea.vmem %s874_s9, 1792  ;;  %p8682_p12 = scmp.lt.s32.totalorder %s874_s9, %s874_s9 }
  0x65   : > { %p8675_p9 = scmp.ne.s32.totalorder %s874_s9, %s8674_s1  ;;  %p8683_p13 = scmp.lt.s32.totalorder %s8674_s1, %s8674_s1 }
  0x67   : > { %p8677_p10 = pnand %p8675_p9, %p9138_p6  ;;  %p8684_p0 = por %p8683_p13, %p8682_p12 }
  0x69   : > { %p8678_p11 = pneg %p8677_p10 }
  0x6b   : > { %p8685_p1 = pnand %p8684_p0, %p8678_p11 }
  0x6d   : > { %8688 = shalt.err (!%p8685_p1)
}
  0x6e   : > { %7880 = dma.hbm_to_vmem [thread:$0]  (!%p9128_p5), %s12018_s26, 1792, %s874_s9, [#allocation23], %s12024_s11, %s12024_s11, %s12025_s28  }
  0x6f   : > { %s8948_s7 = smov [#allocation2]  }
  0x70   : > { %s682_s5 = sshll.u32 %s8948_s7, 4  ;;  %s683_s5 = int_to_ptr.vmem [resolvable:$true] %s682_s5 }
  0x71   : > { %s8700_s6 = scalar_lea.vmem %s683_s5, 768  ;;  %p8708_p9 = scmp.lt.s32.totalorder %s683_s5, %s683_s5 }
  0x72   : > { %p8701_p4 = scmp.ne.s32.totalorder %s683_s5, %s8700_s6  ;;  %p8709_p10 = scmp.lt.s32.totalorder %s8700_s6, %s8700_s6 }
  0x74   : > { %p8703_p7 = pnand %p8701_p4, %p9138_p6  ;;  %p8710_p11 = por %p8709_p10, %p8708_p9 }
  0x76   : > { %p8704_p8 = pneg %p8703_p7 }
  0x78   : > { %p8711_p12 = pnand %p8710_p11, %p8704_p8 }
  0x7a   : > { %8714 = shalt.err (!%p8711_p12)
}
  0x7b   : > { %s8949_s0 = smov 192   ;;  %s8950_s8 = smov 12  }
  0x7c   : > { %s12097_s1 = sld [smem:[#allocation79_spill]]  ;;  %s8951_s4 = smov [#allocation6]  }
  0x7d   : > { %s706_s10 = sshll.u32 %s8951_s4, 4  ;;  %s8952_s7 = smov [#allocation9]   ;;  %s707_s10 = int_to_ptr.vmem [resolvable:$true] %s706_s10 }
  0x7e   : > { %s730_s6 = sshll.u32 %s8952_s7, 4  ;;  %s8726_s11 = scalar_lea.vmem %s707_s10, 1536  ;;  %s731_s6 = int_to_ptr.vmem [resolvable:$true] %s730_s6 }
  0x7f   : > { %p8727_p13 = scmp.ne.s32.totalorder %s707_s10, %s8726_s11  ;;  %p8734_p4 = scmp.lt.s32.totalorder %s707_s10, %s707_s10 }
  0x80   : > { %p8735_p7 = scmp.lt.s32.totalorder %s8726_s11, %s8726_s11 }
  0x81   : > { %p8729_p0 = pnand %p8727_p13, %p9138_p6 }
  0x82   : > { %7841 = dma.hbm_to_vmem [thread:$0]  (!%p9128_p5), %s12097_s1, 768, %s683_s5, [#allocation3], %s8949_s0, %s8949_s0, %s8950_s8  }
  0x83   : > { %p8730_p1 = pneg %p8729_p0  ;;  %p8736_p8 = por %p8735_p7, %p8734_p4 }
  0x85   : > { %p8737_p9 = pnand %p8736_p8, %p8730_p1 }
  0x87   : > { %8740 = shalt.err (!%p8737_p9)
}
  0x88   : > { %s12098_s2 = sld [smem:[#allocation81_spill]]  ;;  %s8752_s1 = scalar_lea.vmem %s731_s6, 1536 }
  0x89   : > { %p8753_p10 = scmp.ne.s32.totalorder %s731_s6, %s8752_s1  ;;  %p8760_p13 = scmp.lt.s32.totalorder %s731_s6, %s731_s6 }
  0x8a   : > { %p8761_p0 = scmp.lt.s32.totalorder %s8752_s1, %s8752_s1 }
  0x8b   : > { %p8755_p11 = pnand %p8753_p10, %p9138_p6 }
  0x8c   : > { %p8762_p1 = por %p8761_p0, %p8760_p13 }
  0x8d   : > { %p8756_p12 = pneg %p8755_p11 }
  0x8e   : > { %7847 = dma.hbm_to_vmem [thread:$0]  (!%p9128_p5), %s12098_s2, 1536, %s707_s10, [#allocation5], %s8949_s0, %s8949_s0, %s8950_s8  }
  0x8f   : > { %p8763_p4 = pnand %p8762_p1, %p8756_p12 }
  0x91   : > { %8766 = shalt.err (!%p8763_p4)
}
  0x92   : > { %s12099_s7 = sld [smem:[#allocation83_spill]]  ;;  %s8953_s10 = smov [#allocation12]  }
  0x93   : > { %s758_s5 = sshll.u32 %s8953_s10, 4  ;;  %s8954_s9 = smov [#allocation15]   ;;  %s759_s5 = int_to_ptr.vmem [resolvable:$true] %s758_s5 }
  0x94   : > { %s782_s2 = sshll.u32 %s8954_s9, 4  ;;  %s8778_s28 = scalar_lea.vmem %s759_s5, 16  ;;  %s783_s2 = int_to_ptr.vmem [resolvable:$true] %s782_s2 }
  0x95   : > { %p8779_p7 = scmp.ne.s32.totalorder %s759_s5, %s8778_s28  ;;  %s8785_s1 = scalar_lea.vmem %s759_s5, 32 }
  0x96   : > { %p8786_p10 = scmp.lt.s32.totalorder %s759_s5, %s759_s5  ;;  %p8787_p11 = scmp.lt.s32.totalorder %s8785_s1, %s8778_s28 }
  0x97   : > { %p8781_p8 = pnand %p8779_p7, %p9138_p6 }
  0x98   : > { %7853 = dma.hbm_to_vmem [thread:$0]  (!%p9128_p5), %s12099_s7, 1536, %s731_s6, [#allocation8], %s8949_s0, %s8949_s0, %s8950_s8  }
  0x99   : > { %p8782_p9 = pneg %p8781_p8  ;;  %p8788_p12 = por %p8787_p11, %p8786_p10 }
  0x9b   : > { %p8789_p13 = pnand %p8788_p12, %p8782_p9 }
  0x9d   : > { %8792 = shalt.err (!%p8789_p13)
}
  0x9e   : > { %s12100_s8 = sld [smem:[#allocation86_spill]]  ;;  %s8804_s6 = scalar_lea.vmem %s783_s2, 32 }
  0x9f   : > { %p8805_p0 = scmp.ne.s32.totalorder %s783_s2, %s8804_s6  ;;  %p8812_p7 = scmp.lt.s32.totalorder %s783_s2, %s783_s2 }
  0xa0   : > { %p8813_p8 = scmp.lt.s32.totalorder %s8804_s6, %s8804_s6 }
  0xa1   : > { %p8807_p1 = pnand %p8805_p0, %p9138_p6 }
  0xa2   : > { %p8814_p2 = por %p8813_p8, %p8812_p7 }
  0xa3   : > { %p8808_p4 = pneg %p8807_p1 }
  0xa4   : > { %7859 = dma.hbm_to_vmem [thread:$0]  (!%p9128_p5), %s12100_s8, 16, %s759_s5, [#allocation11]  }
  0xa5   : > { %p8815_p3 = pnand %p8814_p2, %p8808_p4 }
  0xa7   : > { %8818 = shalt.err (!%p8815_p3)
}
  0xa8   : > { %s12101_s7 = sld [smem:[#allocation88_spill]]  ;;  %s8955_s10 = smov [#allocation18]  }
  0xa9   : > { %s821_s5 = sshll.u32 %s8955_s10, 4  ;;  %s8956_s9 = smov [#allocation21]   ;;  %s822_s5 = int_to_ptr.vmem [resolvable:$true] %s821_s5 }
  0xaa   : > { %s863_s1 = sshll.u32 %s8956_s9, 4  ;;  %s8830_s11 = scalar_lea.vmem %s822_s5, 512  ;;  %s864_s1 = int_to_ptr.vmem [resolvable:$true] %s863_s1 }
  0xab   : > { %p8831_p9 = scmp.ne.s32.totalorder %s822_s5, %s8830_s11  ;;  %p8838_p12 = scmp.lt.s32.totalorder %s822_s5, %s822_s5 }
  0xac   : > { %p8839_p2 = scmp.lt.s32.totalorder %s8830_s11, %s8830_s11 }
  0xad   : > { %p8833_p10 = pnand %p8831_p9, %p9138_p6 }
  0xae   : > { %7865 = dma.hbm_to_vmem [thread:$0]  (!%p9128_p5), %s12101_s7, 32, %s783_s2, [#allocation14]  }
  0xaf   : > { %p8834_p11 = pneg %p8833_p10  ;;  %p8840_p3 = por %p8839_p2, %p8838_p12 }
  0xb1   : > { %p8841_p13 = pnand %p8840_p3, %p8834_p11 }
  0xb3   : > { %8844 = shalt.err (!%p8841_p13)
}
  0xb4   : > { %s12102_s0 = smov 4   ;;  %s12103_s8 = smov 64  }
  0xb5   : > { %7871 = dma.hbm_to_vmem [thread:$0]  (!%p9128_p5), %s12010_s18, 512, %s822_s5, [#allocation17], %s12103_s8, %s12103_s8, %s12102_s0  }
  0xb6   : > { %s8856_s28 = scalar_lea.vmem %s864_s1, 32  ;;  %p8864_p7 = scmp.lt.s32.totalorder %s864_s1, %s864_s1 }
  0xb7   : > { %p8857_p0 = scmp.ne.s32.totalorder %s864_s1, %s8856_s28  ;;  %p8865_p8 = scmp.lt.s32.totalorder %s8856_s28, %s8856_s28 }
  0xb9   : > { %p8859_p1 = pnand %p8857_p0, %p9138_p6  ;;  %p8866_p9 = por %p8865_p8, %p8864_p7 }
  0xbb   : > { %p8860_p4 = pneg %p8859_p1 }
  0xbd   : > { %p8867_p10 = pnand %p8866_p9, %p8860_p4 }
  0xbf   : > { %8870 = shalt.err (!%p8867_p10)
}
  0xc0   : > { %7877 = dma.hbm_to_vmem [thread:$0]  (!%p9128_p5), %s12017_s25, 32, %s864_s1, [#allocation20]  }
  0xc1   : > { %s8957_s10 = smov [#allocation24]  }
  0xc2   : > { %s887_s5 = sshll.u32 %s8957_s10, 4  ;;  %s888_s5 = int_to_ptr.vmem [resolvable:$true] %s887_s5 }
  0xc3   : > { %s8882_s9 = scalar_lea.vmem %s888_s5, 16  ;;  %s8889_s11 = scalar_lea.vmem %s888_s5, 32 }
  0xc4   : > { %p8883_p11 = scmp.ne.s32.totalorder %s888_s5, %s8882_s9  ;;  %p8890_p3 = scmp.lt.s32.totalorder %s888_s5, %s888_s5 }
  0xc5   : > { %p8891_p13 = scmp.lt.s32.totalorder %s8889_s11, %s8882_s9 }
  0xc6   : > { %p8885_p12 = pnand %p8883_p11, %p9138_p6 }
  0xc7   : > { %p8892_p0 = por %p8891_p13, %p8890_p3 }
  0xc8   : > { %p8886_p2 = pneg %p8885_p12 }
  0xca   : > { %p8893_p1 = pnand %p8892_p0, %p8886_p2 }
  0xcc   : > { %8896 = shalt.err (!%p8893_p1)
}
  0xcd   : > { %7883 = dma.hbm_to_vmem [thread:$0]  (!%p9128_p5), %s12019_s27, 16, %s888_s5, [#allocation23]  }
  0xce   : > { %p12104_p4 = scmp.ne.s32.totalorder %s12089_s3, 0 }
  0xd0   : > { %909 = sbr.rel (%p12104_p4) target bundleno = 4019 (0xfb3), region = 132 }
  0xd5   : > { %p12105_p7 = scmp.eq.s32.totalorder %s9113_s30, 0 }
  0xd7   : > { %8902 = dma.done.wait (%p12105_p7), [#allocation3], 768   ;;  %p12106_p6 = pmov %p12105_p7 }
  0xd9   : > { %8904 = vsyncadd (%p12106_p6), [#allocation3], 4294966528  ;;  %p12107_p8 = pmov %p12106_p6 }
  0xda   : > { %p12108_p9 = pmov %p12106_p6 }
  0xdb   : > { %8906 = dma.done.wait (%p12107_p8), [#allocation5], 1552  }
  0xdc   : > { %8908 = vsyncadd (%p12108_p9), [#allocation5], 4294965744  ;;  %p12109_p10 = pmov %p12106_p6 }
  0xdd   : > { %p12110_p5 = pmov %p12106_p6 }
  0xde   : > { %8910 = dma.done.wait (%p12109_p10), [#allocation8], 1552  }
  0xdf   : > { %8912 = vsyncadd (%p12110_p5), [#allocation8], 4294965744  ;;  %p12111_p11 = pmov %p12110_p5 }
  0xe0   : > { %p12112_p12 = pmov %p12110_p5 }
  0xe1   : > { %8914 = dma.done.wait (%p12111_p11), [#allocation11], 32  }
  0xe2   : > { %8916 = vsyncadd (%p12112_p12), [#allocation11], 4294967264  ;;  %p12113_p2 = pmov %p12110_p5 }
  0xe4   : > { %8918 = dma.done.wait (%p12113_p2), [#allocation14], 6176   ;;  %p12114_p3 = pmov %p12113_p2 }
  0xe5   : > { %p12115_p13 = pmov %p12113_p2 }
  0xe6   : > { %8920 = vsyncadd (%p12114_p3), [#allocation14], 4294961120 }
  0xe7   : > { %8922 = dma.done.wait (%p12115_p13), [#allocation17], 544   ;;  %p12116_p0 = pmov %p12113_p2 }
  0xe9   : > { %8924 = vsyncadd (%p12116_p0), [#allocation17], 4294966752  ;;  %p12117_p1 = pmov %p12116_p0 }
  0xea   : > { %p12118_p4 = pmov %p12116_p0 }
  0xeb   : > { %8926 = dma.done.wait (%p12117_p1), [#allocation20], 288  }
  0xec   : > { %8928 = vsyncadd (%p12118_p4), [#allocation20], 4294967008  ;;  %p12119_p7 = pmov %p12116_p0 }
  0xed   : > { %p12120_p6 = pmov %p12116_p0 }
  0xee   : > { %8930 = dma.done.wait (%p12119_p7), [#allocation23], 1808  }
  0xef   : > { %8932 = vsyncadd (%p12120_p6), [#allocation23], 4294965488  ;;  %s7035_s3 = sshll.u32 %s9113_s30, 5  ;;  %v12030_v0 = vmov 0   ;;  %v1112_v1 = vld [vmem:[%s12005_s13 + $0xf8] sm:$0xff]  ;;  %v9327_v2 = vld [vmem:[%s12005_s13] sm:$0xff] }
  0xf0   : > { %7948 = vset.pattern.permute.xlu1 %v12030_v0  ;;  %7947 = vset.pattern.permute.xlu0 %v12030_v0  ;;  %p1039_p8 = scmp.lt.s32.totalorder %s7035_s3, 63  ;;  %v8061_v3 = vld [vmem:[#allocation2 + $0x1c] ss:$12 sps:$4 sm:$0xff]   ;;  %v8063_v4 = vld [vmem:[#allocation2 + $0x18] ss:$12 sps:$4 sm:$0xff]   ;;  %s12121_s7 = sld [smem:[#allocation78_spill]] }
  0xf1   : > { %1250 = vmatprep.mubr.bf16.mxu0 %v12030_v0  ;;  %1390 = vmatprep.mubr.bf16.mxu1 %v12030_v0  ;;  %v9338_v5 = vld [vmem:[%s12005_s13 + $0x70] sm:$0xff]  ;;  %v8066_v8 = vld [vmem:[#allocation2] ss:$12 sps:$4 sm:$0xff]   ;;  %v1096_v14 = vld [vmem:[%s12005_s13 + $0x78] sm:$0xff]  ;;  %vm1169_vm0 = vcmask 261120   ;;  %v12028_v24 = vmov 1  }
  0xf2   : > { %s12285_s3 = smov (!%p1039_p8, %s7035_s3), 63  ;;  %1796 = vperm.xlu1 %7948, %v1112_v1   ;;  %1641 = vperm.xlu0 %7947, %v9327_v2   ;;  %v1111_v6 = vld [vmem:[%s12005_s13 + $0xf0] sm:$0xff]  ;;  %v9351_v13 = vld [vmem:[%s12005_s13 + $0x80] sm:$0xff]  ;;  %v9362_v18 = vld [vmem:[%s12005_s13 + $0xe8] sm:$0xff]  ;;  %s8960_s12 = smov 124   ;;  %vm2817_vm3 = vcmask 523264  }
  0xf3   : > { %s7036_s29 = sshll.u32 %s12285_s3, 3  ;;  %1230 = vmatprep.subr.bf16.mxu0 %v8061_v3  ;;  %7774 = vmatprep.subr.bf16.mxu1 %v8061_v3  ;;  %v8064_v7 = vld [vmem:[#allocation2 + $0x4] ss:$12 sps:$4 sm:$0xff]   ;;  %v8067_v17 = vld [vmem:[#allocation2 + $0x20] ss:$12 sps:$4 sm:$0xff]   ;;  %v9378_v25 = vld [vmem:[%s12005_s13 + $0xd8] sm:$0xff] }
  0xf4   : > { %1231 = vmatpush1.bf16.msra.mxu0 %v8063_v4  ;;  %7776 = vmatpush1.bf16.msra.mxu1 %v8063_v4  ;;  %v8068_v20 = vld [vmem:[#allocation2 + $0x8] ss:$12 sps:$4 sm:$0xff]   ;;  %v9399_v31 = vld [vmem:[%s12005_s13 + $0xb8] sm:$0xff]  ;;  %v1109_v33 = vld [vmem:[%s12005_s13 + $0xe0] sm:$0xff]  ;;  %s8961_s28 = smov 120   ;;  %s12280_s5 = sld [smem:[#allocation85_spill]] }
  0xf5   : > { %1232 = vmatprep.subr.bf16.mxu0 %v8064_v7  ;;  %7775 = vmatprep.subr.bf16.mxu1 %v8064_v7  ;;  %v9386_v28 = vld [vmem:[%s12005_s13 + $0xc8] sm:$0xff]  ;;  %v1093_v35 = vld [vmem:[%s12005_s13 + $0x60] sm:$0xff]  ;;  %v1100_v38 = vld [vmem:[%s12005_s13 + $0x98] sm:$0xff]  ;;  %vm6066_vm4 = vcmask 130048   ;;  %vm6757_vm5 = vcmask 785408   ;;  %p1044_p9 = scmp.lt.s32.totalorder %s9113_s30, 1 }
  0xf6   : > { %s9333_s10 = scalar_lea.vmem %s12121_s7, %s7036_s29  ;;  %1711 = vperm.xlu1 %7948, %v9338_v5   ;;  %1791 = vperm.xlu0 %7947, %v1111_v6   ;;  %v9408_v34 = vld [vmem:[%s12005_s13 + $0xa8] sm:$0xff]  ;;  %v1107_v52 = vld [vmem:[%s12005_s13 + $0xd0] sm:$0xff]  ;;  %v1092_v60 = vld [vmem:[%s12005_s13 + $0x58] sm:$0xff]  ;;  %s12282_s11 = sld [smem:[#allocation91_spill]] }
  0xf7   : > { %v1049_v9 = vld [vmem:[%s9333_s10] sm:$0xff]  ;;  %v1050_v10 = vld [vmem:[%s9333_s10 + $0x8] sm:$0xff]  ;;  %v1051_v19 = vld [vmem:[%s9333_s10 + $0x10] sm:$0xff]  ;;  %s12287_s30 = smov (!%p1044_p9, %s9113_s30), 1 }
  0xf8   : > { %v1077_v11 = vld [vmem:[%s9333_s10 + $0xe0] sm:$0xff]  ;;  %v1078_v12 = vld [vmem:[%s9333_s10 + $0xe8] sm:$0xff]  ;;  %v1113_v15 = vpack.c.bf16 %v1050_v10, %v1049_v9  ;;  %1233 = vmatpush1.bf16.msra.mxu0 %v8066_v8  ;;  %7777 = vmatpush1.bf16.msra.mxu1 %v8066_v8  ;;  %v1052_v21 = vld [vmem:[%s9333_s10 + $0x18] sm:$0xff]  ;;  %s7037_s4 = sshll.u32 %s12287_s30, 3 }
  0xf9   : > { %v9356_v16 = vpack.c.bf16 %v1078_v12, %v1077_v11  ;;  %7582 = vmatprep.subr.bf16.mxu1 %v8067_v17  ;;  %v1079_v22 = vld [vmem:[%s9333_s10 + $0xf0] sm:$0xff]  ;;  %v1080_v23 = vld [vmem:[%s9333_s10 + $0xf8] sm:$0xff]  ;;  %v1114_v26 = vpack.c.bf16 %v1052_v21, %v1051_v19  ;;  %v1053_v29 = vld [vmem:[%s9333_s10 + $0x20] sm:$0xff] }
  0xfa   : > { %1721 = vperm.xlu1 %7948, %v9351_v13   ;;  %1716 = vperm.xlu0 %7947, %v1096_v14   ;;  %v9380_v27 = vpack.c.bf16 %v1080_v23, %v1079_v22  ;;  %v1054_v30 = vld [vmem:[%s9333_s10 + $0x28] sm:$0xff]  ;;  %v1055_v36 = vld [vmem:[%s9333_s10 + $0x30] sm:$0xff]  ;;  %v1056_v37 = vld [vmem:[%s9333_s10 + $0x38] sm:$0xff] }
  0xfb   : > { %7044 = vmatmul.mubr.msk.bf16.vlgmr.msra.gmra.mxu0 %vm1169_vm0, %v1113_v15  ;;  %7058 = vmatmul.mubr.msk.bf16.vlgmr.msra.gmra.mxu1 %vm1169_vm0, %v9356_v16  ;;  %v1115_v32 = vpack.c.bf16 %v1054_v30, %v1053_v29  ;;  %v1057_v39 = vld [vmem:[%s9333_s10 + $0x40] sm:$0xff]  ;;  %v1094_v40 = vld [vmem:[%s12005_s13 + $0x68] sm:$0xff]  ;;  %v1116_v42 = vpack.c.bf16 %v1056_v37, %v1055_v36  ;;  %v1059_v44 = vld [vmem:[%s9333_s10 + $0x50] sm:$0xff] }
  0xfc   : > { %1260 = vmatprep.mubr.bf16.mxu0 %v12030_v0  ;;  %1400 = vmatprep.mubr.bf16.mxu1 %v12030_v0  ;;  %v1058_v41 = vld [vmem:[%s9333_s10 + $0x48] sm:$0xff]  ;;  %v1060_v45 = vld [vmem:[%s9333_s10 + $0x58] sm:$0xff]  ;;  %v1061_v46 = vld [vmem:[%s9333_s10 + $0x60] sm:$0xff]  ;;  %s1047_s0 = scalar_lea.vmem %s12282_s11, %s7037_s4 }
  0xfd   : > { %7583 = vmatpush3.bf16.msra.mxu1 %v8067_v17  ;;  %v1117_v43 = vpack.c.bf16 %v1058_v41, %v1057_v39  ;;  %v1062_v47 = vld [vmem:[%s9333_s10 + $0x68] sm:$0xff]  ;;  %v1118_v48 = vpack.c.bf16 %v1060_v45, %v1059_v44  ;;  %v1063_v50 = vld [vmem:[%s9333_s10 + $0x70] sm:$0xff]  ;;  %v1064_v51 = vld [vmem:[%s9333_s10 + $0x78] sm:$0xff] }
  0xfe   : > { %7949 = vset.pattern.permute.xlu1 %v12028_v24  ;;  %1786 = vperm.xlu0 %7947, %v9362_v18   ;;  %v1119_v49 = vpack.c.bf16 %v1062_v47, %v1061_v46  ;;  %v1065_v53 = vld [vmem:[%s9333_s10 + $0x80] sm:$0xff]  ;;  %v1066_v54 = vld [vmem:[%s9333_s10 + $0x88] sm:$0xff]  ;;  %v1120_v55 = vpack.c.bf16 %v1064_v51, %v1063_v50  ;;  %v1091_v56 = vld [vmem:[%s12005_s13 + $0x50] sm:$0xff] }
  0xff   : > { %2049 = vperm.xlu1 %7949, %v1111_v6   ;;  %7584 = vmatprep.subr.bf16.mxu1 %v8068_v20  ;;  %v1121_v57 = vpack.c.bf16 %v1066_v54, %v1065_v53  ;;  %v1067_v58 = vld [vmem:[%s9333_s10 + $0x90] sm:$0xff]  ;;  %v1068_v59 = vld [vmem:[%s9333_s10 + $0x98] sm:$0xff]  ;;  %v1069_v61 = vld [vmem:[%s9333_s10 + $0xa0] sm:$0xff] }
 0x100   : > { %v1070_v62 = vld [vmem:[%s9333_s10 + $0xa8] sm:$0xff]  ;;  %v1122_v63 = vpack.c.bf16 %v1068_v59, %v1067_v58  ;;  %v1072_v3 = vld [vmem:[%s9333_s10 + $0xb8] sm:$0xff]  ;;  %v1073_v4 = vld [vmem:[%s9333_s10 + $0xc0] sm:$0xff] }
 0x101   : > { %7585 = vmatpush3.bf16.msra.mxu1 %v8068_v20  ;;  %v1105_v6 = vld [vmem:[%s12005_s13 + $0xc0] sm:$0xff]  ;;  %v1090_v8 = vld [vmem:[%s12005_s13 + $0x48] sm:$0xff]  ;;  %v1075_v10 = vld [vmem:[%s9333_s10 + $0xd0] sm:$0xff] }
 0x102   : > { %1776 = vperm.xlu0 %7947, %v9378_v25   ;;  %v1076_v11 = vld [vmem:[%s9333_s10 + $0xd8] sm:$0xff]  ;;  %v1103_v12 = vld [vmem:[%s12005_s13 + $0xb0] sm:$0xff]  ;;  %v1101_v17 = vld [vmem:[%s12005_s13 + $0xa0] sm:$0xff] }
 0x103   : > { %2053 = vperm.xlu1 %7949, %v1112_v1   ;;  %7045 = vmatmul.mubr.msk.bf16.gmra.mxu0 %vm1169_vm0, %v1114_v26  ;;  %v1123_v1 = vpack.c.bf16 %v1070_v62, %v1069_v61  ;;  %v1084_v19 = vld [vmem:[%s12005_s13 + $0x18] sm:$0xff]  ;;  %v1087_v20 = vld [vmem:[%s12005_s13 + $0x30] sm:$0xff]  ;;  %v1082_v21 = vld [vmem:[%s12005_s13 + $0x8] sm:$0xff]  ;;  %v1604_v62 = vlaneseq }
 0x104   : > { %7059 = vmatmul.mubr.msk.bf16.gmra.mxu1 %vm1169_vm0, %v9380_v27  ;;  %1270 = vmatprep.mubr.bf16.mxu0 %v12030_v0  ;;  %v1085_v22 = vld [vmem:[%s12005_s13 + $0x20] sm:$0xff] }
 0x105   : > { %7586 = vmatprep.mubr.msk.bf16.mxu1 %vm1169_vm0, %v1113_v15  ;;  %v1088_v15 = vld [vmem:[%s12005_s13 + $0x38] sm:$0xff] }
 0x106   : > { %1766 = vperm.xlu0 %7947, %v9386_v28  }
 0x107   : > { %1989 = vperm.xlu1 %7949, %v1096_v14   ;;  %v1126_v14 = vpack.c.bf16 %v1076_v11, %v1075_v10 }
 0x10a   : > { %1756 = vperm.xlu0 %7947, %v9399_v31  }
 0x10b   : > { %7950 = vset.pattern.permute.xlu1 %v12030_v0  ;;  %7046 = vmatmul.mubr.msk.bf16.gmra.mxu0 %vm1169_vm0, %v1115_v32 }
 0x10c   : > { %1781 = vperm.xlu1 %7950, %v1109_v33   ;;  %7587 = vmatmul.mubr.msk.bf16.vlgmr.msra.gmra.mxu1 %vm1169_vm0, %v1114_v26 }
 0x10d   : > { %1280 = vmatprep.mubr.bf16.mxu0 %v12030_v0  ;;  %7590 = vmatprep.mubr.msk.bf16.mxu1 %vm1169_vm0, %v1115_v32 }
 0x10e   : > { %1746 = vperm.xlu0 %7947, %v9408_v34  }
 0x110   : > { %1701 = vperm.xlu1 %7950, %v1093_v35  }
 0x112   : > { %1736 = vperm.xlu0 %7947, %v1100_v38   ;;  %v8506_v38 = vld [vmem:[%s12005_s13 + $0x98] sm:$0xff] }
 0x113   : > { %7047 = vmatmul.mubr.msk.bf16.gmra.mxu0 %vm1169_vm0, %v1116_v42 }
 0x114   : > { %1706 = vperm.xlu1 %7950, %v1094_v40   ;;  %7591 = vmatmul.mubr.msk.bf16.gmra.mxu1 %vm1169_vm0, %v1116_v42 }
 0x115   : > { %1290 = vmatprep.mubr.bf16.mxu0 %v12030_v0  ;;  %7594 = vmatprep.mubr.msk.bf16.mxu1 %vm1169_vm0, %v1117_v43 }
 0x116   : > { %7961 = vset.pattern.permute.xlu0 %v12028_v24 }
 0x117   : > { %1929 = vperm.xlu0 %7961, %v9327_v2   ;;  %v1071_v2 = vld [vmem:[%s9333_s10 + $0xb0] sm:$0xff] }
 0x118   : > { %7951 = vset.pattern.permute.xlu1 %v12028_v24  ;;  %v1124_v7 = vpack.c.bf16 %v1072_v3, %v1071_v2 }
 0x119   : > { %2045 = vperm.xlu1 %7951, %v9362_v18   ;;  %v1086_v18 = vld [vmem:[%s12005_s13 + $0x28] sm:$0xff] }
 0x11b   : > { %1985 = vperm.xlu0 %7961, %v9338_v5   ;;  %7048 = vmatmul.mubr.msk.bf16.gmra.mxu0 %vm1169_vm0, %v1117_v43  ;;  %v1074_v5 = vld [vmem:[%s9333_s10 + $0xc8] sm:$0xff] }
 0x11c   : > { %7595 = vmatmul.mubr.msk.bf16.gmra.mxu1 %vm1169_vm0, %v1118_v48  ;;  %1300 = vmatprep.mubr.bf16.mxu0 %v12030_v0  ;;  %v1125_v9 = vpack.c.bf16 %v1074_v5, %v1073_v4  ;;  %v1098_v43 = vld [vmem:[%s12005_s13 + $0x88] sm:$0xff]  ;;  %v9638_v4 = vshrl.u32 %v1604_v62, 7 }
 0x11d   : > { %1977 = vperm.xlu1 %7951, %v1093_v35   ;;  %7598 = vmatprep.mubr.msk.bf16.mxu1 %vm1169_vm0, %v1119_v49 }
 0x11e   : > { %vm1606_vm1 = vcmp.lt.s32.totalorder %v9638_v4, 1  ;;  %vm1895_vm2 = vcmp.lt.s32.totalorder %v9638_v4, 7 }
 0x11f   : > { %1993 = vperm.xlu0 %7961, %v9351_v13   ;;  %v1089_v13 = vld [vmem:[%s12005_s13 + $0x40] sm:$0xff] }
 0x121   : > { %7952 = vset.pattern.permute.xlu1 %v12030_v0 }
 0x122   : > { %1771 = vperm.xlu1 %7952, %v1107_v52  }
 0x123   : > { %2041 = vperm.xlu0 %7961, %v1109_v33   ;;  %7049 = vmatmul.mubr.msk.bf16.gmra.mxu0 %vm1169_vm0, %v1118_v48 }
 0x124   : > { %7599 = vmatmul.mubr.msk.bf16.gmra.mxu1 %vm1169_vm0, %v1120_v55  ;;  %1310 = vmatprep.mubr.bf16.mxu0 %v12030_v0 }
 0x125   : > { %7602 = vmatprep.mubr.msk.bf16.mxu1 %vm1169_vm0, %v1121_v57 }
 0x126   : > { %1691 = vperm.xlu1 %7952, %v1091_v56  }
 0x127   : > { %1981 = vperm.xlu0 %7961, %v1094_v40  }
 0x12a   : > { %1696 = vperm.xlu1 %7952, %v1092_v60  }
 0x12b   : > { %2033 = vperm.xlu0 %7961, %v1107_v52   ;;  %7050 = vmatmul.mubr.msk.bf16.gmra.mxu0 %vm1169_vm0, %v1119_v49 }
 0x12c   : > { %7603 = vmatmul.mubr.msk.bf16.gmra.mxu1 %vm1169_vm0, %v1122_v63  ;;  %1320 = vmatprep.mubr.bf16.mxu0 %v12030_v0 }
 0x12d   : > { %7606 = vmatprep.mubr.msk.bf16.mxu1 %vm1169_vm0, %v1123_v1 }
 0x12e   : > { %7953 = vset.pattern.permute.xlu1 %v12028_v24 }
 0x12f   : > { %2037 = vperm.xlu1 %7953, %v9378_v25   ;;  %1973 = vperm.xlu0 %7961, %v1092_v60  }
 0x133   : > { %1969 = vperm.xlu1 %7953, %v1091_v56   ;;  %2025 = vperm.xlu0 %7961, %v1105_v6  }
 0x134   : > { %7051 = vmatmul.mubr.msk.bf16.gmra.mxu0 %vm1169_vm0, %v1120_v55  ;;  %7607 = vmatmul.mubr.msk.bf16.gmra.mxu1 %vm1169_vm0, %v1124_v7 }
 0x135   : > { %1330 = vmatprep.mubr.bf16.mxu0 %v12030_v0  ;;  %7610 = vmatprep.mubr.msk.bf16.mxu1 %vm1169_vm0, %v1125_v9 }
 0x137   : > { %7954 = vset.pattern.permute.xlu1 %v12030_v0  ;;  %1965 = vperm.xlu0 %7961, %v1090_v8  }
 0x138   : > { %1761 = vperm.xlu1 %7954, %v1105_v6  }
 0x13b   : > { %2017 = vperm.xlu0 %7961, %v1103_v12  }
 0x13c   : > { %1681 = vperm.xlu1 %7954, %v1089_v13   ;;  %7052 = vmatmul.mubr.msk.bf16.gmra.mxu0 %vm1169_vm0, %v1121_v57 }
 0x13d   : > { %7611 = vmatmul.mubr.msk.bf16.gmra.mxu1 %vm1169_vm0, %v1126_v14  ;;  %1340 = vmatprep.mubr.bf16.mxu0 %v12030_v0 }
 0x13e   : > { %7614 = vmatprep.mubr.msk.bf16.mxu1 %vm1169_vm0, %v9356_v16  ;;  %v1099_v16 = vld [vmem:[%s12005_s13 + $0x90] sm:$0xff] }
 0x13f   : > { %1957 = vperm.xlu0 %7961, %v1088_v15  }
 0x140   : > { %1686 = vperm.xlu1 %7954, %v1090_v8  }
 0x143   : > { %2009 = vperm.xlu0 %7961, %v1101_v17  }
 0x144   : > { %7955 = vset.pattern.permute.xlu1 %v12028_v24  ;;  %7053 = vmatmul.mubr.msk.bf16.gmra.mxu0 %vm1169_vm0, %v1122_v63 }
 0x145   : > { %7615 = vmatmul.mubr.msk.bf16.gmra.mxu1 %vm1169_vm0, %v9380_v27  ;;  %2029 = vperm.xlu1 %7955, %v9386_v28  }
 0x146   : > { %1350 = vmatprep.mubr.bf16.mxu0 %v12030_v0 }
 0x147   : > { %1949 = vperm.xlu0 %7961, %v1086_v18  }
 0x149   : > { %1961 = vperm.xlu1 %7955, %v1089_v13  }
 0x14b   : > { %2001 = vperm.xlu0 %7961, %v1099_v16  }
 0x14c   : > { %7054 = vmatmul.mubr.msk.bf16.gmra.mxu0 %vm1169_vm0, %v1123_v1 }
 0x14d   : > { %7956 = vset.pattern.permute.xlu1 %v12030_v0  ;;  %1360 = vmatprep.mubr.bf16.mxu0 %v12030_v0 }
 0x14e   : > { %1751 = vperm.xlu1 %7956, %v1103_v12  }
 0x14f   : > { %1941 = vperm.xlu0 %7961, %v1084_v19  }
 0x152   : > { %1671 = vperm.xlu1 %7956, %v1087_v20  }
 0x153   : > { %7964 = vset.pattern.permute.xlu0 %v12030_v0 }
 0x154   : > { %1646 = vperm.xlu0 %7964, %v1082_v21   ;;  %7055 = vmatmul.mubr.msk.bf16.gmra.mxu0 %vm1169_vm0, %v1124_v7 }
 0x155   : > { %1370 = vmatprep.mubr.bf16.mxu0 %v12030_v0 }
 0x156   : > { %1676 = vperm.xlu1 %7956, %v1088_v15  }
 0x158   : > { %8008 = vset.pattern.permute.xlu0 %v12028_v24 }
 0x15a   : > { %7957 = vset.pattern.permute.xlu1 %v12028_v24 }
 0x15b   : > { %2021 = vperm.xlu1 %7957, %v9399_v31   ;;  %v1083_v31 = vld [vmem:[%s12005_s13 + $0x10] sm:$0xff] }
 0x15c   : > { %7056 = vmatmul.mubr.msk.bf16.gmra.mxu0 %vm1169_vm0, %v1125_v9 }
 0x15d   : > { %1380 = vmatprep.mubr.bf16.mxu0 %v12030_v0 }
 0x15f   : > { %1953 = vperm.xlu1 %7957, %v1087_v20  }
 0x163   : > { %7958 = vset.pattern.permute.xlu1 %v12030_v0 }
 0x164   : > { %1741 = vperm.xlu1 %7958, %v1101_v17   ;;  %7057 = vmatmul.mubr.msk.bf16.gmra.mxu0 %vm1169_vm0, %v1126_v14 }
 0x168   : > { %1661 = vperm.xlu1 %7958, %v1085_v22  }
 0x16c   : > { %1666 = vperm.xlu1 %7958, %v1086_v18  }
 0x16d   : > { %v9546_v23 = vpop.permute.xlu0 %1641  ;;  %v9548_v25 = vpop.permute.xlu1 %1796 }
 0x170   : > { %7959 = vset.pattern.permute.xlu1 %v12028_v24 }
 0x171   : > { %2013 = vperm.xlu1 %7959, %v9408_v34   ;;  %v9552_v26 = vpop.permute.xlu0 %1791  ;;  %v9554_v27 = vpop.permute.xlu1 %1711 }
 0x175   : > { %1945 = vperm.xlu1 %7959, %v1085_v22   ;;  %v9556_v28 = vpop.permute.xlu0 %1716  ;;  %v9558_v29 = vpop.permute.xlu1 %1721 }
 0x176   : > { %12122 = vst [vmem:[#allocation34_spill] sm:$0xff] %v9556_v28  ;;  %12123 = vst [vmem:[#allocation35_spill] sm:$0xff] %v9558_v29 }
 0x179   : > { %7960 = vset.pattern.permute.xlu1 %v12030_v0  ;;  %v9561_v30 = vpop.permute.xlu0 %1786 }
 0x17a   : > { %1731 = vperm.xlu1 %7960, %v1099_v16   ;;  %v9566_v32 = vpop.permute.xlu1 %2049 }
 0x17b   : > { %12124 = vst [vmem:[#allocation36_spill] sm:$0xff] %v9566_v32 }
 0x17d   : > { %v9568_v33 = vpop.permute.xlu0 %1776 }
 0x17e   : > { %12125 = vst [vmem:[#allocation37_spill] sm:$0xff] %v9568_v33  ;;  %1651 = vperm.xlu1 %7960, %v1083_v31   ;;  %v9570_v34 = vpop.permute.xlu1 %2053 }
 0x17f   : > { %12126 = vst [vmem:[#allocation38_spill] sm:$0xff] %v9570_v34 }
 0x181   : > { %v9572_v35 = vpop.permute.xlu0 %1766 }
 0x182   : > { %12127 = vst [vmem:[#allocation39_spill] sm:$0xff] %v9572_v35  ;;  %1656 = vperm.xlu1 %7960, %v1084_v19   ;;  %v9574_v36 = vpop.permute.xlu1 %1989 }
 0x183   : > { %12128 = vst [vmem:[#allocation40_spill] sm:$0xff] %v9574_v36 }
 0x185   : > { %v9576_v37 = vpop.permute.xlu0 %1756 }
 0x186   : > { %12129 = vst [vmem:[#allocation41_spill] sm:$0xff] %v9576_v37  ;;  %7962 = vset.pattern.permute.xlu1 %v12028_v24 }
 0x187   : > { %2005 = vperm.xlu1 %7962, %v8506_v38   ;;  %v9582_v39 = vpop.permute.xlu1 %1781 }
 0x188   : > { %12130 = vst [vmem:[#allocation42_spill] sm:$0xff] %v9582_v39 }
 0x189   : > { %v9584_v40 = vpop.permute.xlu0 %1746 }
 0x18a   : > { %12131 = vst [vmem:[#allocation43_spill] sm:$0xff] %v9584_v40 }
 0x18b   : > { %1937 = vperm.xlu1 %7962, %v1083_v31   ;;  %v9586_v41 = vpop.permute.xlu1 %1701 }
 0x18d   : > { %v9588_v42 = vpop.permute.xlu0 %1736 }
 0x18e   : > { %12132 = vst [vmem:[#allocation44_spill] sm:$0xff] %v9588_v42 }
 0x18f   : > { %7963 = vset.pattern.permute.xlu1 %v12030_v0  ;;  %v9594_v44 = vpop.permute.xlu1 %1706 }
 0x190   : > { %1726 = vperm.xlu1 %7963, %v1098_v43  }
 0x192   : > { %v9596_v45 = vpop.permute.xlu0 %1929 }
 0x194   : > { %7965 = vset.pattern.permute.xlu1 %v12028_v24  ;;  %v9599_v46 = vpop.permute.xlu1 %2045 }
 0x195   : > { %12133 = vst [vmem:[#allocation45_spill] sm:$0xff] %v9599_v46  ;;  %1997 = vperm.xlu1 %7965, %v1098_v43  }
 0x196   : > { %v9601_v47 = vpop.permute.xlu0 %1985 }
 0x198   : > { %v9603_v48 = vpop.permute.xlu1 %1977 }
 0x199   : > { %1933 = vperm.xlu1 %7965, %v1082_v21  }
 0x19a   : > { %v9605_v49 = vpop.permute.xlu0 %1993 }
 0x19b   : > { %12134 = vst [vmem:[#allocation46_spill] sm:$0xff] %v9605_v49 }
 0x19d   : > { %v9607_v50 = vpop.permute.xlu1 %1771  ;;  %8006 = vset.pattern.permute.xlu1 %v12030_v0 }
 0x19e   : > { %12135 = vst [vmem:[#allocation47_spill] sm:$0xff] %v9607_v50  ;;  %v9610_v51 = vpop.permute.xlu0 %2041 }
 0x19f   : > { %12136 = vst [vmem:[#allocation48_spill] sm:$0xff] %v9610_v51 }
 0x1a1   : > { %v9612_v52 = vpop.permute.xlu1 %1691 }
 0x1a2   : > { %v9614_v53 = vpop.permute.xlu0 %1981 }
 0x1a5   : > { %v9616_v54 = vpop.permute.xlu1 %1696 }
 0x1a6   : > { %v9618_v55 = vpop.permute.xlu0 %2033 }
 0x1a7   : > { %12137 = vst [vmem:[#allocation49_spill] sm:$0xff] %v9618_v55 }
 0x1aa   : > { %v9620_v56 = vpop.permute.xlu1 %2037  ;;  %v9622_v57 = vpop.permute.xlu0 %1973 }
 0x1ab   : > { %12138 = vst [vmem:[#allocation50_spill] sm:$0xff] %v9620_v56 }
 0x1ae   : > { %v9624_v58 = vpop.permute.xlu1 %1969  ;;  %v9626_v59 = vpop.permute.xlu0 %2025 }
 0x1af   : > { %12139 = vst [vmem:[#allocation51_spill] sm:$0xff] %v9626_v59 }
 0x1b2   : > { %v9632_v63 = vpop.permute.xlu0 %1965 }
 0x1b3   : > { %v9628_v60 = vpop.permute.xlu1 %1761 }
 0x1b4   : > { %12140 = vst [vmem:[#allocation52_spill] sm:$0xff] %v9628_v60 }
 0x1b6   : > { %v9642_v7 = vpop.permute.xlu0 %2017 }
 0x1b7   : > { %v9630_v61 = vpop.permute.xlu1 %1681  ;;  %12143 = vst [vmem:[#allocation55_spill] sm:$0xff] %v9642_v7 }
 0x1ba   : > { %v9664_v21 = vpop.permute.xlu0 %1957 }
 0x1bb   : > { %v9634_v1 = vpop.permute.xlu1 %1686  ;;  %v1252_v2 = vpop.f32.mrf.mxu0 }
 0x1bc   : > { %v9636_v3 = vpop.f32.mrf.mxu1  ;;  %v1572_v11 = vrot.slane %v1252_v2, 7 }
 0x1bd   : > { %12141 = vst [vmem:[#allocation53_spill] sm:$0xff] %v9636_v3  ;;  %v1254_v5 = vpop.f32.mrf.mxu0  ;;  %v12032_v8 = vrot.slane %v9636_v3, 7 }
 0x1be   : > { %v9640_v6 = vpop.f32.mrf.mxu1 }
 0x1bf   : > { %12142 = vst [vmem:[#allocation54_spill] sm:$0xff] %v9640_v6  ;;  %v1256_v9 = vpop.f32.mrf.mxu0 }
 0x1c0   : > { %v1396_v10 = vpop.f32.mrf.mxu1  ;;  %v1573_v12 = vrot.slane %v1256_v9, 7  ;;  %v9646_v14 = vpop.permute.xlu1 %2029 }
 0x1c1   : > { %v1601_v13 = vrot.slane %v1396_v10, 7  ;;  %12144 = vst [vmem:[#allocation56_spill] sm:$0xff] %v9646_v14  ;;  %v9648_v15 = vpop.f32.mrf.mxu0 }
 0x1c2   : > { %v9650_v17 = vpop.f32.mrf.mxu1  ;;  %v9660_v16 = vsel %vm1606_vm1, %v1572_v11, %v1573_v12 }
 0x1c3   : > { %v9656_v18 = vsel %vm1606_vm1, %v12032_v8, %v1601_v13  ;;  %v1262_v19 = vpop.f32.mrf.mxu0 }
 0x1c4   : > { %v9662_v20 = vpop.f32.mrf.mxu1  ;;  %v1574_v22 = vrot.slane %v1262_v19, 7  ;;  %v9667_v38 = vpop.permute.xlu1 %1961 }
 0x1c5   : > { %v12033_v31 = vrot.slane %v9662_v20, 7  ;;  %v9669_v43 = vpop.f32.mrf.mxu0 }
 0x1c6   : > { %v1404_v62 = vpop.f32.mrf.mxu1  ;;  %v9677_v9 = vsel %vm1606_vm1, %v1573_v12, %v1574_v22 }
 0x1c7   : > { %v1608_v2 = vsel %vm1606_vm1, %v1601_v13, %v12033_v31  ;;  %v1266_v24 = vpop.f32.mrf.mxu0 }
 0x1c8   : > { %v1829_v10 = vmul.f32 %v9552_v26, %v1608_v2  ;;  %v9680_v19 = vpop.f32.mrf.mxu1  ;;  %v1575_v0 = vrot.slane %v1266_v24, 7  ;;  %v9699_v24 = vpop.permute.xlu0 %2009 }
 0x1c9   : > { %v12035_v8 = vrot.slane %v9680_v19, 7  ;;  %v9683_v6 = vpop.permute.xlu1 %1751  ;;  %v9687_v33 = vpop.f32.mrf.mxu0  ;;  %12149 = vst [vmem:[#allocation61_spill] sm:$0xff] %v9699_v24 }
 0x1ca   : > { %12145 = vst [vmem:[#allocation57_spill] sm:$0xff] %v9683_v6  ;;  %v9685_v56 = vadd.f32 %v1829_v10, %v1404_v62  ;;  %12147 = vst [vmem:[#allocation59_spill] sm:$0xff] %v9687_v33  ;;  %v9689_v39 = vpop.f32.mrf.mxu1  ;;  %v9697_v26 = vsel %vm1606_vm1, %v1574_v22, %v1575_v0  ;;  %v8071_v6 = vld [vmem:[%s12009_s17 + $0x4] ss:$8 sps:$4 sm:$0xff]  }
 0x1cb   : > { %v1638_v12 = vsel %vm1606_vm1, %v12035_v8, %v1572_v11  ;;  %12148 = vst [vmem:[#allocation60_spill] sm:$0xff] %v9697_v26  ;;  %v1272_v2 = vpop.f32.mrf.mxu0  ;;  %2431 = vmatprep.mubr.bf16.mxu1 %v8071_v6  ;;  %v12157_v26 = vrot.slane %v9662_v20, 7 }
 0x1cc   : > { %12146 = vst [vmem:[#allocation58_spill] sm:$0xff] %v9685_v56  ;;  %v1799_v13 = vmul.f32 %v9546_v23, %v1638_v12  ;;  %v1576_v62 = vrot.slane %v1272_v2, 7  ;;  %v9702_v10 = vpop.f32.mrf.mxu1  ;;  %v9717_v35 = vpop.permute.xlu0 %1949 }
 0x1cd   : > { %v1672_v31 = vpop.permute.xlu1 %1671  ;;  %v9706_v55 = vpop.f32.mrf.mxu0  ;;  %v12036_v22 = vrot.slane %v9702_v10, 1 }
 0x1ce   : > { %v9704_v3 = vadd.f32 %v1799_v13, %v1254_v5  ;;  %v9708_v50 = vpop.f32.mrf.mxu1  ;;  %v9712_v11 = vsel %vm1606_vm1, %v1575_v0, %v1576_v62 }
 0x1cf   : > { %12150 = vst [vmem:[#allocation62_spill] sm:$0xff] %v9708_v50  ;;  %v1276_v8 = vpop.f32.mrf.mxu0  ;;  %v12155_v33 = vrot.slane %v9708_v50, 1 }
 0x1d0   : > { %v1577_v14 = vrot.slane %v1276_v8, 7  ;;  %v7589_v23 = vpop.f32.mrf.mxu1 }
 0x1d1   : > { %v1677_v12 = vpop.permute.xlu1 %1676  ;;  %v1866_v2 = vrot.slane %v7589_v23, 1  ;;  %v9715_v59 = vpop.f32.mrf.mxu0 }
 0x1d2   : > { %v9719_v5 = vpop.f32.mrf.mxu1  ;;  %v9724_v13 = vsel %vm1606_vm1, %v1576_v62, %v1577_v14 }
 0x1d3   : > { %v1282_v0 = vpop.f32.mrf.mxu0  ;;  %v9730_v8 = vsel %vm1895_vm2, %v12036_v22, %v1866_v2 }
 0x1d4   : > { %12151 = vst [vmem:[#allocation63_spill] sm:$0xff] %v9730_v8  ;;  %v1578_v23 = vrot.slane %v1282_v0, 7  ;;  %v7592_v51 = vpop.f32.mrf.mxu1  ;;  %v9742_v0 = vpop.permute.xlu0 %2001 }
 0x1d5   : > { %v1284_v60 = vpop.f32.mrf.mxu0  ;;  %v1869_v40 = vrot.slane %v7592_v51, 1  ;;  %12153 = vst [vmem:[#allocation65_spill] sm:$0xff] %v9742_v0 }
 0x1d6   : > { %v9732_v37 = vpop.permute.xlu1 %2021  ;;  %v1632_v62 = vsel %vm1606_vm1, %v1577_v14, %v1578_v23  ;;  %v9739_v46 = vpop.f32.mrf.mxu1 }
 0x1d7   : > { %12152 = vst [vmem:[#allocation64_spill] sm:$0xff] %v9732_v37  ;;  %v1805_v7 = vmul.f32 %v1672_v31, %v1632_v62  ;;  %v12037_v56 = vrot.slane %v9739_v46, 1  ;;  %v1286_v22 = vpop.f32.mrf.mxu0 }
 0x1d8   : > { %v1579_v42 = vrot.slane %v1286_v22, 7  ;;  %v7593_v24 = vpop.f32.mrf.mxu1  ;;  %v12039_v22 = vrot.slane %v9719_v5, 1  ;;  %v9764_v6 = vpop.permute.xlu0 %1941 }
 0x1d9   : > { %v1837_v37 = vadd.f32 %v1805_v7, %v1284_v60  ;;  %v9748_v34 = vsel %vm1895_vm2, %v1866_v2, %v12037_v56  ;;  %v1870_v14 = vrot.slane %v7593_v24, 1  ;;  %v1288_v32 = vpop.f32.mrf.mxu0 }
 0x1da   : > { %v1954_v8 = vpop.permute.xlu1 %1953  ;;  %v1631_v51 = vsel %vm1606_vm1, %v1578_v23, %v1579_v42  ;;  %v9752_v31 = vpop.f32.mrf.mxu1 }
 0x1db   : > { %v1920_v60 = vsel %vm1895_vm2, %v1869_v40, %v1870_v14  ;;  %v1292_v7 = vpop.f32.mrf.mxu0  ;;  %v1806_v24 = vmul.f32 %v1677_v12, %v1631_v51 }
 0x1dc   : > { %v2062_v62 = vmul.f32 %v1954_v8, %v1920_v60  ;;  %v1580_v0 = vrot.slane %v1292_v7, 7  ;;  %v7596_v2 = vpop.f32.mrf.mxu1  ;;  %v1926_v8 = vsel %vm1895_vm2, %v12155_v33, %v12039_v22 }
 0x1dd   : > { %v1294_v56 = vpop.f32.mrf.mxu0  ;;  %v1873_v60 = vrot.slane %v7596_v2, 1 }
 0x1de   : > { %v9758_v49 = vadd.f32 %v2062_v62, %v1837_v37  ;;  %v1630_v23 = vsel %vm1606_vm1, %v1579_v42, %v1580_v0  ;;  %v1477_v36 = vpop.f32.mrf.mxu1 }
 0x1df   : > { %v9762_v29 = vpop.permute.xlu1 %1741  ;;  %v1807_v12 = vmul.f32 %v9630_v61, %v1630_v23  ;;  %v1871_v37 = vrot.slane %v1477_v36, 1  ;;  %v1296_v51 = vpop.f32.mrf.mxu0  ;;  %v2056_v36 = vmul.f32 %v9596_v45, %v1926_v8  ;;  %v1838_v61 = vadd.f32 %v1806_v24, %v1288_v32 }
 0x1e0   : > { %12154 = vst [vmem:[#allocation66_spill] sm:$0xff] %v9762_v29  ;;  %v1581_v42 = vrot.slane %v1296_v51, 7  ;;  %v7597_v62 = vpop.f32.mrf.mxu1  ;;  %v12156_v29 = vrot.slane %v9680_v19, 7  ;;  %v1828_v45 = vmul.f32 %v9561_v30, %v9656_v18  ;;  %v12158_v32 = vrot.slane %v9752_v31, 1 }
 0x1e1   : > { %v1839_v50 = vadd.f32 %v1807_v12, %v1294_v56  ;;  %v1919_v33 = vsel %vm1895_vm2, %v1870_v14, %v1871_v37  ;;  %v1874_v2 = vrot.slane %v7597_v62, 1  ;;  %v1298_v22 = vpop.f32.mrf.mxu0  ;;  %v1647_v12 = vpop.permute.xlu0 %1646 }
 0x1e2   : > { %v1607_v28 = vsel %vm1606_vm1, %v12157_v26, %v12156_v29  ;;  %v2063_v23 = vmul.f32 %v9664_v21, %v1919_v33  ;;  %v1629_v51 = vsel %vm1606_vm1, %v1580_v0, %v1581_v42  ;;  %v1480_v19 = vpop.f32.mrf.mxu1  ;;  %v1921_v21 = vsel %vm1895_vm2, %v12158_v32, %v1869_v40 }
 0x1e3   : > { %v1662_v7 = vpop.permute.xlu1 %1661  ;;  %v1916_v20 = vsel %vm1895_vm2, %v1873_v60, %v1874_v2  ;;  %v1808_v29 = vmul.f32 %v9634_v1, %v1629_v51  ;;  %v1872_v56 = vrot.slane %v1480_v19, 1  ;;  %v1302_v14 = vpop.f32.mrf.mxu0  ;;  %v1830_v18 = vmul.f32 %v9548_v25, %v1607_v28  ;;  %v9809_v51 = vld [vmem:[#allocation4] ss:$0 sm:$0xff] }
 0x1e4   : > { %v1803_v26 = vmul.f32 %v1662_v7, %v9712_v11  ;;  %v2095_v0 = vadd.f32 %v2063_v23, %v1838_v61  ;;  %v1582_v24 = vrot.slane %v1302_v14, 7  ;;  %v9796_v8 = vpop.f32.mrf.mxu1  ;;  %v2088_v40 = vadd.f32 %v2056_v36, %v9704_v3 }
 0x1e5   : > { %v1840_v62 = vadd.f32 %v1808_v29, %v1298_v22  ;;  %v1917_v1 = vsel %vm1895_vm2, %v1872_v56, %v1873_v60  ;;  %v1918_v11 = vsel %vm1895_vm2, %v1871_v37, %v1872_v56  ;;  %v1304_v30 = vpop.f32.mrf.mxu0  ;;  %v2061_v60 = vmul.f32 %v9717_v35, %v1921_v21 }
 0x1e6   : > { %v9803_v7 = vadd.f32 %v1803_v26, %v9706_v55  ;;  %v2064_v33 = vmul.f32 %v9667_v38, %v1918_v11  ;;  %v2065_v61 = vmul.f32 %v9632_v63, %v1917_v1  ;;  %v1493_v23 = vpop.f32.mrf.mxu1  ;;  %v1628_v37 = vsel %vm1606_vm1, %v1581_v42, %v1582_v24 }
 0x1e7   : > { %v1667_v22 = vpop.permute.xlu1 %1666  ;;  %v1875_v55 = vrot.slane %v1493_v23, 1  ;;  %v1306_v29 = vpop.f32.mrf.mxu0  ;;  %v9816_v25 = vadd.f32 %v1828_v45, %v9650_v17  ;;  %v1809_v63 = vmul.f32 %v9612_v52, %v1628_v37  ;;  %v1800_v35 = vmul.f32 %v1647_v12, %v9660_v16 }
 0x1e8   : > { %v1804_v19 = vmul.f32 %v1667_v22, %v9724_v13  ;;  %v9818_v28 = vadd.f32 %v2064_v33, %v1839_v50  ;;  %v9820_v3 = vadd.f32 %v2065_v61, %v1840_v62  ;;  %v9823_v38 = vpop.f32.mrf.mxu1  ;;  %v1583_v13 = vrot.slane %v1306_v29, 7 }
 0x1e9   : > { %v1915_v42 = vsel %vm1895_vm2, %v1874_v2, %v1875_v55  ;;  %v1308_v56 = vpop.f32.mrf.mxu0  ;;  %v9830_v17 = vadd.f32 %v1830_v18, %v9689_v39  ;;  %v9833_v50 = vadd.f32 %v9809_v51, %v2088_v40  ;;  %v1841_v26 = vadd.f32 %v1809_v63, %v1304_v30 }
 0x1ea   : > { %v1836_v36 = vadd.f32 %v1804_v19, %v9715_v59  ;;  %v2066_v52 = vmul.f32 %v9624_v58, %v1916_v20  ;;  %v1496_v14 = vpop.f32.mrf.mxu1  ;;  %v9838_v16 = vadd.f32 %v9809_v51, %v9758_v49  ;;  %v9841_v2 = vadd.f32 %v9809_v51, %v2095_v0 }
 0x1eb   : > { %12159 = vst [vmem:[#allocation67_spill] sm:$0xff] %v9833_v50  ;;  %v1627_v45 = vsel %vm1606_vm1, %v1582_v24, %v1583_v13  ;;  %v1312_v32 = vpop.f32.mrf.mxu0  ;;  %v2067_v58 = vmul.f32 %v9622_v57, %v1915_v42  ;;  %v9852_v49 = vadd.f32 %v1800_v35, %v9648_v15  ;;  %v1876_v0 = vrot.slane %v1496_v14, 1 }
 0x1ec   : > { %12160 = vst [vmem:[#allocation68_spill] sm:$0xff] %v9838_v16  ;;  %12161 = vst [vmem:[#allocation69_spill] sm:$0xff] %v9841_v2  ;;  %v2093_v59 = vadd.f32 %v2061_v60, %v1836_v36  ;;  %v9845_v39 = vpop.permute.xlu1 %2013  ;;  %v2098_v21 = vadd.f32 %v2066_v52, %v1841_v26  ;;  %v1810_v12 = vmul.f32 %v9616_v54, %v1627_v45  ;;  %v1584_v20 = vrot.slane %v1312_v32, 7  ;;  %v9849_v62 = vpop.f32.mrf.mxu1 }
 0x1ed   : > { %v1314_v1 = vpop.f32.mrf.mxu0  ;;  %v12162_v11 = vrot.slane %v9752_v31, 1  ;;  %v12163_v24 = vrot.slane %v9739_v46, 1  ;;  %v12164_v18 = vrot.slane %v9702_v10, 1  ;;  %v12165_v54 = vrot.slane %v9719_v5, 1 }
 0x1ee   : > { %v12040_v15 = vmax.f32 %v9833_v50, 0.0  ;;  %v1877_v40 = vrot.slane %v9796_v8, 1  ;;  %v1842_v33 = vadd.f32 %v1810_v12, %v1308_v56  ;;  %v1626_v31 = vsel %vm1606_vm1, %v1583_v13, %v1584_v20  ;;  %v9872_v46 = vpop.f32.mrf.mxu1 }
 0x1ef   : > { %v1922_v30 = vsel %vm1895_vm2, %v12163_v24, %v12162_v11  ;;  %v9866_v57 = vsel %vm1895_vm2, %v12165_v54, %v12164_v18  ;;  %v9876_v61 = vmul.f32 %v9764_v6, %v9748_v34  ;;  %v12042_v10 = vmax.f32 %v9838_v16, 0.0  ;;  %v1316_v60 = vpop.f32.mrf.mxu0 }
 0x1f0   : > { %v9880_v5 = vadd.f32 %v9809_v51, %v2093_v59  ;;  %v1811_v23 = vmul.f32 %v9586_v41, %v1626_v31  ;;  %v1946_v22 = vpop.permute.xlu1 %1945  ;;  %v12043_v8 = vmax.f32 %v9841_v2, 0.0  ;;  %v2099_v37 = vadd.f32 %v2067_v58, %v1842_v33  ;;  %v9885_v63 = vpop.f32.mrf.mxu1 }
 0x1f1   : > { %v12049_v19 = vrot.slane %v9849_v62, 1  ;;  %v2060_v29 = vmul.f32 %v1946_v22, %v1922_v30  ;;  %v1878_v34 = vrot.slane %v9823_v38, 1  ;;  %v1914_v35 = vsel %vm1895_vm2, %v1875_v55, %v1876_v0  ;;  %v1318_v36 = vpop.f32.mrf.mxu0 }
 0x1f2   : > { %12166 = vst [vmem:[#allocation70_spill] sm:$0xff] %v9880_v5  ;;  %v1843_v6 = vadd.f32 %v1811_v23, %v1314_v1  ;;  %v1585_v42 = vrot.slane %v1316_v60, 7  ;;  %v1913_v41 = vsel %vm1895_vm2, %v1876_v0, %v1877_v40  ;;  %v1882_v56 = vrot.slane %v9885_v63, 1  ;;  %v9894_v26 = vpop.f32.mrf.mxu1  ;;  %v12181_v63 = vld [vmem:[#allocation65_spill] sm:$0xff] }
 0x1f3   : > { %v2092_v13 = vadd.f32 %v2060_v29, %v9803_v7  ;;  %v9898_v52 = vrot.slane %v12040_v15, 1  ;;  %v9902_v38 = vrot.slane %v12042_v10, 1  ;;  %v12041_v55 = vmax.f32 %v9880_v5, 0.0 }
 0x1f4   : > { %v1912_v14 = vsel %vm1895_vm2, %v1877_v40, %v1878_v34  ;;  %v1625_v7 = vsel %vm1606_vm1, %v1584_v20, %v1585_v42  ;;  %v1322_v59 = vpop.f32.mrf.mxu0  ;;  %v2068_v45 = vmul.f32 %v9603_v48, %v1914_v35  ;;  %v9917_v12 = vsel %vm1895_vm2, %v12049_v19, %v1882_v56  ;;  %v9920_v0 = vpop.f32.mrf.mxu1 }
 0x1f5   : > { %12167 = vst [vmem:[#allocation71_spill] sm:$0xff] %v9902_v38  ;;  %v2131_v32 = vadd.f32 %v9809_v51, %v2092_v13  ;;  %v1812_v58 = vmul.f32 %v9594_v44, %v1625_v7  ;;  %v9922_v1 = vpop.permute.xlu1 %1731  ;;  %v9926_v20 = vrot.slane %v12043_v8, 1  ;;  %v9930_v48 = vadd.f32 %v9809_v51, %v9818_v28 }
 0x1f6   : > { %v2069_v11 = vmul.f32 %v9614_v53, %v1913_v41  ;;  %v1586_v24 = vrot.slane %v1322_v59, 7  ;;  %v1324_v30 = vpop.f32.mrf.mxu0  ;;  %v2100_v18 = vadd.f32 %v2068_v45, %v1843_v6  ;;  %v2070_v44 = vmul.f32 %v9601_v47, %v1912_v14  ;;  %v9934_v33 = vpop.f32.mrf.mxu1 }
 0x1f7   : > { %12168 = vst [vmem:[#allocation72_spill] sm:$0xff] %v9926_v20  ;;  %12169 = vst [vmem:[#allocation73_spill] sm:$0xff] %v9930_v48  ;;  %v2163_v54 = vmax.f32 %v2131_v32, 0.0  ;;  %v1844_v40 = vadd.f32 %v1812_v58, %v1318_v36  ;;  %v9937_v31 = vadd.f32 %v9809_v51, %v2098_v21  ;;  %v9941_v23 = vrot.slane %v12041_v55, 1  ;;  %v12174_v32 = vld [vmem:[#allocation34_spill] sm:$0xff] }
 0x1f8   : > { %v1879_v28 = vrot.slane %v9872_v46, 1  ;;  %v1624_v53 = vsel %vm1606_vm1, %v1585_v42, %v1586_v24  ;;  %v1326_v22 = vpop.f32.mrf.mxu0  ;;  %v9947_v60 = vadd.f32 %v9809_v51, %v2099_v37  ;;  %v9952_v21 = vpop.f32.mrf.mxu1  ;;  %v9956_v36 = vadd.f32 %v9809_v51, %v9820_v3 }
 0x1f9   : > { %12170 = vst [vmem:[#allocation74_spill] sm:$0xff] %v9941_v23  ;;  %v9949_v29 = vrot.slane %v2163_v54, 1  ;;  %v1813_v47 = vmul.f32 %v9554_v27, %v1624_v53  ;;  %v1587_v6 = vrot.slane %v1326_v22, 7  ;;  %v1652_v35 = vpop.permute.xlu1 %1651  ;;  %v2101_v46 = vadd.f32 %v2069_v11, %v1844_v40 }
 0x1fa   : > { %12171 = vst [vmem:[#allocation75_spill] sm:$0xff] %v9956_v36  ;;  %v12048_v41 = vrot.slane %v9894_v26, 1  ;;  %v1801_v42 = vmul.f32 %v1652_v35, %v9677_v9  ;;  %v1328_v13 = vpop.f32.mrf.mxu0  ;;  %v9961_v37 = vadd.f32 %v9809_v51, %v2100_v18  ;;  %v1528_v3 = vpop.f32.mrf.mxu1  ;;  %v12044_v59 = vmax.f32 %v9937_v31, 0.0 }
 0x1fb   : > { %v2249_v27 = vsel %vm1895_vm2, %v9949_v29, %v9941_v23  ;;  %v1845_v14 = vadd.f32 %v1813_v47, %v1324_v30  ;;  %v1623_v7 = vsel %vm1606_vm1, %v1586_v24, %v1587_v6  ;;  %v12047_v18 = vmax.f32 %v9947_v60, 0.0  ;;  %v12176_v47 = vld [vmem:[#allocation60_spill] sm:$0xff] }
 0x1fc   : > { %12172 = vst [vmem:[#allocation76_spill] sm:$0xff] %v9961_v37  ;;  %v9970_v45 = vmax.f32 %v2163_v54, %v2249_v27  ;;  %v9973_v9 = vadd.f32 %v1801_v42, %v9669_v43  ;;  %v1814_v58 = vmul.f32 %v12174_v32, %v1623_v7  ;;  %v9976_v11 = vpop.f32.mrf.mxu0  ;;  %v1911_v30 = vsel %vm1895_vm2, %v1878_v34, %v1879_v28  ;;  %v12177_v32 = vld [vmem:[#allocation59_spill] sm:$0xff] }
 0x1fd   : > { %v2102_v40 = vadd.f32 %v2070_v44, %v1845_v14  ;;  %v12045_v24 = vrot.slane %v9976_v11, 7  ;;  %v9982_v53 = vpop.f32.mrf.mxu1  ;;  %v1657_v22 = vpop.permute.xlu1 %1656  ;;  %v9985_v54 = vadd.f32 %v9809_v51, %v2101_v46  ;;  %v1885_v43 = vrot.slane %v9920_v0, 1 }
 0x1fe   : > { %12173 = vst [vmem:[#allocation77_spill] sm:$0xff] %v9970_v45  ;;  %v1802_v35 = vmul.f32 %v1657_v22, %v12176_v47  ;;  %v1334_v42 = vpop.f32.mrf.mxu0  ;;  %v1910_v27 = vsel %vm1895_vm2, %v1879_v28, %v12048_v41  ;;  %v12046_v34 = vmax.f32 %v9961_v37, 0.0  ;;  %v1886_v44 = vrot.slane %v9952_v21, 1  ;;  %v12178_v47 = vld [vmem:[#allocation35_spill] sm:$0xff] }
 0x1ff   : > { %12175 = vst [vmem:[#allocation34_spill] sm:$0xff] %v9985_v54  ;;  %v1846_v14 = vadd.f32 %v1814_v58, %v1328_v13  ;;  %v1622_v46 = vsel %vm1606_vm1, %v1587_v6, %v12045_v24  ;;  %v9999_v7 = vpop.f32.mrf.mxu1  ;;  %v10003_v0 = vrot.slane %v12044_v59, 1  ;;  %v10010_v21 = vrot.slane %v12047_v18, 1  ;;  %v12179_v58 = vld [vmem:[#allocation40_spill] sm:$0xff] }
 0x200   : > { %v1834_v22 = vadd.f32 %v1802_v35, %v12177_v32  ;;  %v1815_v28 = vmul.f32 %v12178_v47, %v1622_v46  ;;  %v1336_v15 = vpop.f32.mrf.mxu0  ;;  %v10013_v13 = vadd.f32 %v9809_v51, %v2102_v40  ;;  %v1883_v6 = vrot.slane %v9934_v33, 1  ;;  %v12180_v47 = vld [vmem:[#allocation46_spill] sm:$0xff] }
 0x201   : > { %v2071_v10 = vmul.f32 %v12179_v58, %v1911_v30  ;;  %v10017_v8 = vpop.f32.mrf.mxu1  ;;  %v12050_v35 = vmax.f32 %v9985_v54, 0.0  ;;  %v1884_v32 = vrot.slane %v1528_v3, 1  ;;  %v2072_v55 = vmul.f32 %v12180_v47, %v1910_v27 }
 0x202   : > { %v2091_v46 = vadd.f32 %v9876_v61, %v1834_v22  ;;  %v2006_v59 = vpop.permute.xlu1 %2005  ;;  %v10022_v24 = vpop.f32.mrf.mxu0  ;;  %v10026_v40 = vrot.slane %v12046_v34, 1  ;;  %v10030_v33 = vsel %vm1895_vm2, %v1885_v43, %v1886_v44  ;;  %v1907_v3 = vsel %vm1895_vm2, %v1882_v56, %v1883_v6 }
 0x203   : > { %v2103_v30 = vadd.f32 %v2071_v10, %v1846_v14  ;;  %v10036_v61 = vpop.f32.mrf.mxu1  ;;  %v1889_v27 = vrot.slane %v9982_v53, 1  ;;  %v1847_v58 = vadd.f32 %v1815_v28, %v1334_v42  ;;  %v1589_v41 = vrot.slane %v1336_v15, 7 }
 0x204   : > { %v2130_v22 = vadd.f32 %v9809_v51, %v2091_v46  ;;  %v1342_v34 = vpop.f32.mrf.mxu0  ;;  %v2074_v14 = vmul.f32 %v12181_v63, %v9917_v12  ;;  %v10048_v56 = vrot.slane %v12050_v35, 1  ;;  %v1905_v53 = vsel %vm1895_vm2, %v1884_v32, %v1885_v43 }
 0x205   : > { %v1590_v19 = vrot.slane %v1342_v34, 7  ;;  %v10042_v10 = vpop.f32.mrf.mxu1  ;;  %v1906_v18 = vsel %vm1895_vm2, %v1883_v6, %v1884_v32  ;;  %v10055_v15 = vadd.f32 %v9809_v51, %v2103_v30  ;;  %v12183_v34 = vld [vmem:[#allocation63_spill] sm:$0xff]  ;;  %v12184_v35 = vrot.slane %v9849_v62, 1 }
 0x206   : > { %12182 = vst [vmem:[#allocation60_spill] sm:$0xff] %v10048_v56  ;;  %v2162_v42 = vmax.f32 %v2130_v22, 0.0  ;;  %v1938_v28 = vpop.permute.xlu1 %1937  ;;  %v1344_v46 = vpop.f32.mrf.mxu0  ;;  %v12185_v43 = vrot.slane %v9894_v26, 1  ;;  %v2104_v45 = vadd.f32 %v2072_v55, %v1847_v58  ;;  %v12186_v6 = vrot.slane %v9999_v7, 1 }
 0x207   : > { %v2058_v47 = vmul.f32 %v1938_v28, %v12183_v34  ;;  %v1620_v12 = vsel %vm1606_vm1, %v1589_v41, %v1590_v19  ;;  %v10060_v63 = vpop.f32.mrf.mxu1  ;;  %v12187_v34 = vmax.f32 %v10013_v13, 0.0  ;;  %v2075_v58 = vmul.f32 %v2006_v59, %v1907_v3  ;;  %v12195_v59 = vld [vmem:[#allocation38_spill] sm:$0xff] }
 0x208   : > { %v1909_v22 = vsel %vm1895_vm2, %v12185_v43, %v12184_v35  ;;  %v2194_v50 = vrot.slane %v2162_v42, 1  ;;  %v1903_v32 = vsel %vm1895_vm2, %v1886_v44, %v12186_v6  ;;  %v1346_v28 = vpop.f32.mrf.mxu0  ;;  %v1817_v44 = vmul.f32 %v9922_v1, %v1620_v12 }
 0x209   : > { %v10075_v5 = vrot.slane %v12187_v34, 1  ;;  %v2090_v26 = vadd.f32 %v2058_v47, %v9973_v9  ;;  %v1591_v23 = vrot.slane %v1346_v28, 7  ;;  %v7617_v35 = vpop.f32.mrf.mxu1  ;;  %v12188_v6 = vrot.slane %v9976_v11, 7 }
 0x20a   : > { %v2250_v55 = vsel %vm1895_vm2, %v2194_v50, %v9949_v29  ;;  %v1348_v43 = vpop.f32.mrf.mxu0  ;;  %v1894_v47 = vrot.slane %v7617_v35, 1  ;;  %v10092_v16 = vadd.f32 %v9809_v51, %v2104_v45  ;;  %v12190_v29 = vrot.slane %v10017_v8, 1  ;;  %v12192_v45 = vld [vmem:[#allocation62_spill] sm:$0xff] }
 0x20b   : > { %v1621_v34 = vsel %vm1606_vm1, %v12188_v6, %v1589_v41  ;;  %v10088_v62 = vmax.f32 %v2162_v42, %v2250_v55  ;;  %v2129_v9 = vadd.f32 %v9809_v51, %v2090_v26  ;;  %v1727_v28 = vpop.permute.xlu1 %1726  ;;  %v1619_v41 = vsel %vm1606_vm1, %v1590_v19, %v1591_v23  ;;  %v12196_v19 = vld [vmem:[#allocation61_spill] sm:$0xff]  ;;  %v1560_v20 = vpop.f32.mrf.mxu1 }
 0x20c   : > { %v10098_v1 = vsel %vm1895_vm2, %v1889_v27, %v12190_v29  ;;  %v1352_v11 = vpop.f32.mrf.mxu0  ;;  %v12191_v42 = vrot.slane %v10042_v10, 1  ;;  %v12193_v26 = vrot.slane %v12192_v45, 1  ;;  %v1849_v6 = vadd.f32 %v1817_v44, %v1344_v46  ;;  %v12194_v29 = vld [vmem:[#allocation36_spill] sm:$0xff] }
 0x20d   : > { %12189 = vst [vmem:[#allocation59_spill] sm:$0xff] %v10088_v62  ;;  %v2161_v3 = vmax.f32 %v2129_v9, 0.0  ;;  %v1592_v55 = vrot.slane %v1352_v11, 7  ;;  %v2076_v2 = vmul.f32 %v12196_v19, %v1906_v18  ;;  %v12197_v9 = vmax.f32 %v10055_v15, 0.0  ;;  %v12202_v19 = vld [vmem:[#allocation66_spill] sm:$0xff] }
 0x20e   : > { %v1896_v12 = vsel %vm1895_vm2, %v12191_v42, %v1894_v47  ;;  %v1927_v35 = vsel %vm1895_vm2, %v1894_v47, %v12193_v26  ;;  %v1354_v37 = vpop.f32.mrf.mxu0  ;;  %v12198_v42 = vld [vmem:[#allocation44_spill] sm:$0xff]  ;;  %v10122_v47 = vmul.f32 %v9845_v39, %v1905_v53  ;;  %v12199_v46 = vrot.slane %v10036_v61, 1 }
 0x20f   : > { %v2086_v30 = vmul.f32 %v12194_v29, %v1896_v12  ;;  %v2087_v62 = vmul.f32 %v12195_v59, %v1927_v35  ;;  %v10116_v38 = vrot.slane %v12197_v9, 1  ;;  %v10118_v54 = vrot.slane %v2161_v3, 1  ;;  %v12200_v59 = vld [vmem:[#allocation58_spill] sm:$0xff]  ;;  %v12201_v35 = vld [vmem:[#allocation55_spill] sm:$0xff]  ;;  %v12203_v53 = vld [vmem:[#allocation64_spill] sm:$0xff] }
 0x210   : > { %v1818_v45 = vmul.f32 %v12198_v42, %v1619_v41  ;;  %v10128_v44 = vsel %vm1895_vm2, %v12199_v46, %v1889_v27  ;;  %v1998_v12 = vpop.permute.xlu1 %1997  ;;  %v1356_v26 = vpop.f32.mrf.mxu0  ;;  %v10134_v29 = vmul.f32 %v12201_v35, %v10030_v33  ;;  %v1618_v27 = vsel %vm1606_vm1, %v1591_v23, %v1592_v55 }
 0x211   : > { %v2118_v18 = vadd.f32 %v2086_v30, %v12200_v59  ;;  %v2119_v11 = vadd.f32 %v2087_v62, %v9830_v17  ;;  %v2251_v39 = vsel %vm1895_vm2, %v10118_v54, %v2194_v50  ;;  %v2106_v17 = vadd.f32 %v2074_v14, %v1849_v6 }
 0x212   : > { %v10143_v30 = vmax.f32 %v2161_v3, %v2251_v39  ;;  %v1816_v62 = vmul.f32 %v1727_v28, %v1621_v34  ;;  %v1819_v9 = vmul.f32 %v12202_v19, %v1618_v27  ;;  %v1358_v42 = vpop.f32.mrf.mxu0  ;;  %v1850_v33 = vadd.f32 %v1818_v45, %v1348_v43 }
 0x213   : > { %v1892_v46 = vrot.slane %v1560_v20, 1  ;;  %v1593_v59 = vrot.slane %v1356_v26, 7  ;;  %v2157_v35 = vadd.f32 %v9809_v51, %v2118_v18  ;;  %v2073_v56 = vmul.f32 %v1998_v12, %v1909_v22 }
 0x214   : > { %v1851_v41 = vadd.f32 %v1819_v9, %v1354_v37  ;;  %v1934_v50 = vpop.permute.xlu1 %1933  ;;  %v1362_v48 = vpop.f32.mrf.mxu0  ;;  %v10148_v36 = vmul.f32 %v12203_v53, %v1903_v32  ;;  %v2158_v23 = vadd.f32 %v9809_v51, %v2119_v11  ;;  %v2239_v20 = vsel %vm1895_vm2, %v10075_v5, %v10116_v38  ;;  %v12204_v32 = vld [vmem:[#allocation43_spill] sm:$0xff]  ;;  %v12208_v9 = vld [vmem:[#allocation45_spill] sm:$0xff] }
 0x215   : > { %v1617_v14 = vsel %vm1606_vm1, %v1592_v55, %v1593_v59  ;;  %v2057_v34 = vmul.f32 %v1934_v50, %v9866_v57  ;;  %v1594_v28 = vrot.slane %v1362_v48, 7  ;;  %v10159_v37 = vadd.f32 %v9809_v51, %v2106_v17 }
 0x216   : > { %v1848_v22 = vadd.f32 %v1816_v62, %v10022_v24  ;;  %v1820_v43 = vmul.f32 %v12204_v32, %v1617_v14  ;;  %v1364_v3 = vpop.f32.mrf.mxu0  ;;  %v2189_v6 = vmax.f32 %v2157_v35, 0.0  ;;  %v2107_v45 = vadd.f32 %v2075_v58, %v1850_v33  ;;  %v12209_v14 = vld [vmem:[#allocation57_spill] sm:$0xff] }
 0x217   : > { %v12205_v55 = vrot.slane %v10042_v10, 1  ;;  %v2089_v48 = vadd.f32 %v2057_v34, %v9852_v49  ;;  %v2190_v18 = vmax.f32 %v2158_v23, 0.0  ;;  %v12206_v11 = vmax.f32 %v10092_v16, 0.0 }
 0x218   : > { %v2108_v26 = vadd.f32 %v2076_v2, %v1851_v41  ;;  %v2105_v39 = vadd.f32 %v2073_v56, %v1848_v22  ;;  %v1366_v24 = vpop.f32.mrf.mxu0  ;;  %v10172_v53 = vrot.slane %v2189_v6, 1  ;;  %v1616_v10 = vsel %vm1606_vm1, %v1593_v59, %v1594_v28 }
 0x219   : > { %v1897_v57 = vsel %vm1895_vm2, %v1892_v46, %v12205_v55  ;;  %v10170_v12 = vrot.slane %v12206_v11, 1  ;;  %v2128_v27 = vadd.f32 %v9809_v51, %v2089_v48  ;;  %v1595_v58 = vrot.slane %v1366_v24, 7  ;;  %v12210_v48 = vld [vmem:[#allocation41_spill] sm:$0xff] }
 0x21a   : > { %v2222_v17 = vrot.slane %v2190_v18, 1  ;;  %v2177_v62 = vmax.f32 %v10159_v37, 0.0  ;;  %v12207_v49 = vrot.slane %v10060_v63, 1  ;;  %v2085_v2 = vmul.f32 %v12208_v9, %v1897_v57  ;;  %v1368_v41 = vpop.f32.mrf.mxu0 }
 0x21b   : > { %v1852_v56 = vadd.f32 %v1820_v43, %v1358_v42  ;;  %v10184_v33 = vadd.f32 %v9809_v51, %v2107_v45  ;;  %v2160_v35 = vmax.f32 %v2128_v27, 0.0  ;;  %v1615_v59 = vsel %vm1606_vm1, %v1594_v28, %v1595_v58 }
 0x21c   : > { %v1898_v19 = vsel %vm1895_vm2, %v12207_v49, %v1892_v46  ;;  %v2223_v50 = vsel %vm1895_vm2, %v10172_v53, %v2222_v17  ;;  %v10192_v23 = vadd.f32 %v9809_v51, %v2108_v26  ;;  %v10195_v46 = vadd.f32 %v9809_v51, %v2105_v39  ;;  %v1372_v34 = vpop.f32.mrf.mxu0 }
 0x21d   : > { %v1821_v42 = vmul.f32 %v12209_v14, %v1616_v10  ;;  %v2238_v22 = vsel %vm1895_vm2, %v10116_v38, %v10170_v12  ;;  %v10202_v32 = vrot.slane %v2160_v35, 1  ;;  %v2254_v28 = vsel %vm1895_vm2, %v2222_v17, %v9898_v52 }
 0x21e   : > { %v2285_v43 = vmax.f32 %v2189_v6, %v2223_v50  ;;  %v1596_v45 = vrot.slane %v1372_v34, 7  ;;  %v2117_v55 = vadd.f32 %v2085_v2, %v9816_v25  ;;  %v2109_v57 = vadd.f32 %v10122_v47, %v1852_v56  ;;  %v1374_v39 = vpop.f32.mrf.mxu0 }
 0x21f   : > { %v1822_v11 = vmul.f32 %v12210_v48, %v1615_v59  ;;  %v2286_v26 = vmax.f32 %v2190_v18, %v2254_v28  ;;  %v2178_v24 = vmax.f32 %v10184_v33, 0.0  ;;  %v2252_v38 = vsel %vm1895_vm2, %v10202_v32, %v10118_v54 }
 0x220   : > { %v12211_v27 = vmax.f32 %v10055_v15, 0.0  ;;  %v1614_v6 = vsel %vm1606_vm1, %v1595_v58, %v1596_v45  ;;  %v2179_v25 = vmax.f32 %v10192_v23, 0.0  ;;  %v2176_v47 = vmax.f32 %v10195_v46, 0.0  ;;  %v1376_v9 = vpop.f32.mrf.mxu0  ;;  %v12215_v58 = vld [vmem:[#allocation52_spill] sm:$0xff] }
 0x221   : > { %v10221_v17 = vmax.f32 %v2160_v35, %v2252_v38  ;;  %v12212_v18 = vmax.f32 %v10013_v13, 0.0  ;;  %v12213_v2 = vrot.slane %v10060_v63, 1  ;;  %v12214_v54 = vrot.slane %v10017_v8, 1  ;;  %v12216_v63 = vld [vmem:[#allocation48_spill] sm:$0xff] }
 0x222   : > { %v2270_v10 = vmax.f32 %v12211_v27, %v2238_v22  ;;  %v1853_v56 = vadd.f32 %v1821_v42, %v1364_v3  ;;  %v2318_v59 = vpack.c.bf16 %v2286_v26, %v2285_v43  ;;  %v1823_v50 = vmul.f32 %v12215_v58, %v1614_v6  ;;  %v1378_v13 = vpop.f32.mrf.mxu0  ;;  %v12219_v26 = vld [vmem:[#allocation39_spill] sm:$0xff]  ;;  %v8074_v23 = vld [vmem:[%s12009_s17 + $0x10] ss:$8 sps:$4 sm:$0xff]  }
 0x223   : > { %v2269_v49 = vmax.f32 %v12212_v18, %v2239_v20  ;;  %v1899_v15 = vsel %vm1895_vm2, %v12214_v54, %v12213_v2  ;;  %v10233_v14 = vadd.f32 %v9809_v51, %v2109_v57  ;;  %v1854_v35 = vadd.f32 %v1822_v11, %v1368_v41 }
 0x224   : > { %v1597_v22 = vrot.slane %v1376_v9, 7  ;;  %v10237_v20 = vrot.slane %v2177_v62, 1  ;;  %v10241_v8 = vrot.slane %v2178_v24, 1  ;;  %v2084_v3 = vmul.f32 %v12216_v63, %v1898_v19  ;;  %7440 = vmatprep.subr.bf16.mxu1 %v2318_v59  ;;  %v12220_v9 = vld [vmem:[#allocation51_spill] sm:$0xff]  ;;  %v12221_v59 = vld [vmem:[#allocation56_spill] sm:$0xff] }
 0x225   : > { %v2310_v34 = vpack.c.bf16 %v2270_v10, %v2269_v49  ;;  %v2156_v42 = vadd.f32 %v9809_v51, %v2117_v55  ;;  %v10247_v28 = vrot.slane %v2179_v25, 1  ;;  %v10251_v41 = vrot.slane %v2176_v47, 1  ;;  %v1382_v55 = vpop.f32.mrf.mxu0 }
 0x226   : > { %v12217_v43 = vrot.slane %v10036_v61, 1  ;;  %v12218_v57 = vrot.slane %v9999_v7, 1  ;;  %v1613_v19 = vsel %vm1606_vm1, %v1596_v45, %v1597_v22  ;;  %v1855_v11 = vadd.f32 %v1823_v50, %v1374_v39 }
 0x227   : > { %7441 = vmatpush3.bf16.msra.mxu1 %v2310_v34  ;;  %v1824_v38 = vmul.f32 %v12219_v26, %v1613_v19  ;;  %v1598_v27 = vrot.slane %v1382_v55, 7  ;;  %v2188_v10 = vmax.f32 %v2156_v42, 0.0  ;;  %v2180_v6 = vmax.f32 %v10233_v14, 0.0  ;;  %v1384_v49 = vpop.f32.mrf.mxu0  ;;  %v8072_v14 = vld [vmem:[%s12009_s17 + $0x14] ss:$8 sps:$4 sm:$0xff]  }
 0x228   : > { %v1902_v48 = vsel %vm1895_vm2, %v12218_v57, %v12217_v43  ;;  %v2110_v18 = vadd.f32 %v10134_v29, %v1853_v56  ;;  %v2111_v61 = vadd.f32 %v10148_v36, %v1854_v35  ;;  %v2242_v7 = vsel %vm1895_vm2, %v10010_v21, %v10026_v40  ;;  %v12222_v29 = vld [vmem:[#allocation47_spill] sm:$0xff] }
 0x229   : > { %v2080_v45 = vmul.f32 %v12220_v9, %v1902_v48  ;;  %v1856_v2 = vadd.f32 %v1824_v38, %v1378_v13  ;;  %v1612_v39 = vsel %vm1606_vm1, %v1597_v22, %v1598_v27  ;;  %v10272_v54 = vrot.slane %v2188_v10, 1  ;;  %v1386_v36 = vpop.f32.mrf.mxu0  ;;  %v12224_v22 = vld [vmem:[#allocation49_spill] sm:$0xff] }
 0x22a   : > { %v2081_v58 = vmul.f32 %v12221_v59, %v10128_v44  ;;  %v1825_v56 = vmul.f32 %v12222_v29, %v1612_v39  ;;  %v2243_v50 = vsel %vm1895_vm2, %v10003_v0, %v10010_v21  ;;  %v12223_v35 = vmax.f32 %v9947_v60, 0.0  ;;  %v12226_v60 = vld [vmem:[#allocation75_spill] sm:$0xff]  ;;  %v12231_v39 = vld [vmem:[#allocation50_spill] sm:$0xff] }
 0x22b   : > { %v2112_v13 = vadd.f32 %v2080_v45, %v1855_v11  ;;  %v2082_v63 = vmul.f32 %v12224_v22, %v10098_v1  ;;  %v1599_v42 = vrot.slane %v1386_v36, 7  ;;  %v2224_v44 = vsel %vm1895_vm2, %v10272_v54, %v10172_v53  ;;  %v12227_v1 = vld [vmem:[#allocation53_spill] sm:$0xff] }
 0x22c   : > { %v10283_v34 = vmax.f32 %v12223_v35, %v2242_v7  ;;  %v1857_v43 = vadd.f32 %v1825_v56, %v1384_v49  ;;  %v10291_v57 = vmax.f32 %v2188_v10, %v2224_v44  ;;  %v12225_v48 = vmax.f32 %v9937_v31, 0.0  ;;  %v12229_v49 = vld [vmem:[#allocation42_spill] sm:$0xff]  ;;  %v12230_v31 = vld [vmem:[#allocation37_spill] sm:$0xff] }
 0x22d   : > { %v2168_v19 = vmax.f32 %v12226_v60, 0.0  ;;  %v10299_v55 = vadd.f32 %v9809_v51, %v2111_v61  ;;  %v2113_v11 = vadd.f32 %v2081_v58, %v1856_v2  ;;  %v12228_v26 = vrot.slane %v12227_v1, 7  ;;  %v1388_v2 = vpop.f32.mrf.mxu0  ;;  %v12232_v58 = vld [vmem:[#allocation73_spill] sm:$0xff]  ;;  %v12234_v35 = vld [vmem:[#allocation54_spill] sm:$0xff] }
 0x22e   : > { %v10295_v21 = vmax.f32 %v12225_v48, %v2243_v50  ;;  %v1611_v53 = vsel %vm1606_vm1, %v1598_v27, %v1599_v42  ;;  %v2114_v10 = vadd.f32 %v2082_v63, %v1857_v43  ;;  %v10312_v61 = vadd.f32 %v9809_v51, %v2110_v18  ;;  %v12235_v18 = vld [vmem:[#allocation60_spill] sm:$0xff] }
 0x22f   : > { %v1610_v38 = vsel %vm1606_vm1, %v1599_v42, %v12228_v26  ;;  %v1826_v9 = vmul.f32 %v12230_v31, %v1611_v53  ;;  %v2083_v59 = vmul.f32 %v12231_v39, %v1899_v15  ;;  %v12233_v29 = vmax.f32 %v12232_v58, 0.0 }
 0x230   : > { %v1827_v7 = vmul.f32 %v12229_v49, %v1610_v38  ;;  %v2308_v45 = vpack.c.bf16 %v10283_v34, %v10295_v21  ;;  %v2200_v36 = vrot.slane %v2168_v19, 1  ;;  %v10318_v27 = vadd.f32 %v9809_v51, %v2112_v13  ;;  %v8078_v21 = vld [vmem:[%s12009_s17 + $0x34] ss:$8 sps:$4 sm:$0xff]  }
 0x231   : > { %v2199_v56 = vrot.slane %v12233_v29, 1  ;;  %v2153_v50 = vadd.f32 %v9809_v51, %v2114_v10  ;;  %v1858_v63 = vadd.f32 %v1826_v9, %v1388_v2  ;;  %v2152_v42 = vadd.f32 %v9809_v51, %v2113_v11 }
 0x232   : > { %v1859_v22 = vadd.f32 %v1827_v7, %v12234_v35  ;;  %v2240_v44 = vsel %vm1895_vm2, %v12235_v18, %v10075_v5  ;;  %v2244_v15 = vsel %vm1895_vm2, %v2200_v36, %v10003_v0  ;;  %v2182_v43 = vmax.f32 %v10299_v55, 0.0  ;;  %v12237_v0 = vld [vmem:[#allocation72_spill] sm:$0xff]  ;;  %v12238_v7 = vld [vmem:[#allocation34_spill] sm:$0xff] }
 0x233   : > { %v2245_v13 = vsel %vm1895_vm2, %v2199_v56, %v2200_v36  ;;  %v2115_v60 = vadd.f32 %v2083_v59, %v1858_v63  ;;  %v12236_v1 = vmov %v12233_v29  ;;  %v2185_v11 = vmax.f32 %v2153_v50, 0.0  ;;  %v12241_v59 = vld [vmem:[#allocation69_spill] sm:$0xff]  ;;  %v12245_v35 = vld [vmem:[#allocation68_spill] sm:$0xff] }
 0x234   : > { %v2116_v48 = vadd.f32 %v2084_v3, %v1859_v22  ;;  %v10335_v26 = vmax.f32 %v12236_v1, %v2245_v13  ;;  %v2241_v5 = vsel %vm1895_vm2, %v10026_v40, %v12235_v18  ;;  %v10341_v38 = vmax.f32 %v2168_v19, %v2244_v15  ;;  %v12240_v40 = vld [vmem:[#allocation71_spill] sm:$0xff]  ;;  %v12247_v15 = vld [vmem:[#allocation74_spill] sm:$0xff] }
 0x235   : > { %v2246_v53 = vsel %vm1895_vm2, %v12237_v0, %v2199_v56  ;;  %v2183_v10 = vmax.f32 %v10318_v27, 0.0  ;;  %v2154_v3 = vadd.f32 %v9809_v51, %v2115_v60  ;;  %v12239_v31 = vmax.f32 %v12238_v7, 0.0  ;;  %v12243_v27 = vld [vmem:[#allocation76_spill] sm:$0xff] }
 0x236   : > { %v2155_v49 = vadd.f32 %v9809_v51, %v2116_v48  ;;  %v2184_v2 = vmax.f32 %v2152_v42, 0.0  ;;  %v2307_v39 = vpack.c.bf16 %v10341_v38, %v10335_v26  ;;  %v2247_v19 = vsel %vm1895_vm2, %v12240_v40, %v12237_v0  ;;  %v12248_v0 = vld [vmem:[#allocation70_spill] sm:$0xff] }
 0x237   : > { %v2268_v9 = vmax.f32 %v12239_v31, %v2240_v44  ;;  %v12242_v58 = vmax.f32 %v12241_v59, 0.0  ;;  %v2186_v56 = vmax.f32 %v2154_v3, 0.0  ;;  %v12244_v51 = vmax.f32 %v12243_v27, 0.0 }
 0x238   : > { %v2187_v36 = vmax.f32 %v2155_v49, 0.0  ;;  %v12246_v22 = vmax.f32 %v12245_v35, 0.0  ;;  %v2181_v42 = vmax.f32 %v10312_v61, 0.0  ;;  %v2214_v18 = vrot.slane %v2182_v43, 1 }
 0x239   : > { %v10359_v29 = vmax.f32 %v12242_v58, %v2246_v53  ;;  %v2267_v50 = vmax.f32 %v12244_v51, %v2241_v5  ;;  %v2217_v44 = vrot.slane %v2185_v11, 1  ;;  %v2248_v13 = vsel %vm1895_vm2, %v12247_v15, %v12240_v40 }
 0x23a   : > { %v2261_v63 = vmax.f32 %v12246_v22, %v2247_v19  ;;  %v2218_v48 = vrot.slane %v2186_v56, 1  ;;  %v2219_v60 = vrot.slane %v2187_v36, 1  ;;  %v2215_v5 = vrot.slane %v2183_v10, 1 }
 0x23b   : > { %v2309_v1 = vpack.c.bf16 %v2268_v9, %v2267_v50  ;;  %v2216_v38 = vrot.slane %v2184_v2, 1  ;;  %v12249_v53 = vmax.f32 %v12248_v0, 0.0  ;;  %v2234_v61 = vsel %vm1895_vm2, %v10241_v8, %v10247_v28  ;;  %v12251_v50 = vld [vmem:[#allocation59_spill] sm:$0xff] }
 0x23c   : > { %v2306_v26 = vpack.c.bf16 %v10359_v29, %v2261_v63  ;;  %v2225_v49 = vsel %vm1895_vm2, %v2219_v60, %v10272_v54  ;;  %v2226_v7 = vsel %vm1895_vm2, %v2218_v48, %v2219_v60  ;;  %v2227_v31 = vsel %vm1895_vm2, %v2217_v44, %v2218_v48  ;;  %v12250_v29 = vld [vmem:[#allocation77_spill] sm:$0xff] }
 0x23d   : > { %v2260_v3 = vmax.f32 %v12249_v53, %v2248_v13  ;;  %v2235_v9 = vsel %vm1895_vm2, %v10237_v20, %v10241_v8  ;;  %v2283_v40 = vmax.f32 %v2187_v36, %v2225_v49  ;;  %v2281_v19 = vmax.f32 %v2185_v11, %v2227_v31  ;;  %v12253_v36 = vld [vmem:[#allocation67_spill] sm:$0xff]  ;;  %v8086_v60 = vld [vmem:[%s12009_s17 + $0x50] ss:$8 sps:$4 sm:$0xff]   ;;  %v8096_v49 = vld [vmem:[%s12013_s21 + $0x20] sm:$0xff]  }
 0x23e   : > { %v2282_v59 = vmax.f32 %v2186_v56, %v2226_v7  ;;  %v2228_v58 = vsel %vm1895_vm2, %v2216_v38, %v2217_v44  ;;  %v2273_v54 = vmax.f32 %v2177_v62, %v2235_v9  ;;  %v2274_v51 = vmax.f32 %v2178_v24, %v2234_v61  ;;  %v8093_v53 = vld [vmem:[%s12013_s21 + $0x38] sm:$0xff]   ;;  %v8095_v61 = vld [vmem:[%s12013_s21 + $0x28] sm:$0xff]   ;;  %v8098_v9 = vld [vmem:[%s12013_s21 + $0x10] sm:$0xff]  }
 0x23f   : > { %v2305_v27 = vpack.c.bf16 %v2260_v3, %v12250_v29  ;;  %v2304_v35 = vpack.c.bf16 %v12251_v50, %v10143_v30  ;;  %v2317_v22 = vpack.c.bf16 %v10291_v57, %v2283_v40  ;;  %v2229_v8 = vsel %vm1895_vm2, %v2215_v5, %v2216_v38  ;;  %v8092_v38 = vld [vmem:[%s12009_s17 + $0x70] ss:$8 sps:$4 sm:$0xff]   ;;  %7618 = vmatprep.subr.bf16.mxu0 %v8093_v53  ;;  %v8099_v40 = vld [vmem:[%s12013_s21 + $0x8] sm:$0xff]  }
 0x240   : > { %v2236_v11 = vsel %vm1895_vm2, %v10251_v41, %v10237_v20  ;;  %v2237_v37 = vsel %vm1895_vm2, %v10170_v12, %v10251_v41  ;;  %v2312_v62 = vpack.c.bf16 %v2274_v51, %v2273_v54  ;;  %v12252_v33 = vmax.f32 %v10092_v16, 0.0  ;;  %7619 = vmatpush3.bf16.msra.mxu0 %v8093_v53  ;;  %v8094_v3 = vld [vmem:[%s12013_s21 + $0x30] sm:$0xff]   ;;  %v8097_v7 = vld [vmem:[%s12013_s21 + $0x18] sm:$0xff]  }
 0x241   : > { %v2272_v30 = vmax.f32 %v2176_v47, %v2236_v11  ;;  %v2253_v57 = vsel %vm1895_vm2, %v9898_v52, %v10202_v32  ;;  %7442 = vmatprep.subr.bf16.mxu1 %v2317_v22  ;;  %v2316_v56 = vpack.c.bf16 %v2282_v59, %v2281_v19  ;;  %v2280_v20 = vmax.f32 %v2184_v2, %v2228_v58  ;;  %v8106_v53 = vld [vmem:[#allocation6 + $0x34] ss:$12 sps:$4 sm:$0xff]  }
 0x242   : > { %v2271_v24 = vmax.f32 %v12252_v33, %v2237_v37  ;;  %v12254_v63 = vmax.f32 %v12253_v36, 0.0  ;;  %v2213_v15 = vrot.slane %v2181_v42, 1  ;;  %7443 = vmatpush3.bf16.msra.mxu1 %v2309_v1  ;;  %v2230_v16 = vsel %vm1895_vm2, %v2214_v18, %v2215_v5  ;;  %v8087_v1 = vld [vmem:[%s12009_s17 + $0x64] ss:$8 sps:$4 sm:$0xff]   ;;  %v8090_v5 = vld [vmem:[%s12009_s17 + $0x74] ss:$8 sps:$4 sm:$0xff]   ;;  %7620 = vmatprep.subr.bf16.mxu0 %v8094_v3 }
 0x243   : > { %7444 = vmatprep.subr.bf16.mxu1 %v2316_v56  ;;  %v2279_v46 = vmax.f32 %v2183_v10, %v2229_v8  ;;  %v2212_v41 = vrot.slane %v2180_v6, 1  ;;  %v2278_v2 = vmax.f32 %v2182_v43, %v2230_v16  ;;  %v8081_v43 = vld [vmem:[%s12009_s17 + $0x44] ss:$8 sps:$4 sm:$0xff]   ;;  %v12255_v0 = vmov 0  }
 0x244   : > { %v2255_v44 = vmax.f32 %v12254_v63, %v2253_v57  ;;  %v2311_v12 = vpack.c.bf16 %v2272_v30, %v2271_v24  ;;  %v2231_v52 = vsel %vm1895_vm2, %v2213_v15, %v2214_v18  ;;  %7621 = vmatpush3.bf16.msra.mxu0 %v8094_v3  ;;  %v8107_v3 = vld [vmem:[#allocation6 + $0x50] ss:$12 sps:$4 sm:$0xff]  }
 0x245   : > { %v2315_v32 = vpack.c.bf16 %v2280_v20, %v2279_v46  ;;  %v2232_v13 = vsel %vm1895_vm2, %v2212_v41, %v2213_v15  ;;  %v2277_v10 = vmax.f32 %v2181_v42, %v2231_v52  ;;  %v8084_v42 = vld [vmem:[%s12009_s17 + $0x54] ss:$8 sps:$4 sm:$0xff]   ;;  %7622 = vmatprep.subr.bf16.mxu0 %v8095_v61 }
 0x246   : > { %v2303_v47 = vpack.c.bf16 %v10221_v17, %v2255_v44  ;;  %7445 = vmatpush3.bf16.msra.mxu1 %v2308_v45  ;;  %v2233_v17 = vsel %vm1895_vm2, %v10247_v28, %v2212_v41  ;;  %v2276_v18 = vmax.f32 %v2180_v6, %v2232_v13  ;;  %v8069_v28 = vld [vmem:[%s12009_s17] ss:$8 sps:$4 sm:$0xff]   ;;  %v8080_v45 = vld [vmem:[%s12009_s17 + $0x30] ss:$8 sps:$4 sm:$0xff]  }
 0x247   : > { %7446 = vmatprep.subr.bf16.mxu1 %v2315_v32  ;;  %v2314_v48 = vpack.c.bf16 %v2278_v2, %v2277_v10  ;;  %v2275_v55 = vmax.f32 %v2179_v25, %v2233_v17  ;;  %v8075_v25 = vld [vmem:[%s12009_s17 + $0x24] ss:$8 sps:$4 sm:$0xff]   ;;  %v8077_v6 = vld [vmem:[%s12009_s17 + $0x20] ss:$8 sps:$4 sm:$0xff]  }
 0x248   : > { %7623 = vmatpush3.bf16.msra.mxu0 %v8095_v61 }
 0x249   : > { %v2313_v34 = vpack.c.bf16 %v2276_v18, %v2275_v55  ;;  %7624 = vmatprep.subr.bf16.mxu0 %v8096_v49 }
 0x24a   : > { %7447 = vmatpush3.bf16.msra.mxu1 %v2307_v39  ;;  %v8083_v39 = vld [vmem:[%s12009_s17 + $0x40] ss:$8 sps:$4 sm:$0xff]  }
 0x24b   : > { %7448 = vmatprep.subr.bf16.mxu1 %v2314_v48 }
 0x24c   : > { %7625 = vmatpush3.bf16.msra.mxu0 %v8096_v49 }
 0x24d   : > { %7626 = vmatprep.subr.bf16.mxu0 %v8097_v7 }
 0x24e   : > { %7449 = vmatpush3.bf16.msra.mxu1 %v2306_v26  ;;  %v8089_v26 = vld [vmem:[%s12009_s17 + $0x60] ss:$8 sps:$4 sm:$0xff]  }
 0x24f   : > { %7450 = vmatprep.subr.bf16.mxu1 %v2313_v34 }
 0x250   : > { %7627 = vmatpush3.bf16.msra.mxu0 %v8097_v7 }
 0x251   : > { %7628 = vmatprep.subr.bf16.mxu0 %v8098_v9 }
 0x252   : > { %7451 = vmatpush3.bf16.msra.mxu1 %v2305_v27 }
 0x253   : > { %7452 = vmatprep.subr.bf16.mxu1 %v2312_v62 }
 0x254   : > { %7629 = vmatpush3.bf16.msra.mxu0 %v8098_v9  ;;  %v2727_v9 = vld [vmem:[%s12006_s14 + $0x70] sm:$0xff] }
 0x255   : > { %7630 = vmatprep.subr.bf16.mxu0 %v8099_v40 }
 0x256   : > { %7453 = vmatpush3.bf16.msra.mxu1 %v2304_v35  ;;  %v8100_v35 = vld [vmem:[%s12013_s21] sm:$0xff]  }
 0x257   : > { %7454 = vmatprep.subr.bf16.mxu1 %v2311_v12 }
 0x258   : > { %7631 = vmatpush3.bf16.msra.mxu0 %v8099_v40 }
 0x259   : > { %7632 = vmatprep.subr.bf16.mxu0 %v8100_v35 }
 0x25a   : > { %7455 = vmatpush3.bf16.msra.mxu1 %v2303_v47 }
 0x25c   : > { %7633 = vmatpush3.bf16.msra.mxu0 %v8100_v35 }
 0x25d   : > { %2432 = vmatmul.mubr.bf16.vlgmr.msra.gmra.mxu1 %v8069_v28  ;;  %7650 = vmatprep.subr.bf16.mxu0 %v8107_v3 }
 0x25e   : > { %2439 = vmatprep.mubr.bf16.mxu1 %v8072_v14 }
 0x265   : > { %2440 = vmatmul.mubr.bf16.gmra.mxu1 %v8074_v23 }
 0x266   : > { %2447 = vmatprep.mubr.bf16.mxu1 %v8075_v25 }
 0x26d   : > { %2448 = vmatmul.mubr.bf16.gmra.mxu1 %v8077_v6 }
 0x26e   : > { %2455 = vmatprep.mubr.bf16.mxu1 %v8078_v21 }
 0x275   : > { %2456 = vmatmul.mubr.bf16.gmra.mxu1 %v8080_v45 }
 0x276   : > { %2463 = vmatprep.mubr.bf16.mxu1 %v8081_v43 }
 0x27d   : > { %2464 = vmatmul.mubr.bf16.gmra.mxu1 %v8083_v39 }
 0x27e   : > { %2471 = vmatprep.mubr.bf16.mxu1 %v8084_v42 }
 0x285   : > { %2472 = vmatmul.mubr.bf16.gmra.mxu1 %v8086_v60 }
 0x286   : > { %2479 = vmatprep.mubr.bf16.mxu1 %v8087_v1 }
 0x28d   : > { %2480 = vmatmul.mubr.bf16.gmra.mxu1 %v8089_v26 }
 0x28e   : > { %2487 = vmatprep.mubr.bf16.mxu1 %v8090_v5  ;;  %v8101_v5 = vld [vmem:[#allocation6 + $0x48] ss:$12 sps:$4 sm:$0xff]  }
 0x295   : > { %2488 = vmatmul.mubr.bf16.gmra.mxu1 %v8092_v38  ;;  %v8103_v38 = vld [vmem:[#allocation6 + $0x4c] ss:$12 sps:$4 sm:$0xff]  }
 0x296   : > { %2874 = vmatprep.mubr.bf16.mxu1 %v12255_v0  ;;  %2850 = vmatprep.subr.bf16.mxu1 %v8103_v38  ;;  %v8111_v38 = vld [vmem:[#allocation6 + $0x1c] ss:$12 sps:$4 sm:$0xff]  }
 0x297   : > { %2851 = vmatpush1.bf16.msra.mxu1 %v8101_v5 }
 0x298   : > { %2852 = vmatprep.subr.bf16.mxu1 %v8106_v53  ;;  %v8112_v53 = vld [vmem:[#allocation6 + $0x20] ss:$12 sps:$4 sm:$0xff]  }
 0x31d   : > { %v7456_v31 = vpop.f32.mrf.mxu1 }
 0x31f   : > { %v7457_v19 = vpop.f32.mrf.mxu1 }
 0x320   : > { %v10508_v29 = vadd.f32 %v7457_v19, %v7456_v31  ;;  %v8104_v31 = vld [vmem:[#allocation6 + $0x30] ss:$12 sps:$4 sm:$0xff]   ;;  %v12256_v19 = vmov 1  }
 0x321   : > { %v7459_v59 = vpop.f32.mrf.mxu1  ;;  %2853 = vmatpush1.bf16.msra.mxu1 %v8104_v31  ;;  %v2726_v31 = vld [vmem:[%s12006_s14 + $0x68] sm:$0xff] }
 0x322   : > { %2854 = vmatprep.subr.bf16.mxu1 %v8111_v38 }
 0x323   : > { %v7460_v58 = vpop.f32.mrf.mxu1 }
 0x324   : > { %v10510_v27 = vadd.f32 %v7460_v58, %v7459_v59 }
 0x325   : > { %v7462_v54 = vpop.f32.mrf.mxu1 }
 0x326   : > { %v7966_v51 = vpack.i.bf16 %v10510_v27, %v10508_v29 }
 0x327   : > { %v7463_v50 = vpop.f32.mrf.mxu1 }
 0x328   : > { %7967 = vrot.lane.b32.xlu0 %v7966_v51, %s8960_s12  ;;  %v10518_v11 = vadd.f32 %v7463_v50, %v7462_v54 }
 0x329   : > { %v7465_v22 = vpop.f32.mrf.mxu1 }
 0x32b   : > { %v7466_v8 = vpop.f32.mrf.mxu1 }
 0x32c   : > { %v10520_v37 = vadd.f32 %v7466_v8, %v7465_v22 }
 0x32d   : > { %v7468_v62 = vpop.f32.mrf.mxu1 }
 0x32e   : > { %v7971_v33 = vpack.i.bf16 %v10520_v37, %v10518_v11 }
 0x32f   : > { %v7469_v24 = vpop.f32.mrf.mxu1 }
 0x330   : > { %7972 = vrot.lane.b32.xlu1 %v7971_v33, %s8960_s12  ;;  %v10525_v56 = vadd.f32 %v7469_v24, %v7468_v62 }
 0x331   : > { %v7471_v30 = vpop.f32.mrf.mxu1 }
 0x333   : > { %v7472_v57 = vpop.f32.mrf.mxu1 }
 0x334   : > { %v10527_v20 = vadd.f32 %v7472_v57, %v7471_v30  ;;  %v8108_v57 = vld [vmem:[#allocation6 + $0x38] ss:$12 sps:$4 sm:$0xff]  }
 0x335   : > { %v7474_v36 = vpop.f32.mrf.mxu1 }
 0x336   : > { %v7976_v63 = vpack.i.bf16 %v10527_v20, %v10525_v56 }
 0x337   : > { %v7475_v44 = vpop.f32.mrf.mxu1 }
 0x338   : > { %7977 = vrot.lane.b32.xlu0 %v7976_v63, %s8960_s12  ;;  %v10532_v12 = vadd.f32 %v7475_v44, %v7474_v36 }
 0x339   : > { %v7477_v15 = vpop.f32.mrf.mxu1 }
 0x33b   : > { %v7478_v16 = vpop.f32.mrf.mxu1 }
 0x33c   : > { %v10534_v46 = vadd.f32 %v7478_v16, %v7477_v15 }
 0x33d   : > { %v7480_v47 = vpop.f32.mrf.mxu1 }
 0x33e   : > { %v7981_v41 = vpack.i.bf16 %v10534_v46, %v10532_v12 }
 0x33f   : > { %v7481_v52 = vpop.f32.mrf.mxu1 }
 0x340   : > { %7982 = vrot.lane.b32.xlu1 %v7981_v41, %s8960_s12  ;;  %v10539_v13 = vadd.f32 %v7481_v52, %v7480_v47 }
 0x341   : > { %v7483_v32 = vpop.f32.mrf.mxu1 }
 0x343   : > { %v7484_v2 = vpop.f32.mrf.mxu1 }
 0x344   : > { %v10541_v10 = vadd.f32 %v7484_v2, %v7483_v32 }
 0x345   : > { %v7486_v17 = vpop.f32.mrf.mxu1 }
 0x346   : > { %v7986_v48 = vpack.i.bf16 %v10541_v10, %v10539_v13 }
 0x347   : > { %v7487_v18 = vpop.f32.mrf.mxu1 }
 0x348   : > { %7987 = vrot.lane.b32.xlu0 %v7986_v48, %s8960_s12  ;;  %v10546_v28 = vadd.f32 %v7487_v18, %v7486_v17 }
 0x349   : > { %v7489_v55 = vpop.f32.mrf.mxu1 }
 0x34b   : > { %v7490_v34 = vpop.f32.mrf.mxu1 }
 0x34c   : > { %v10548_v14 = vadd.f32 %v7490_v34, %v7489_v55 }
 0x34d   : > { %v7492_v23 = vpop.f32.mrf.mxu1 }
 0x34e   : > { %v7991_v25 = vpack.i.bf16 %v10548_v14, %v10546_v28 }
 0x34f   : > { %v7493_v6 = vpop.f32.mrf.mxu1 }
 0x350   : > { %7992 = vrot.lane.b32.xlu1 %v7991_v25, %s8960_s12  ;;  %v10553_v43 = vadd.f32 %v7493_v6, %v7492_v23 }
 0x351   : > { %v7495_v21 = vpop.f32.mrf.mxu1 }
 0x353   : > { %v7496_v45 = vpop.f32.mrf.mxu1 }
 0x354   : > { %v10555_v39 = vadd.f32 %v7496_v45, %v7495_v21 }
 0x355   : > { %v7498_v42 = vpop.f32.mrf.mxu1 }
 0x356   : > { %v7996_v60 = vpack.i.bf16 %v10555_v39, %v10553_v43 }
 0x357   : > { %v7499_v1 = vpop.f32.mrf.mxu1 }
 0x358   : > { %7997 = vrot.lane.b32.xlu0 %v7996_v60, %s8960_s12  ;;  %v10560_v49 = vadd.f32 %v7499_v1, %v7498_v42 }
 0x359   : > { %v7501_v26 = vpop.f32.mrf.mxu1 }
 0x35b   : > { %v7502_v61 = vpop.f32.mrf.mxu1 }
 0x35c   : > { %v10562_v7 = vadd.f32 %v7502_v61, %v7501_v26  ;;  %3285 = vperm.xlu0 %8008, %v2727_v9   ;;  %v8116_v61 = vld [vmem:[#allocation6 + $0x8] ss:$12 sps:$4 sm:$0xff]  }
 0x35e   : > { %v8001_v40 = vpack.i.bf16 %v10562_v7, %v10560_v49 }
 0x360   : > { %8002 = vrot.lane.b32.xlu1 %v8001_v40, %s8960_s12  ;;  %v2721_v40 = vld [vmem:[%s12006_s14 + $0x40] sm:$0xff] }
 0x364   : > { %3156 = vperm.xlu1 %8006, %v2727_v9   ;;  %v2724_v9 = vld [vmem:[%s12006_s14 + $0x58] sm:$0xff] }
 0x368   : > { %8007 = vset.pattern.permute.xlu1 %v12256_v19 }
 0x39a   : > { %v7968_v59 = vpop.permute.xlu0 %7967 }
 0x39b   : > { %v7970_v58 = vunpack.i.h.bf16 %v7968_v59  ;;  %v7969_v54 = vunpack.i.l.bf16 %v7968_v59  ;;  %v2723_v59 = vld [vmem:[%s12006_s14 + $0x50] sm:$0xff] }
 0x39c   : > { %3269 = vperm.xlu0 %8008, %v2723_v59  }
 0x39d   : > { %v2529_v51 = vmax.f32 %v10510_v27, %v7970_v58  ;;  %v2528_v50 = vmax.f32 %v10508_v29, %v7969_v54  ;;  %v2719_v58 = vld [vmem:[%s12006_s14 + $0x30] sm:$0xff]  ;;  %v2722_v54 = vld [vmem:[%s12006_s14 + $0x48] sm:$0xff] }
 0x39f   : > { %v2544_v35 = vpack.c.bf16 %v2529_v51, %v2528_v50  ;;  %v2720_v51 = vld [vmem:[%s12006_s14 + $0x38] sm:$0xff]  ;;  %v2717_v50 = vld [vmem:[%s12006_s14 + $0x20] sm:$0xff] }
 0x3a0   : > { %3253 = vperm.xlu0 %8008, %v2719_v58  }
 0x3a1   : > { %7634 = vmatprep.mubr.bf16.mxu0 %v2544_v35  ;;  %v2718_v35 = vld [vmem:[%s12006_s14 + $0x28] sm:$0xff] }
 0x3a2   : > { %v7973_v22 = vpop.permute.xlu1 %7972 }
 0x3a3   : > { %v7975_v8 = vunpack.i.h.bf16 %v7973_v22  ;;  %v7974_v62 = vunpack.i.l.bf16 %v7973_v22  ;;  %v2716_v22 = vld [vmem:[%s12006_s14 + $0x18] sm:$0xff] }
 0x3a4   : > { %8016 = vset.pattern.permute.xlu0 %v12255_v0 }
 0x3a5   : > { %v2531_v33 = vmax.f32 %v10520_v37, %v7975_v8  ;;  %v2530_v24 = vmax.f32 %v10518_v11, %v7974_v62  ;;  %v2715_v8 = vld [vmem:[%s12006_s14 + $0x10] sm:$0xff]  ;;  %v2714_v62 = vld [vmem:[%s12006_s14 + $0x8] sm:$0xff] }
 0x3a7   : > { %v2545_v30 = vpack.c.bf16 %v2531_v33, %v2530_v24 }
 0x3a9   : > { %7635 = vmatmul.mubr.bf16.vlgmr.msra.gmra.mxu0 %v2545_v30 }
 0x3aa   : > { %v7978_v36 = vpop.permute.xlu0 %7977  ;;  %7651 = vmatpush3.bf16.msra.mxu0 %v8107_v3  ;;  %v8115_v3 = vld [vmem:[#allocation6 + $0x4] ss:$12 sps:$4 sm:$0xff]  }
 0x3ab   : > { %v7980_v63 = vunpack.i.h.bf16 %v7978_v36  ;;  %v7979_v44 = vunpack.i.l.bf16 %v7978_v36  ;;  %7652 = vmatprep.subr.bf16.mxu0 %v8108_v57 }
 0x3ad   : > { %v2533_v27 = vmax.f32 %v10527_v20, %v7980_v63  ;;  %v2532_v29 = vmax.f32 %v10525_v56, %v7979_v44 }
 0x3ae   : > { %7653 = vmatpush3.bf16.msra.mxu0 %v8108_v57 }
 0x3af   : > { %v2546_v15 = vpack.c.bf16 %v2533_v27, %v2532_v29  ;;  %7654 = vmatprep.subr.bf16.mxu0 %v8112_v53 }
 0x3b1   : > { %7638 = vmatprep.mubr.bf16.mxu0 %v2546_v15 }
 0x3b2   : > { %v7983_v16 = vpop.permute.xlu1 %7982  ;;  %7655 = vmatpush3.bf16.msra.mxu0 %v8112_v53 }
 0x3b3   : > { %v7985_v47 = vunpack.i.h.bf16 %v7983_v16  ;;  %v7984_v37 = vunpack.i.l.bf16 %v7983_v16  ;;  %7656 = vmatprep.subr.bf16.mxu0 %v8116_v61 }
 0x3b5   : > { %v2535_v11 = vmax.f32 %v10534_v46, %v7985_v47  ;;  %v2534_v41 = vmax.f32 %v10532_v12, %v7984_v37 }
 0x3b6   : > { %7657 = vmatpush3.bf16.msra.mxu0 %v8116_v61 }
 0x3b7   : > { %v2547_v52 = vpack.c.bf16 %v2535_v11, %v2534_v41 }
 0x3b9   : > { %7639 = vmatmul.mubr.bf16.gmra.mxu0 %v2547_v52 }
 0x3ba   : > { %v7988_v32 = vpop.permute.xlu0 %7987 }
 0x3bb   : > { %v7990_v2 = vunpack.i.h.bf16 %v7988_v32  ;;  %v7989_v17 = vunpack.i.l.bf16 %v7988_v32 }
 0x3bd   : > { %v2537_v48 = vmax.f32 %v10541_v10, %v7990_v2  ;;  %v2536_v20 = vmax.f32 %v10539_v13, %v7989_v17 }
 0x3bf   : > { %v2548_v56 = vpack.c.bf16 %v2537_v48, %v2536_v20 }
 0x3c1   : > { %7642 = vmatprep.mubr.bf16.mxu0 %v2548_v56 }
 0x3c2   : > { %v7993_v18 = vpop.permute.xlu1 %7992 }
 0x3c3   : > { %v7995_v55 = vunpack.i.h.bf16 %v7993_v18  ;;  %v7994_v34 = vunpack.i.l.bf16 %v7993_v18 }
 0x3c5   : > { %v2539_v23 = vmax.f32 %v10548_v14, %v7995_v55  ;;  %v2538_v46 = vmax.f32 %v10546_v28, %v7994_v34  ;;  %v8109_v28 = vld [vmem:[#allocation6 + $0x18] ss:$12 sps:$4 sm:$0xff]  }
 0x3c6   : > { %2855 = vmatpush1.bf16.msra.mxu1 %v8109_v28 }
 0x3c7   : > { %v2549_v25 = vpack.c.bf16 %v2539_v23, %v2538_v46  ;;  %2856 = vmatprep.subr.bf16.mxu1 %v8115_v3 }
 0x3c9   : > { %7643 = vmatmul.mubr.bf16.gmra.mxu0 %v2549_v25 }
 0x3ca   : > { %v7998_v12 = vpop.permute.xlu0 %7997 }
 0x3cb   : > { %v8000_v6 = vunpack.i.h.bf16 %v7998_v12  ;;  %v7999_v21 = vunpack.i.l.bf16 %v7998_v12 }
 0x3cd   : > { %v2541_v45 = vmax.f32 %v10555_v39, %v8000_v6  ;;  %v2540_v10 = vmax.f32 %v10553_v43, %v7999_v21  ;;  %v2713_v39 = vld [vmem:[%s12006_s14] sm:$0xff] }
 0x3ce   : > { %3229 = vperm.xlu1 %8007, %v2713_v39   ;;  %v8113_v43 = vld [vmem:[#allocation6] ss:$12 sps:$4 sm:$0xff]   ;;  %3086 = vperm.xlu0 %8016, %v2713_v39  }
 0x3cf   : > { %v2550_v42 = vpack.c.bf16 %v2541_v45, %v2540_v10  ;;  %2857 = vmatpush1.bf16.msra.mxu1 %v8113_v43 }
 0x3d1   : > { %7646 = vmatprep.mubr.bf16.mxu0 %v2550_v42 }
 0x3d2   : > { %v8003_v13 = vpop.permute.xlu1 %8002 }
 0x3d3   : > { %v8005_v60 = vunpack.i.h.bf16 %v8003_v13  ;;  %v8004_v1 = vunpack.i.l.bf16 %v8003_v13 }
 0x3d5   : > { %v2543_v26 = vmax.f32 %v10562_v7, %v8005_v60  ;;  %v2542_v14 = vmax.f32 %v10560_v49, %v8004_v1  ;;  %v2728_v49 = vld [vmem:[%s12006_s14 + $0x78] sm:$0xff]  ;;  %v2725_v7 = vld [vmem:[%s12006_s14 + $0x60] sm:$0xff] }
 0x3d6   : > { %3289 = vperm.xlu1 %8007, %v2728_v49   ;;  %3161 = vperm.xlu0 %8016, %v2728_v49   ;;  %v8117_v49 = vld [vmem:[#allocation18] sm:$0xff]  }
 0x3d7   : > { %v2551_v5 = vpack.c.bf16 %v2543_v26, %v2542_v14  ;;  %v10685_v45 = vpop.permute.xlu0 %3285 }
 0x3d9   : > { %7647 = vmatmul.mubr.bf16.gmra.mxu0 %v2551_v5 }
 0x3da   : > { %8009 = vset.pattern.permute.xlu1 %v12255_v0  ;;  %3151 = vperm.xlu0 %8016, %v2726_v31  }
 0x3db   : > { %3146 = vperm.xlu1 %8009, %v2725_v7  }
 0x3de   : > { %3136 = vperm.xlu0 %8016, %v2723_v59  }
 0x3df   : > { %8010 = vset.pattern.permute.xlu1 %v12256_v19  ;;  %v10671_v34 = vpop.permute.xlu1 %3156 }
 0x3e0   : > { %3277 = vperm.xlu1 %8010, %v2725_v7  }
 0x3e2   : > { %3131 = vperm.xlu0 %8016, %v2722_v54  }
 0x3e4   : > { %3281 = vperm.xlu1 %8010, %v2726_v31  }
 0x3e6   : > { %3116 = vperm.xlu0 %8016, %v2719_v58  }
 0x3e8   : > { %8011 = vset.pattern.permute.xlu1 %v12255_v0 }
 0x3e9   : > { %3141 = vperm.xlu1 %8011, %v2724_v9  }
 0x3ea   : > { %3111 = vperm.xlu0 %8016, %v2718_v35  }
 0x3ed   : > { %8012 = vset.pattern.permute.xlu1 %v12256_v19 }
 0x3ee   : > { %3273 = vperm.xlu1 %8012, %v2724_v9   ;;  %3096 = vperm.xlu0 %8016, %v2715_v8  }
 0x3f2   : > { %8013 = vset.pattern.permute.xlu1 %v12255_v0  ;;  %8021 = vset.pattern.permute.xlu0 %v12256_v19 }
 0x3f3   : > { %3126 = vperm.xlu1 %8013, %v2721_v40   ;;  %3237 = vperm.xlu0 %8021, %v2715_v8  }
 0x3f7   : > { %8014 = vset.pattern.permute.xlu1 %v12256_v19  ;;  %3233 = vperm.xlu0 %8021, %v2714_v62  }
 0x3f8   : > { %3261 = vperm.xlu1 %8014, %v2721_v40  }
 0x3fb   : > { %8044 = vset.pattern.permute.xlu0 %v12255_v0 }
 0x3fc   : > { %3265 = vperm.xlu1 %8014, %v2722_v54  }
 0x400   : > { %8015 = vset.pattern.permute.xlu1 %v12255_v0 }
 0x401   : > { %3121 = vperm.xlu1 %8015, %v2720_v51  }
 0x405   : > { %8017 = vset.pattern.permute.xlu1 %v12256_v19 }
 0x406   : > { %3257 = vperm.xlu1 %8017, %v2720_v51  }
 0x40a   : > { %8018 = vset.pattern.permute.xlu1 %v12255_v0 }
 0x40b   : > { %3106 = vperm.xlu1 %8018, %v2717_v50  }
 0x40f   : > { %8019 = vset.pattern.permute.xlu1 %v12256_v19 }
 0x410   : > { %3245 = vperm.xlu1 %8019, %v2717_v50  }
 0x414   : > { %3249 = vperm.xlu1 %8019, %v2718_v35  }
 0x417   : > { %v10689_v42 = vpop.permute.xlu0 %3269 }
 0x418   : > { %8020 = vset.pattern.permute.xlu1 %v12255_v0 }
 0x419   : > { %3101 = vperm.xlu1 %8020, %v2716_v22  }
 0x41b   : > { %v10693_v60 = vpop.permute.xlu0 %3253 }
 0x41d   : > { %8022 = vset.pattern.permute.xlu1 %v12256_v19 }
 0x41e   : > { %3241 = vperm.xlu1 %8022, %v2716_v22  }
 0x422   : > { %8023 = vset.pattern.permute.xlu1 %v12255_v0 }
 0x423   : > { %3091 = vperm.xlu1 %8023, %v2714_v62  }
 0x449   : > { %v10673_v23 = vpop.permute.xlu1 %3229  ;;  %v10697_v26 = vpop.permute.xlu0 %3086 }
 0x451   : > { %v10675_v46 = vpop.permute.xlu1 %3289  ;;  %v10701_v5 = vpop.permute.xlu0 %3161 }
 0x455   : > { %v10705_v38 = vpop.permute.xlu0 %3151 }
 0x456   : > { %v10677_v25 = vpop.permute.xlu1 %3146 }
 0x459   : > { %v10709_v39 = vpop.permute.xlu0 %3136 }
 0x45b   : > { %v10679_v12 = vpop.permute.xlu1 %3277 }
 0x45d   : > { %v10711_v3 = vpop.permute.xlu0 %3131 }
 0x45f   : > { %v10681_v6 = vpop.permute.xlu1 %3281 }
 0x461   : > { %v10715_v7 = vpop.permute.xlu0 %3116 }
 0x464   : > { %v10683_v21 = vpop.permute.xlu1 %3141 }
 0x465   : > { %v10719_v9 = vpop.permute.xlu0 %3111 }
 0x469   : > { %v7636_v33 = vpop.f32.mrf.mxu0  ;;  %v10687_v10 = vpop.permute.xlu1 %3273 }
 0x46a   : > { %v3097_v59 = vpop.permute.xlu0 %3096 }
 0x46b   : > { %v2650_v24 = vpop.f32.mrf.mxu0 }
 0x46d   : > { %v7637_v30 = vpop.f32.mrf.mxu0 }
 0x46e   : > { %v2730_v63 = vpack.c.bf16 %v7637_v30, %v7636_v33  ;;  %v10691_v13 = vpop.permute.xlu1 %3126  ;;  %v3238_v35 = vpop.permute.xlu0 %3237 }
 0x46f   : > { %v2653_v57 = vpop.f32.mrf.mxu0 }
 0x470   : > { %v2729_v36 = vpack.c.bf16 %v2653_v57, %v2650_v24 }
 0x472   : > { %7113 = vmatmul.mubr.msk.bf16.vlgmr.msra.gmra.mxu1 %vm2817_vm3, %v2729_v36  ;;  %7658 = vmatprep.mubr.msk.bf16.mxu0 %vm2817_vm3, %v2729_v36 }
 0x473   : > { %7659 = vmatmul.mubr.msk.bf16.vlgmr.msra.gmra.mxu0 %vm2817_vm3, %v2730_v63  ;;  %2884 = vmatprep.mubr.bf16.mxu1 %v12255_v0  ;;  %v10695_v1 = vpop.permute.xlu1 %3261 }
 0x477   : > { %v10699_v14 = vpop.permute.xlu1 %3265 }
 0x479   : > { %v7640_v44 = vpop.f32.mrf.mxu0 }
 0x47a   : > { %7114 = vmatmul.mubr.msk.bf16.gmra.mxu1 %vm2817_vm3, %v2730_v63 }
 0x47b   : > { %v2666_v27 = vpop.f32.mrf.mxu0  ;;  %2894 = vmatprep.mubr.bf16.mxu1 %v12255_v0 }
 0x47c   : > { %v10703_v28 = vpop.permute.xlu1 %3121 }
 0x47d   : > { %v7641_v29 = vpop.f32.mrf.mxu0 }
 0x47e   : > { %v2732_v47 = vpack.c.bf16 %v7641_v29, %v7640_v44 }
 0x47f   : > { %v2669_v15 = vpop.f32.mrf.mxu0 }
 0x480   : > { %v2731_v16 = vpack.c.bf16 %v2669_v15, %v2666_v27 }
 0x481   : > { %v10707_v53 = vpop.permute.xlu1 %3257 }
 0x482   : > { %7115 = vmatmul.mubr.msk.bf16.gmra.mxu1 %vm2817_vm3, %v2731_v16  ;;  %7662 = vmatprep.mubr.msk.bf16.mxu0 %vm2817_vm3, %v2731_v16 }
 0x483   : > { %7663 = vmatmul.mubr.msk.bf16.gmra.mxu0 %vm2817_vm3, %v2732_v47  ;;  %2904 = vmatprep.mubr.bf16.mxu1 %v12255_v0 }
 0x486   : > { %v3107_v43 = vpop.permute.xlu1 %3106 }
 0x489   : > { %v7644_v37 = vpop.f32.mrf.mxu0 }
 0x48a   : > { %7116 = vmatmul.mubr.msk.bf16.gmra.mxu1 %vm2817_vm3, %v2732_v47  ;;  %v3234_v47 = vpop.permute.xlu0 %3233 }
 0x48b   : > { %v2682_v11 = vpop.f32.mrf.mxu0  ;;  %2914 = vmatprep.mubr.bf16.mxu1 %v12255_v0  ;;  %v10713_v61 = vpop.permute.xlu1 %3245 }
 0x48d   : > { %v7645_v41 = vpop.f32.mrf.mxu0 }
 0x48e   : > { %v2734_v2 = vpack.c.bf16 %v7645_v41, %v7644_v37 }
 0x48f   : > { %v2685_v52 = vpop.f32.mrf.mxu0  ;;  %v10717_v31 = vpop.permute.xlu1 %3249 }
 0x490   : > { %v2733_v32 = vpack.c.bf16 %v2685_v52, %v2682_v11 }
 0x492   : > { %7117 = vmatmul.mubr.msk.bf16.gmra.mxu1 %vm2817_vm3, %v2733_v32  ;;  %7666 = vmatprep.mubr.msk.bf16.mxu0 %vm2817_vm3, %v2733_v32 }
 0x493   : > { %7667 = vmatmul.mubr.msk.bf16.gmra.mxu0 %vm2817_vm3, %v2734_v2  ;;  %2924 = vmatprep.mubr.bf16.mxu1 %v12255_v0 }
 0x494   : > { %v3102_v40 = vpop.permute.xlu1 %3101 }
 0x499   : > { %v7648_v17 = vpop.f32.mrf.mxu0  ;;  %v3242_v58 = vpop.permute.xlu1 %3241 }
 0x49a   : > { %7118 = vmatmul.mubr.msk.bf16.gmra.mxu1 %vm2817_vm3, %v2734_v2 }
 0x49b   : > { %v2698_v48 = vpop.f32.mrf.mxu0  ;;  %2934 = vmatprep.mubr.bf16.mxu1 %v12255_v0 }
 0x49d   : > { %v7649_v20 = vpop.f32.mrf.mxu0 }
 0x49e   : > { %v2736_v55 = vpack.c.bf16 %v7649_v20, %v7648_v17  ;;  %v3092_v30 = vpop.permute.xlu1 %3091 }
 0x49f   : > { %v2701_v56 = vpop.f32.mrf.mxu0 }
 0x4a0   : > { %v2735_v18 = vpack.c.bf16 %v2701_v56, %v2698_v48  ;;  %v10743_v48 = vld [vmem:[#allocation7] ss:$0 sm:$0xff] }
 0x4a2   : > { %7119 = vmatmul.mubr.msk.bf16.gmra.mxu1 %vm2817_vm3, %v2735_v18  ;;  %7670 = vmatprep.mubr.msk.bf16.mxu0 %vm2817_vm3, %v2735_v18 }
 0x4a3   : > { %7671 = vmatmul.mubr.msk.bf16.gmra.mxu0 %vm2817_vm3, %v2736_v55  ;;  %2944 = vmatprep.mubr.bf16.mxu1 %v12255_v0 }
 0x4a4   : > { %7690 = vmatprep.mubr.bf16.mxu0 %v8117_v49 }
 0x4aa   : > { %7120 = vmatmul.mubr.msk.bf16.gmra.mxu1 %vm2817_vm3, %v2736_v55 }
 0x532   : > { %v10721_v54 = vpop.f32.mrf.mxu1 }
 0x533   : > { %v7660_v51 = vpop.f32.mrf.mxu0  ;;  %v12063_v62 = vrot.slane %v10721_v54, 7 }
 0x534   : > { %v10723_v50 = vpop.f32.mrf.mxu1  ;;  %v3198_v27 = vrot.slane %v7660_v51, 1 }
 0x535   : > { %v10725_v22 = vpop.f32.mrf.mxu0 }
 0x536   : > { %v2880_v8 = vpop.f32.mrf.mxu1 }
 0x537   : > { %v3053_v33 = vrot.slane %v2880_v8, 7  ;;  %v7661_v24 = vpop.f32.mrf.mxu0 }
 0x538   : > { %v2882_v57 = vpop.f32.mrf.mxu1  ;;  %v3199_v36 = vrot.slane %v7661_v24, 1 }
 0x539   : > { %v3082_v63 = vsel %vm1606_vm1, %v12063_v62, %v3053_v33  ;;  %v10732_v44 = vpop.f32.mrf.mxu0 }
 0x53a   : > { %v3165_v29 = vmul.f32 %v3092_v30, %v3082_v63  ;;  %v12066_v15 = vrot.slane %v10732_v44, 1  ;;  %v2886_v16 = vpop.f32.mrf.mxu1  ;;  %v3224_v32 = vsel %vm1895_vm2, %v3198_v27, %v3199_v36 }
 0x53b   : > { %v3054_v37 = vrot.slane %v2886_v16, 7  ;;  %v3294_v49 = vmul.f32 %v3238_v35, %v3224_v32 }
 0x53c   : > { %v3181_v11 = vadd.f32 %v3165_v29, %v2882_v57  ;;  %v3225_v41 = vsel %vm1895_vm2, %v12066_v15, %v3198_v27  ;;  %v2888_v52 = vpop.f32.mrf.mxu1 }
 0x53d   : > { %v3293_v2 = vmul.f32 %v3234_v47, %v3225_v41  ;;  %v3081_v17 = vsel %vm1606_vm1, %v3053_v33, %v3054_v37 }
 0x53e   : > { %v3166_v20 = vmul.f32 %v3097_v59, %v3081_v17  ;;  %v2890_v56 = vpop.f32.mrf.mxu1 }
 0x53f   : > { %v3309_v18 = vadd.f32 %v3293_v2, %v3181_v11  ;;  %v3055_v55 = vrot.slane %v2890_v56, 7 }
 0x540   : > { %v3182_v51 = vadd.f32 %v3166_v20, %v2888_v52  ;;  %v2892_v8 = vpop.f32.mrf.mxu1 }
 0x541   : > { %v3332_v24 = vadd.f32 %v10743_v48, %v3309_v18  ;;  %v3080_v30 = vsel %vm1606_vm1, %v3054_v37, %v3055_v55 }
 0x542   : > { %v3310_v57 = vadd.f32 %v3294_v49, %v3182_v51  ;;  %v3167_v63 = vmul.f32 %v3102_v40, %v3080_v30  ;;  %v10748_v27 = vpop.f32.mrf.mxu1 }
 0x543   : > { %v3056_v33 = vrot.slane %v10748_v27, 7  ;;  %v10751_v29 = vpop.f32.mrf.mxu0  ;;  %v3348_v59 = vmax.f32 %v3332_v24, 0.0 }
 0x544   : > { %v3333_v16 = vadd.f32 %v10743_v48, %v3310_v57  ;;  %v3183_v47 = vadd.f32 %v3167_v63, %v2892_v8  ;;  %v2898_v35 = vpop.f32.mrf.mxu1 }
 0x545   : > { %v3079_v11 = vsel %vm1606_vm1, %v3055_v55, %v3056_v33  ;;  %v3005_v41 = vpop.f32.mrf.mxu0  ;;  %v10758_v17 = vrot.slane %v3348_v59, 1 }
 0x546   : > { %v3349_v52 = vmax.f32 %v3333_v16, 0.0  ;;  %v3168_v32 = vmul.f32 %v3107_v43, %v3079_v11  ;;  %v3200_v37 = vrot.slane %v3005_v41, 1  ;;  %v2900_v2 = vpop.f32.mrf.mxu1 }
 0x547   : > { %v10756_v40 = vpop.f32.mrf.mxu0  ;;  %12257 = vst [vmem:[#allocation35_spill] sm:$0xff] %v10758_v17 }
 0x548   : > { %v3365_v20 = vrot.slane %v3349_v52, 1  ;;  %v3184_v56 = vadd.f32 %v3168_v32, %v2898_v35  ;;  %v3223_v18 = vsel %vm1895_vm2, %v3199_v36, %v3200_v37  ;;  %v10762_v49 = vpop.f32.mrf.mxu1 }
 0x549   : > { %v3295_v51 = vmul.f32 %v3242_v58, %v3223_v18  ;;  %v10764_v8 = vpop.f32.mrf.mxu0 }
 0x54a   : > { %v12064_v55 = vrot.slane %v10764_v8, 1  ;;  %v10767_v24 = vpop.f32.mrf.mxu1  ;;  %v3392_v43 = vsel %vm1895_vm2, %v10758_v17, %v3365_v20 }
 0x54b   : > { %v3311_v30 = vadd.f32 %v3295_v51, %v3183_v47  ;;  %v10772_v57 = vmax.f32 %v3348_v59, %v3392_v43  ;;  %v3058_v19 = vrot.slane %v10767_v24, 7 }
 0x54c   : > { %v3222_v36 = vsel %vm1895_vm2, %v3200_v37, %v12064_v55  ;;  %v10778_v63 = vpop.f32.mrf.mxu1 }
 0x54d   : > { %12258 = vst [vmem:[#allocation40_spill] sm:$0xff] %v10772_v57  ;;  %12259 = vst [vmem:[#allocation46_spill] sm:$0xff] %v10778_v63  ;;  %v3296_v58 = vmul.f32 %v10713_v61, %v3222_v36  ;;  %v3334_v27 = vadd.f32 %v10743_v48, %v3311_v30 }
 0x54e   : > { %v2910_v16 = vpop.f32.mrf.mxu1 }
 0x54f   : > { %v3312_v35 = vadd.f32 %v3296_v58, %v3184_v56  ;;  %v3350_v11 = vmax.f32 %v3334_v27, 0.0 }
 0x550   : > { %v10782_v41 = vpop.f32.mrf.mxu1 }
 0x551   : > { %12260 = vst [vmem:[#allocation65_spill] sm:$0xff] %v10782_v41  ;;  %v10785_v47 = vadd.f32 %v10743_v48, %v3312_v35  ;;  %v3366_v59 = vrot.slane %v3350_v11, 1 }
 0x552   : > { %v2916_v32 = vpop.f32.mrf.mxu1 }
 0x553   : > { %12261 = vst [vmem:[#allocation63_spill] sm:$0xff] %v10785_v47  ;;  %v12065_v18 = vmax.f32 %v10785_v47, 0.0  ;;  %v3391_v37 = vsel %vm1895_vm2, %v3365_v20, %v3366_v59  ;;  %v7668_v43 = vpop.f32.mrf.mxu0 }
 0x554   : > { %v10790_v51 = vpop.f32.mrf.mxu1  ;;  %v3397_v61 = vmax.f32 %v3349_v52, %v3391_v37  ;;  %v12071_v52 = vrot.slane %v10725_v22, 1  ;;  %v3057_v37 = vrot.slane %v2900_v2, 7 }
 0x555   : > { %v10794_v56 = vrot.slane %v12065_v18, 1  ;;  %v10801_v27 = vpop.f32.mrf.mxu0  ;;  %v3203_v18 = vrot.slane %v10756_v40, 1 }
 0x556   : > { %v2920_v30 = vpop.f32.mrf.mxu1  ;;  %v3078_v40 = vsel %vm1606_vm1, %v3056_v33, %v3057_v37 }
 0x557   : > { %12262 = vst [vmem:[#allocation62_spill] sm:$0xff] %v10794_v56  ;;  %v3390_v36 = vsel %vm1895_vm2, %v3366_v59, %v10794_v56  ;;  %v7669_v15 = vpop.f32.mrf.mxu0  ;;  %v12264_v59 = vrot.slane %v10732_v44, 1  ;;  %v3061_v24 = vrot.slane %v2920_v30, 7  ;;  %v10829_v63 = vmul.f32 %v10719_v9, %v3078_v40 }
 0x558   : > { %v10799_v58 = vpop.f32.mrf.mxu1  ;;  %v3398_v35 = vmax.f32 %v3350_v11, %v3390_v36  ;;  %v3202_v36 = vrot.slane %v10751_v29, 1 }
 0x559   : > { %v3226_v11 = vsel %vm1895_vm2, %v12071_v52, %v12264_v59  ;;  %v3024_v47 = vpop.f32.mrf.mxu0  ;;  %v3077_v59 = vsel %vm1606_vm1, %v3057_v37, %v3058_v19  ;;  %v3059_v52 = vrot.slane %v2910_v16, 7 }
 0x55a   : > { %v2926_v62 = vpop.f32.mrf.mxu1  ;;  %v10805_v55 = vpack.c.bf16 %v3398_v35, %v3397_v61  ;;  %v3060_v61 = vrot.slane %v2916_v32, 7  ;;  %v3220_v2 = vsel %vm1895_vm2, %v3202_v36, %v3203_v18  ;;  %v10824_v44 = vmul.f32 %v10673_v23, %v3226_v11 }
 0x55b   : > { %v3206_v32 = vrot.slane %v7668_v43, 1  ;;  %v3062_v56 = vrot.slane %v2926_v62, 7  ;;  %v10832_v33 = vmul.f32 %v10693_v60, %v3220_v2  ;;  %v3205_v62 = vrot.slane %v3024_v47, 1 }
 0x55c   : > { %v10803_v20 = vpop.f32.mrf.mxu1  ;;  %12263 = vst [vmem:[#allocation36_spill] sm:$0xff] %v10805_v55  ;;  %v3207_v55 = vrot.slane %v7669_v15, 1  ;;  %v3075_v23 = vsel %vm1606_vm1, %v3059_v52, %v3060_v61  ;;  %v3204_v15 = vrot.slane %v10801_v27, 1  ;;  %v12266_v60 = vrot.slane %v10764_v8, 1 }
 0x55d   : > { %12265 = vst [vmem:[#allocation38_spill] sm:$0xff] %v10832_v33  ;;  %v10850_v27 = vmul.f32 %v10715_v7, %v3077_v59  ;;  %v3076_v11 = vsel %vm1606_vm1, %v3058_v19, %v3059_v52  ;;  %v3172_v47 = vmul.f32 %v10691_v13, %v3075_v23  ;;  %v3217_v13 = vsel %vm1895_vm2, %v3205_v62, %v3206_v32 }
 0x55e   : > { %v2930_v0 = vpop.f32.mrf.mxu1  ;;  %v3216_v16 = vsel %vm1895_vm2, %v3206_v32, %v3207_v55  ;;  %v10847_v37 = vsel %vm1895_vm2, %v12266_v60, %v3202_v36  ;;  %v3219_v36 = vsel %vm1895_vm2, %v3203_v18, %v3204_v15 }
 0x55f   : > { %v3063_v57 = vrot.slane %v2930_v0, 7  ;;  %v3074_v0 = vsel %vm1606_vm1, %v3060_v61, %v3061_v24  ;;  %v3073_v61 = vsel %vm1606_vm1, %v3061_v24, %v3062_v56  ;;  %v3302_v59 = vmul.f32 %v10689_v42, %v3216_v16 }
 0x560   : > { %v10817_v35 = vpop.f32.mrf.mxu1  ;;  %v3173_v7 = vmul.f32 %v10711_v3, %v3074_v0  ;;  %v3174_v18 = vmul.f32 %v10709_v39, %v3073_v61 }
 0x561   : > { %v3072_v19 = vsel %vm1606_vm1, %v3062_v56, %v3063_v57 }
 0x562   : > { %v2936_v29 = vpop.f32.mrf.mxu1  ;;  %v3175_v56 = vmul.f32 %v10683_v21, %v3072_v19 }
 0x563   : > { %v3064_v17 = vrot.slane %v2936_v29, 7  ;;  %v7672_v41 = vpop.f32.mrf.mxu0 }
 0x564   : > { %v2938_v30 = vpop.f32.mrf.mxu1  ;;  %v3210_v3 = vrot.slane %v7672_v41, 1  ;;  %v3191_v61 = vadd.f32 %v3175_v56, %v10817_v35 }
 0x565   : > { %v3071_v9 = vsel %vm1606_vm1, %v3063_v57, %v3064_v17  ;;  %v3037_v43 = vpop.f32.mrf.mxu0  ;;  %v3218_v57 = vsel %vm1895_vm2, %v3204_v15, %v3205_v62  ;;  %v3190_v62 = vadd.f32 %v3174_v18, %v10803_v20  ;;  %v12268_v20 = vrot.slane %v10721_v54, 7 }
 0x566   : > { %v3208_v2 = vrot.slane %v3037_v43, 1  ;;  %v2940_v40 = vpop.f32.mrf.mxu1  ;;  %v3176_v29 = vmul.f32 %v10677_v25, %v3071_v9  ;;  %v3299_v54 = vmul.f32 %v10707_v53, %v3219_v36  ;;  %v3185_v53 = vadd.f32 %v10829_v63, %v10762_v49 }
 0x567   : > { %v3065_v8 = vrot.slane %v2940_v40, 7  ;;  %v7673_v33 = vpop.f32.mrf.mxu0 }
 0x568   : > { %v2942_v52 = vpop.f32.mrf.mxu1  ;;  %v3215_v24 = vsel %vm1895_vm2, %v3207_v55, %v3208_v2  ;;  %v3211_v25 = vrot.slane %v7673_v33, 1  ;;  %v3192_v32 = vadd.f32 %v3176_v29, %v2938_v30  ;;  %v3300_v30 = vmul.f32 %v10695_v1, %v3218_v57 }
 0x569   : > { %v3070_v23 = vsel %vm1606_vm1, %v3064_v17, %v3065_v8  ;;  %v3040_v9 = vpop.f32.mrf.mxu0  ;;  %v3303_v55 = vmul.f32 %v10687_v10, %v3215_v24  ;;  %v3189_v10 = vadd.f32 %v3173_v7, %v10799_v58 }
 0x56a   : > { %v3177_v42 = vmul.f32 %v10705_v38, %v3070_v23  ;;  %v3209_v16 = vrot.slane %v3040_v9, 1  ;;  %v2946_v0 = vpop.f32.mrf.mxu1  ;;  %v3212_v38 = vsel %vm1895_vm2, %v3210_v3, %v3211_v25  ;;  %v3188_v23 = vadd.f32 %v3172_v47, %v10790_v51 }
 0x56b   : > { %v3066_v43 = vrot.slane %v2946_v0, 7  ;;  %v3306_v1 = vmul.f32 %v10685_v45, %v3212_v38  ;;  %v3319_v7 = vadd.f32 %v3303_v55, %v3191_v61  ;;  %v3171_v45 = vmul.f32 %v10703_v28, %v3076_v11 }
 0x56c   : > { %v3193_v33 = vadd.f32 %v3177_v42, %v2942_v52  ;;  %v3213_v17 = vsel %vm1895_vm2, %v3209_v16, %v3210_v3  ;;  %v3214_v39 = vsel %vm1895_vm2, %v3208_v2, %v3209_v16  ;;  %v2948_v41 = vpop.f32.mrf.mxu1  ;;  %v3318_v9 = vadd.f32 %v3302_v59, %v3190_v62 }
 0x56d   : > { %v3304_v60 = vmul.f32 %v10679_v12, %v3214_v39  ;;  %v3305_v15 = vmul.f32 %v10681_v6, %v3213_v17  ;;  %v3069_v21 = vsel %vm1606_vm1, %v3065_v8, %v3066_v43  ;;  %v3301_v12 = vmul.f32 %v10699_v14, %v3217_v13 }
 0x56e   : > { %v3178_v40 = vmul.f32 %v10671_v34, %v3069_v21  ;;  %v2950_v2 = vpop.f32.mrf.mxu1  ;;  %v12267_v6 = vrot.slane %v10725_v22, 1  ;;  %v3342_v56 = vadd.f32 %v10743_v48, %v3319_v7  ;;  %v3297_v47 = vmul.f32 %v10717_v31, %v10847_v37 }
 0x56f   : > { %v3320_v29 = vadd.f32 %v3304_v60, %v3192_v32  ;;  %v3321_v19 = vadd.f32 %v3305_v15, %v3193_v33  ;;  %v3067_v52 = vrot.slane %v2950_v2, 7  ;;  %v3317_v57 = vadd.f32 %v3301_v12, %v3189_v10  ;;  %v12271_v60 = vld [vmem:[#allocation38_spill] sm:$0xff] }
 0x570   : > { %v3227_v8 = vsel %vm1895_vm2, %v3211_v25, %v12267_v6  ;;  %v3194_v58 = vadd.f32 %v3178_v40, %v2948_v41  ;;  %v2952_v18 = vpop.f32.mrf.mxu1  ;;  %v3358_v39 = vmax.f32 %v3342_v56, 0.0  ;;  %v12272_v6 = vld [vmem:[#allocation35_spill] sm:$0xff] }
 0x571   : > { %v3083_v34 = vsel %vm1606_vm1, %v3067_v52, %v12268_v20  ;;  %v3068_v35 = vsel %vm1606_vm1, %v3066_v43, %v3067_v52  ;;  %v3343_v24 = vadd.f32 %v10743_v48, %v3320_v29  ;;  %v3344_v25 = vadd.f32 %v10743_v48, %v3321_v19 }
 0x572   : > { %v3322_v14 = vadd.f32 %v3306_v1, %v3194_v58  ;;  %v3164_v22 = vmul.f32 %v10697_v26, %v3083_v34  ;;  %v3179_v13 = vmul.f32 %v10701_v5, %v3068_v35  ;;  %v3307_v0 = vmul.f32 %v10675_v46, %v3227_v8  ;;  %v12270_v46 = vld [vmem:[#allocation65_spill] sm:$0xff] }
 0x573   : > { %v3316_v26 = vadd.f32 %v3300_v30, %v3188_v23  ;;  %v3359_v5 = vmax.f32 %v3343_v24, 0.0  ;;  %v3360_v11 = vmax.f32 %v3344_v25, 0.0  ;;  %v3187_v59 = vadd.f32 %v3171_v45, %v12270_v46  ;;  %v12273_v25 = vld [vmem:[#allocation40_spill] sm:$0xff] }
 0x574   : > { %v3345_v3 = vadd.f32 %v10743_v48, %v3322_v14  ;;  %v3180_v42 = vadd.f32 %v3164_v22, %v10723_v50  ;;  %v3195_v16 = vadd.f32 %v3179_v13, %v2952_v18  ;;  %v12269_v50 = vld [vmem:[#allocation46_spill] sm:$0xff]  ;;  %v3341_v43 = vadd.f32 %v10743_v48, %v3318_v9 }
 0x575   : > { %v3186_v36 = vadd.f32 %v10850_v27, %v12269_v50  ;;  %v3315_v17 = vadd.f32 %v3299_v54, %v3187_v59  ;;  %v3339_v41 = vadd.f32 %v10743_v48, %v3316_v26  ;;  %v3340_v49 = vadd.f32 %v10743_v48, %v3317_v57 }
 0x576   : > { %v3361_v32 = vmax.f32 %v3345_v3, 0.0  ;;  %v3308_v28 = vadd.f32 %v10824_v44, %v3180_v42  ;;  %v3323_v51 = vadd.f32 %v3307_v0, %v3195_v16  ;;  %v3375_v37 = vrot.slane %v3359_v5, 1 }
 0x577   : > { %v3376_v38 = vrot.slane %v3360_v11, 1  ;;  %v3313_v27 = vadd.f32 %v3297_v47, %v3185_v53  ;;  %v3314_v15 = vadd.f32 %v12271_v60, %v3186_v36  ;;  %v3357_v21 = vmax.f32 %v3341_v43, 0.0  ;;  %v12274_v43 = vld [vmem:[#allocation62_spill] sm:$0xff]  ;;  %v8121_v60 = vld [vmem:[%s12014_s22 + $0x38] sm:$0xff]  }
 0x578   : > { %v3377_v55 = vrot.slane %v3361_v32, 1  ;;  %v3331_v33 = vadd.f32 %v10743_v48, %v3308_v28  ;;  %v3346_v44 = vadd.f32 %v10743_v48, %v3323_v51  ;;  %v3374_v40 = vrot.slane %v3358_v39, 1  ;;  %7698 = vmatprep.subr.bf16.mxu1 %v8121_v60 }
 0x579   : > { %v3355_v2 = vmax.f32 %v3339_v41, 0.0  ;;  %v3356_v61 = vmax.f32 %v3340_v49, 0.0  ;;  %v3338_v29 = vadd.f32 %v10743_v48, %v3315_v17  ;;  %v3381_v12 = vsel %vm1895_vm2, %v3375_v37, %v3376_v38  ;;  %v12275_v17 = vld [vmem:[#allocation63_spill] sm:$0xff]  ;;  %7699 = vmatpush3.bf16.msra.mxu1 %v8121_v60  ;;  %v3677_v60 = vld [vmem:[%s12007_s15 + $0x20] sm:$0xff] }
 0x57a   : > { %v3347_v63 = vmax.f32 %v3331_v33, 0.0  ;;  %v3362_v31 = vmax.f32 %v3346_v44, 0.0  ;;  %v3380_v62 = vsel %vm1895_vm2, %v3376_v38, %v3377_v55  ;;  %v3337_v34 = vadd.f32 %v10743_v48, %v3314_v15  ;;  %v8120_v38 = vld [vmem:[#allocation18 + $0x18] sm:$0xff]  }
 0x57b   : > { %v3408_v7 = vmax.f32 %v3360_v11, %v3380_v62  ;;  %v3373_v35 = vrot.slane %v3357_v21, 1  ;;  %v3382_v24 = vsel %vm1895_vm2, %v3374_v40, %v3375_v37  ;;  %v3407_v22 = vmax.f32 %v3359_v5, %v3381_v12  ;;  %v8119_v37 = vld [vmem:[#allocation18 + $0x10] sm:$0xff]  }
 0x57c   : > { %v3378_v10 = vrot.slane %v3362_v31, 1  ;;  %v3363_v30 = vrot.slane %v3347_v63, 1  ;;  %v3336_v13 = vadd.f32 %v10743_v48, %v3313_v27  ;;  %v3371_v54 = vrot.slane %v3355_v2, 1  ;;  %v8122_v15 = vld [vmem:[%s12014_s22 + $0x30] sm:$0xff]  }
 0x57d   : > { %v3383_v23 = vsel %vm1895_vm2, %v3373_v35, %v3374_v40  ;;  %v3372_v9 = vrot.slane %v3356_v61, 1  ;;  %v3354_v18 = vmax.f32 %v3338_v29, 0.0  ;;  %v3425_v3 = vpack.c.bf16 %v3408_v7, %v3407_v22  ;;  %7700 = vmatprep.subr.bf16.mxu1 %v8122_v15  ;;  %v8126_v62 = vld [vmem:[%s12014_s22 + $0x10] sm:$0xff]   ;;  %v8127_v40 = vld [vmem:[%s12014_s22 + $0x8] sm:$0xff]  }
 0x57e   : > { %v3379_v19 = vsel %vm1895_vm2, %v3377_v55, %v3378_v10  ;;  %v3394_v52 = vsel %vm1895_vm2, %v3378_v10, %v3363_v30  ;;  %v3393_v8 = vsel %vm1895_vm2, %v3363_v30, %v12272_v6  ;;  %v3406_v42 = vmax.f32 %v3358_v39, %v3382_v24  ;;  %7701 = vmatpush3.bf16.msra.mxu1 %v8122_v15  ;;  %v8124_v10 = vld [vmem:[%s12014_s22 + $0x20] sm:$0xff]   ;;  %v8125_v30 = vld [vmem:[%s12014_s22 + $0x18] sm:$0xff]   ;;  %v8135_v22 = vld [vmem:[#allocation9 + $0x34] ss:$12 sps:$4 sm:$0xff]  }
 0x57f   : > { %v3409_v58 = vmax.f32 %v3361_v32, %v3379_v19  ;;  %v3410_v1 = vmax.f32 %v3362_v31, %v3394_v52  ;;  %v3395_v20 = vmax.f32 %v3347_v63, %v3393_v8  ;;  %v3353_v16 = vmax.f32 %v3337_v34, 0.0  ;;  %v12277_v63 = vld [vmem:[#allocation36_spill] sm:$0xff]  ;;  %v8118_v31 = vld [vmem:[#allocation18 + $0x8] sm:$0xff]   ;;  %v8131_v24 = vld [vmem:[#allocation9 + $0x4c] ss:$12 sps:$4 sm:$0xff]  }
 0x580   : > { %v3384_v0 = vsel %vm1895_vm2, %v3372_v9, %v3373_v35  ;;  %v3405_v26 = vmax.f32 %v3357_v21, %v3383_v23  ;;  %v3385_v48 = vsel %vm1895_vm2, %v3371_v54, %v3372_v9  ;;  %v3370_v57 = vrot.slane %v3354_v18, 1  ;;  %v8123_v21 = vld [vmem:[%s12014_s22 + $0x28] sm:$0xff]   ;;  %v3679_v15 = vld [vmem:[%s12007_s15 + $0x30] sm:$0xff] }
 0x581   : > { %v3426_v14 = vpack.c.bf16 %v3410_v1, %v3409_v58  ;;  %v3419_v45 = vpack.c.bf16 %v12273_v25, %v3395_v20  ;;  %v3352_v5 = vmax.f32 %v3336_v13, 0.0  ;;  %v3404_v32 = vmax.f32 %v3356_v61, %v3384_v0  ;;  %7702 = vmatprep.subr.bf16.mxu1 %v8123_v21  ;;  %v8129_v35 = vld [vmem:[#allocation9 + $0x48] ss:$12 sps:$4 sm:$0xff]   ;;  %v3673_v13 = vld [vmem:[%s12007_s15] sm:$0xff] }
 0x582   : > { %v3424_v56 = vpack.c.bf16 %v3406_v42, %v3405_v26  ;;  %v3369_v28 = vrot.slane %v3353_v16, 1  ;;  %v3386_v51 = vsel %vm1895_vm2, %v3370_v57, %v3371_v54  ;;  %v3403_v11 = vmax.f32 %v3355_v2, %v3385_v48  ;;  %7703 = vmatpush3.bf16.msra.mxu1 %v8123_v21  ;;  %v8128_v2 = vld [vmem:[%s12014_s22] sm:$0xff]   ;;  %v3680_v21 = vld [vmem:[%s12007_s15 + $0x38] sm:$0xff] }
 0x583   : > { %7674 = vmatprep.subr.bf16.mxu0 %v3426_v14  ;;  %v3368_v47 = vrot.slane %v3352_v5, 1  ;;  %v3402_v36 = vmax.f32 %v3354_v18, %v3386_v51  ;;  %v12276_v39 = vmax.f32 %v12275_v17, 0.0  ;;  %v12278_v27 = vmov 0   ;;  %7704 = vmatprep.subr.bf16.mxu1 %v8124_v10  ;;  %v8133_v25 = vld [vmem:[#allocation9 + $0x30] ss:$12 sps:$4 sm:$0xff]  }
 0x584   : > { %7675 = vmatpush3.bf16.msra.mxu0 %v3426_v14  ;;  %v3387_v53 = vsel %vm1895_vm2, %v3369_v28, %v3370_v57  ;;  %v3423_v50 = vpack.c.bf16 %v3404_v32, %v3403_v11  ;;  %v8132_v14 = vld [vmem:[#allocation9 + $0x50] ss:$12 sps:$4 sm:$0xff]   ;;  %v8136_v32 = vld [vmem:[#allocation9 + $0x38] ss:$12 sps:$4 sm:$0xff]   ;;  %v8140_v17 = vld [vmem:[#allocation9 + $0x20] ss:$12 sps:$4 sm:$0xff]  }
 0x585   : > { %7676 = vmatprep.subr.bf16.mxu0 %v3425_v3  ;;  %v3388_v46 = vsel %vm1895_vm2, %v3368_v47, %v3369_v28  ;;  %v3401_v59 = vmax.f32 %v3353_v16, %v3387_v53  ;;  %v3389_v55 = vsel %vm1895_vm2, %v12274_v43, %v3368_v47 }
 0x586   : > { %v3400_v44 = vmax.f32 %v3352_v5, %v3388_v46  ;;  %v3399_v41 = vmax.f32 %v12276_v39, %v3389_v55  ;;  %7705 = vmatpush3.bf16.msra.mxu1 %v8124_v10  ;;  %v8141_v39 = vld [vmem:[#allocation9] ss:$12 sps:$4 sm:$0xff]  }
 0x587   : > { %v3422_v33 = vpack.c.bf16 %v3402_v36, %v3401_v59  ;;  %7706 = vmatprep.subr.bf16.mxu1 %v8125_v30 }
 0x588   : > { %7677 = vmatpush3.bf16.msra.mxu0 %v3425_v3  ;;  %v3421_v49 = vpack.c.bf16 %v3400_v44, %v3399_v41  ;;  %v8139_v44 = vld [vmem:[#allocation9 + $0x1c] ss:$12 sps:$4 sm:$0xff]   ;;  %v8143_v41 = vld [vmem:[#allocation9 + $0x4] ss:$12 sps:$4 sm:$0xff]  }
 0x589   : > { %7678 = vmatprep.subr.bf16.mxu0 %v3424_v56 }
 0x58a   : > { %7707 = vmatpush3.bf16.msra.mxu1 %v8125_v30 }
 0x58b   : > { %7708 = vmatprep.subr.bf16.mxu1 %v8126_v62 }
 0x58c   : > { %7679 = vmatpush3.bf16.msra.mxu0 %v3424_v56 }
 0x58d   : > { %7680 = vmatprep.subr.bf16.mxu0 %v3423_v50 }
 0x58e   : > { %7709 = vmatpush3.bf16.msra.mxu1 %v8126_v62 }
 0x58f   : > { %7710 = vmatprep.subr.bf16.mxu1 %v8127_v40 }
 0x590   : > { %7681 = vmatpush3.bf16.msra.mxu0 %v3423_v50 }
 0x591   : > { %7682 = vmatprep.subr.bf16.mxu0 %v3422_v33 }
 0x592   : > { %7711 = vmatpush3.bf16.msra.mxu1 %v8127_v40 }
 0x593   : > { %7712 = vmatprep.subr.bf16.mxu1 %v8128_v2 }
 0x594   : > { %7683 = vmatpush3.bf16.msra.mxu0 %v3422_v33  ;;  %v8137_v33 = vld [vmem:[#allocation9 + $0x18] ss:$12 sps:$4 sm:$0xff]  }
 0x595   : > { %7684 = vmatprep.subr.bf16.mxu0 %v3421_v49 }
 0x596   : > { %7713 = vmatpush3.bf16.msra.mxu1 %v8128_v2 }
 0x597   : > { %7722 = vmatprep.subr.bf16.mxu1 %v8132_v14 }
 0x598   : > { %7685 = vmatpush3.bf16.msra.mxu0 %v3421_v49  ;;  %v8144_v49 = vld [vmem:[#allocation9 + $0x8] ss:$12 sps:$4 sm:$0xff]  }
 0x599   : > { %7686 = vmatprep.subr.bf16.mxu0 %v12277_v63 }
 0x59c   : > { %7687 = vmatpush3.bf16.msra.mxu0 %v12277_v63  ;;  %v3674_v63 = vld [vmem:[%s12007_s15 + $0x8] sm:$0xff] }
 0x59d   : > { %7688 = vmatprep.subr.bf16.mxu0 %v3419_v45 }
 0x5a0   : > { %7689 = vmatpush3.bf16.msra.mxu0 %v3419_v45  ;;  %v12279_v45 = vmov 1  }
 0x5a1   : > { %3785 = vmatprep.subr.bf16.mxu0 %v8131_v24  ;;  %v8155_v24 = vld [vmem:[%s12280_s5 + $0x7c] ss:$12 sps:$4 sm:$0xff]  }
 0x5a3   : > { %7691 = vmatmul.mubr.bf16.vlgmr.msra.gmra.mxu0 %v8118_v31  ;;  %v3675_v31 = vld [vmem:[%s12007_s15 + $0x10] sm:$0xff] }
 0x5a4   : > { %7694 = vmatprep.mubr.bf16.mxu0 %v8119_v37  ;;  %3786 = vmatpush1.bf16.msra.mxu0 %v8129_v35  ;;  %v3676_v37 = vld [vmem:[%s12007_s15 + $0x18] sm:$0xff] }
 0x5a5   : > { %3787 = vmatprep.subr.bf16.mxu0 %v8135_v22  ;;  %v8152_v35 = vld [vmem:[%s12280_s5 + $0x98] ss:$12 sps:$4 sm:$0xff]  }
 0x5a6   : > { %v8153_v22 = vld [vmem:[%s12280_s5 + $0x78] ss:$12 sps:$4 sm:$0xff]  }
 0x5a8   : > { %3788 = vmatpush1.bf16.msra.mxu0 %v8133_v25  ;;  %v8160_v25 = vld [vmem:[%s12280_s5 + $0x68] ss:$12 sps:$4 sm:$0xff]  }
 0x5a9   : > { %3789 = vmatprep.subr.bf16.mxu0 %v8139_v44 }
 0x5ab   : > { %7695 = vmatmul.mubr.bf16.gmra.mxu0 %v8120_v38  ;;  %v3678_v38 = vld [vmem:[%s12007_s15 + $0x28] sm:$0xff] }
 0x5ac   : > { %3809 = vmatprep.mubr.bf16.mxu0 %v12278_v27  ;;  %3790 = vmatpush1.bf16.msra.mxu0 %v8137_v33 }
 0x5ad   : > { %3791 = vmatprep.subr.bf16.mxu0 %v8143_v41 }
 0x5b0   : > { %3792 = vmatpush1.bf16.msra.mxu0 %v8141_v39 }
 0x663   : > { %v7692_v61 = vpop.f32.mrf.mxu0 }
 0x665   : > { %v3485_v29 = vpop.f32.mrf.mxu0 }
 0x667   : > { %v7693_v19 = vpop.f32.mrf.mxu0 }
 0x668   : > { %v8029_v52 = vpack.i.bf16 %v7693_v19, %v7692_v61 }
 0x669   : > { %v3488_v12 = vpop.f32.mrf.mxu0 }
 0x66a   : > { %v8024_v6 = vpack.i.bf16 %v3488_v12, %v3485_v29  ;;  %8030 = vrot.lane.b32.xlu0 %v8029_v52, %s8961_s28 }
 0x66b   : > { %v7696_v8 = vpop.f32.mrf.mxu0 }
 0x66c   : > { %8025 = vrot.lane.b32.xlu1 %v8024_v6, %s8961_s28 }
 0x66d   : > { %v3501_v58 = vpop.f32.mrf.mxu0 }
 0x66f   : > { %v7697_v1 = vpop.f32.mrf.mxu0 }
 0x670   : > { %v8039_v7 = vpack.i.bf16 %v7697_v1, %v7696_v8 }
 0x671   : > { %v3504_v20 = vpop.f32.mrf.mxu0 }
 0x672   : > { %v8034_v34 = vpack.i.bf16 %v3504_v20, %v3501_v58  ;;  %8040 = vrot.lane.b32.xlu0 %v8039_v7, %s8961_s28  ;;  %v8148_v7 = vld [vmem:[%s12280_s5 + $0xb0] ss:$12 sps:$4 sm:$0xff]  }
 0x674   : > { %8035 = vrot.lane.b32.xlu1 %v8034_v34, %s8961_s28  ;;  %v8151_v34 = vld [vmem:[%s12280_s5 + $0x94] ss:$12 sps:$4 sm:$0xff]   ;;  %s12281_s28 = sld [smem:[#allocation89_spill]] }
 0x676   : > { %3938 = vperm.xlu0 %8044, %v3674_v63  }
 0x678   : > { %3933 = vperm.xlu1 %8023, %v3673_v13  }
 0x67a   : > { %3943 = vperm.xlu0 %8044, %v3675_v31  }
 0x67c   : > { %8045 = vset.pattern.permute.xlu1 %v12279_v45 }
 0x67d   : > { %4004 = vperm.xlu1 %8045, %v3673_v13   ;;  %v8159_v13 = vld [vmem:[%s12280_s5 + $0x64] ss:$12 sps:$4 sm:$0xff]  }
 0x67e   : > { %8047 = vset.pattern.permute.xlu0 %v12279_v45 }
 0x67f   : > { %4012 = vperm.xlu0 %8047, %v3675_v31  }
 0x681   : > { %4008 = vperm.xlu1 %8045, %v3674_v63  }
 0x683   : > { %8050 = vset.pattern.permute.xlu0 %v12278_v27 }
 0x684   : > { %3958 = vperm.xlu0 %8050, %v3678_v38  }
 0x685   : > { %8046 = vset.pattern.permute.xlu1 %v12278_v27 }
 0x686   : > { %3948 = vperm.xlu1 %8046, %v3676_v37  }
 0x688   : > { %3963 = vperm.xlu0 %8050, %v3679_v15  }
 0x68a   : > { %8048 = vset.pattern.permute.xlu1 %v12279_v45 }
 0x68b   : > { %4016 = vperm.xlu1 %8048, %v3676_v37  }
 0x68c   : > { %8053 = vset.pattern.permute.xlu0 %v12279_v45 }
 0x68d   : > { %4028 = vperm.xlu0 %8053, %v3679_v15  }
 0x68f   : > { %8049 = vset.pattern.permute.xlu1 %v12278_v27 }
 0x690   : > { %3953 = vperm.xlu1 %8049, %v3677_v60  }
 0x691   : > { %8056 = vset.pattern.permute.xlu0 %v12278_v27 }
 0x694   : > { %8051 = vset.pattern.permute.xlu1 %v12279_v45 }
 0x695   : > { %4020 = vperm.xlu1 %8051, %v3677_v60  }
 0x699   : > { %4024 = vperm.xlu1 %8051, %v3678_v38  }
 0x69d   : > { %8052 = vset.pattern.permute.xlu1 %v12278_v27 }
 0x69e   : > { %3968 = vperm.xlu1 %8052, %v3680_v21  }
 0x6a2   : > { %8054 = vset.pattern.permute.xlu1 %v12279_v45 }
 0x6a3   : > { %4032 = vperm.xlu1 %8054, %v3680_v21  }
 0x6a7   : > { %8055 = vset.pattern.permute.xlu1 %v12278_v27 }
 0x6dc   : > { %v8031_v23 = vpop.permute.xlu0 %8030 }
 0x6dd   : > { %v8033_v54 = vunpack.i.h.bf16 %v8031_v23  ;;  %v8032_v9 = vunpack.i.l.bf16 %v8031_v23  ;;  %v8157_v23 = vld [vmem:[%s12280_s5 + $0x60] ss:$12 sps:$4 sm:$0xff]  }
 0x6de   : > { %v8026_v18 = vpop.permute.xlu1 %8025 }
 0x6df   : > { %v8028_v3 = vunpack.i.h.bf16 %v8026_v18  ;;  %v8027_v42 = vunpack.i.l.bf16 %v8026_v18  ;;  %v3535_v16 = vmax.f32 %v7693_v19, %v8033_v54  ;;  %v3534_v0 = vmax.f32 %v7692_v61, %v8032_v9  ;;  %v8161_v54 = vld [vmem:[%s12280_s5 + $0x48] ss:$12 sps:$4 sm:$0xff]   ;;  %v8163_v9 = vld [vmem:[%s12280_s5 + $0x4c] ss:$12 sps:$4 sm:$0xff]   ;;  %v8164_v18 = vld [vmem:[%s12280_s5 + $0x50] ss:$12 sps:$4 sm:$0xff]  }
 0x6e1   : > { %v3533_v26 = vmax.f32 %v3488_v12, %v8028_v3  ;;  %v3532_v48 = vmax.f32 %v3485_v29, %v8027_v42  ;;  %v3541_v5 = vpack.c.bf16 %v3535_v16, %v3534_v0  ;;  %v8167_v3 = vld [vmem:[%s12280_s5 + $0x34] ss:$12 sps:$4 sm:$0xff]   ;;  %v8168_v42 = vld [vmem:[%s12280_s5 + $0x38] ss:$12 sps:$4 sm:$0xff]   ;;  %v8165_v16 = vld [vmem:[%s12280_s5 + $0x30] ss:$12 sps:$4 sm:$0xff]  }
 0x6e2   : > { %v8171_v0 = vld [vmem:[%s12280_s5 + $0x1c] ss:$12 sps:$4 sm:$0xff]  }
 0x6e3   : > { %v3540_v57 = vpack.c.bf16 %v3533_v26, %v3532_v48  ;;  %v8172_v26 = vld [vmem:[%s12280_s5 + $0x20] ss:$12 sps:$4 sm:$0xff]   ;;  %v8169_v48 = vld [vmem:[%s12280_s5 + $0x18] ss:$12 sps:$4 sm:$0xff]  }
 0x6e4   : > { %v8041_v56 = vpop.permute.xlu0 %8040 }
 0x6e5   : > { %v8043_v28 = vunpack.i.h.bf16 %v8041_v56  ;;  %v8042_v51 = vunpack.i.l.bf16 %v8041_v56  ;;  %7714 = vmatprep.mubr.bf16.mxu1 %v3540_v57  ;;  %v8175_v57 = vld [vmem:[%s12280_s5 + $0x4] ss:$12 sps:$4 sm:$0xff]   ;;  %v8173_v56 = vld [vmem:[%s12280_s5] ss:$12 sps:$4 sm:$0xff]  }
 0x6e6   : > { %7715 = vmatmul.mubr.bf16.vlgmr.msra.gmra.mxu1 %v3541_v5  ;;  %v8036_v11 = vpop.permute.xlu1 %8035  ;;  %v8176_v5 = vld [vmem:[%s12280_s5 + $0x8] ss:$12 sps:$4 sm:$0xff]  }
 0x6e7   : > { %v8038_v53 = vunpack.i.h.bf16 %v8036_v11  ;;  %v8037_v47 = vunpack.i.l.bf16 %v8036_v11  ;;  %7723 = vmatpush3.bf16.msra.mxu1 %v8132_v14  ;;  %v3539_v50 = vmax.f32 %v7697_v1, %v8043_v28  ;;  %v3538_v36 = vmax.f32 %v7696_v8, %v8042_v51  ;;  %v8147_v1 = vld [vmem:[%s12280_s5 + $0xac] ss:$12 sps:$4 sm:$0xff]  }
 0x6e8   : > { %7724 = vmatprep.subr.bf16.mxu1 %v8136_v32  ;;  %4238 = vmatprep.subr.bf16.mxu0 %v8147_v1  ;;  %v8156_v14 = vld [vmem:[%s12280_s5 + $0x80] ss:$12 sps:$4 sm:$0xff]  }
 0x6e9   : > { %v3537_v46 = vmax.f32 %v3504_v20, %v8038_v53  ;;  %v3536_v59 = vmax.f32 %v3501_v58, %v8037_v47  ;;  %v3543_v55 = vpack.c.bf16 %v3539_v50, %v3538_v36  ;;  %v8145_v58 = vld [vmem:[%s12280_s5 + $0xa8] ss:$12 sps:$4 sm:$0xff]   ;;  %v8149_v20 = vld [vmem:[%s12280_s5 + $0x90] ss:$12 sps:$4 sm:$0xff]  }
 0x6eb   : > { %v3542_v43 = vpack.c.bf16 %v3537_v46, %v3536_v59  ;;  %7725 = vmatpush3.bf16.msra.mxu1 %v8136_v32 }
 0x6ec   : > { %7726 = vmatprep.subr.bf16.mxu1 %v8140_v17 }
 0x6ed   : > { %7718 = vmatprep.mubr.bf16.mxu1 %v3542_v43 }
 0x6ee   : > { %7719 = vmatmul.mubr.bf16.gmra.mxu1 %v3543_v55 }
 0x6ef   : > { %7727 = vmatpush3.bf16.msra.mxu1 %v8140_v17 }
 0x6f0   : > { %7728 = vmatprep.subr.bf16.mxu1 %v8144_v49 }
 0x6f1   : > { %v11125_v43 = vpop.permute.xlu0 %3938 }
 0x6f3   : > { %7729 = vmatpush3.bf16.msra.mxu1 %v8144_v49  ;;  %v11109_v32 = vpop.permute.xlu1 %3933 }
 0x6f4   : > { %7738 = vmatprep.subr.bf16.mxu1 %v8148_v7 }
 0x6f5   : > { %v11131_v63 = vpop.permute.xlu0 %3943 }
 0x6f8   : > { %v11111_v28 = vpop.permute.xlu1 %4004 }
 0x6fc   : > { %v11113_v51 = vpop.permute.xlu1 %4008 }
 0x701   : > { %v11115_v11 = vpop.permute.xlu1 %3948 }
 0x706   : > { %v11121_v36 = vpop.permute.xlu1 %4016 }
 0x70b   : > { %v11127_v39 = vpop.permute.xlu1 %3953 }
 0x710   : > { %v11133_v60 = vpop.permute.xlu1 %4020 }
 0x7a6   : > { %v7716_v10 = vpop.f32.mrf.mxu1 }
 0x7a8   : > { %v3642_v30 = vpop.f32.mrf.mxu1 }
 0x7aa   : > { %v7717_v62 = vpop.f32.mrf.mxu1 }
 0x7ab   : > { %v3682_v61 = vpack.c.bf16 %v7717_v62, %v7716_v10 }
 0x7ac   : > { %v3645_v40 = vpop.f32.mrf.mxu1 }
 0x7ad   : > { %v3681_v2 = vpack.c.bf16 %v3645_v40, %v3642_v30  ;;  %v11138_v40 = vpop.permute.xlu0 %4012 }
 0x7ae   : > { %v7720_v29 = vpop.f32.mrf.mxu1 }
 0x7af   : > { %7154 = vmatmul.mubr.msk.bf16.vlgmr.msra.gmra.mxu0 %vm2817_vm3, %v3681_v2  ;;  %7730 = vmatprep.mubr.msk.bf16.mxu1 %vm2817_vm3, %v3681_v2 }
 0x7b0   : > { %v3658_v19 = vpop.f32.mrf.mxu1  ;;  %7731 = vmatmul.mubr.msk.bf16.vlgmr.msra.gmra.mxu1 %vm2817_vm3, %v3682_v61  ;;  %3819 = vmatprep.mubr.bf16.mxu0 %v12278_v27 }
 0x7b1   : > { %4239 = vmatpush1.bf16.msra.mxu0 %v8145_v58  ;;  %7739 = vmatpush3.bf16.msra.mxu1 %v8148_v7 }
 0x7b2   : > { %v7721_v52 = vpop.f32.mrf.mxu1  ;;  %4240 = vmatprep.subr.bf16.mxu0 %v8151_v34  ;;  %7740 = vmatprep.subr.bf16.mxu1 %v8152_v35  ;;  %v11145_v34 = vpop.permute.xlu1 %4024 }
 0x7b3   : > { %v3684_v8 = vpack.c.bf16 %v7721_v52, %v7720_v29 }
 0x7b4   : > { %v3661_v12 = vpop.f32.mrf.mxu1 }
 0x7b5   : > { %v3683_v6 = vpack.c.bf16 %v3661_v12, %v3658_v19  ;;  %4241 = vmatpush1.bf16.msra.mxu0 %v8149_v20  ;;  %7741 = vmatpush3.bf16.msra.mxu1 %v8152_v35 }
 0x7b6   : > { %4242 = vmatprep.subr.bf16.mxu0 %v8155_v24  ;;  %7742 = vmatprep.subr.bf16.mxu1 %v8156_v14 }
 0x7b7   : > { %7155 = vmatmul.mubr.msk.bf16.gmra.mxu0 %vm2817_vm3, %v3682_v61  ;;  %7734 = vmatprep.mubr.msk.bf16.mxu1 %vm2817_vm3, %v3683_v6 }
 0x7b8   : > { %7735 = vmatmul.mubr.msk.bf16.gmra.mxu1 %vm2817_vm3, %v3684_v8  ;;  %3829 = vmatprep.mubr.bf16.mxu0 %v12278_v27 }
 0x7b9   : > { %4243 = vmatpush1.bf16.msra.mxu0 %v8153_v22  ;;  %7743 = vmatpush3.bf16.msra.mxu1 %v8156_v14  ;;  %v11149_v22 = vpop.permute.xlu0 %3958 }
 0x7ba   : > { %4244 = vmatprep.subr.bf16.mxu0 %v8159_v13  ;;  %7744 = vmatprep.subr.bf16.mxu1 %v8160_v25 }
 0x7bd   : > { %4245 = vmatpush1.bf16.msra.mxu0 %v8157_v23  ;;  %7745 = vmatpush3.bf16.msra.mxu1 %v8160_v25 }
 0x7be   : > { %4246 = vmatprep.subr.bf16.mxu0 %v8163_v9  ;;  %7746 = vmatprep.subr.bf16.mxu1 %v8164_v18 }
 0x7bf   : > { %7156 = vmatmul.mubr.msk.bf16.gmra.mxu0 %vm2817_vm3, %v3683_v6 }
 0x7c0   : > { %3839 = vmatprep.mubr.bf16.mxu0 %v12278_v27 }
 0x7c1   : > { %4247 = vmatpush1.bf16.msra.mxu0 %v8161_v54  ;;  %7747 = vmatpush3.bf16.msra.mxu1 %v8164_v18 }
 0x7c2   : > { %4248 = vmatprep.subr.bf16.mxu0 %v8167_v3  ;;  %7748 = vmatprep.subr.bf16.mxu1 %v8168_v42 }
 0x7c5   : > { %4249 = vmatpush1.bf16.msra.mxu0 %v8165_v16  ;;  %7749 = vmatpush3.bf16.msra.mxu1 %v8168_v42 }
 0x7c6   : > { %4250 = vmatprep.subr.bf16.mxu0 %v8171_v0  ;;  %7750 = vmatprep.subr.bf16.mxu1 %v8172_v26 }
 0x7c7   : > { %7157 = vmatmul.mubr.msk.bf16.gmra.mxu0 %vm2817_vm3, %v3684_v8 }
 0x7c8   : > { %4270 = vmatprep.mubr.bf16.mxu0 %v12278_v27 }
 0x7c9   : > { %4251 = vmatpush1.bf16.msra.mxu0 %v8169_v48  ;;  %7751 = vmatpush3.bf16.msra.mxu1 %v8172_v26 }
 0x7ca   : > { %4252 = vmatprep.subr.bf16.mxu0 %v8175_v57  ;;  %7752 = vmatprep.subr.bf16.mxu1 %v8176_v5 }
 0x7cd   : > { %4253 = vmatpush1.bf16.msra.mxu0 %v8173_v56  ;;  %7753 = vmatpush3.bf16.msra.mxu1 %v8176_v5 }
 0x86f   : > { %v11117_v53 = vpop.f32.mrf.mxu0 }
 0x870   : > { %v7732_v47 = vpop.f32.mrf.mxu1  ;;  %v3915_v62 = vrot.slane %v11117_v53, 7 }
 0x871   : > { %v11119_v50 = vpop.f32.mrf.mxu0  ;;  %v3989_v7 = vrot.slane %v7732_v47, 1 }
 0x872   : > { %v11123_v46 = vpop.f32.mrf.mxu1 }
 0x873   : > { %v3815_v59 = vpop.f32.mrf.mxu0  ;;  %v3987_v26 = vrot.slane %v11123_v46, 1  ;;  %v11173_v46 = vpop.permute.xlu1 %3968 }
 0x874   : > { %v7733_v55 = vpop.f32.mrf.mxu1  ;;  %v3916_v15 = vrot.slane %v3815_v59, 7 }
 0x875   : > { %v3817_v33 = vpop.f32.mrf.mxu0  ;;  %v3990_v58 = vrot.slane %v7733_v55, 1 }
 0x876   : > { %v3887_v44 = vpop.f32.mrf.mxu1  ;;  %v3929_v29 = vsel %vm1606_vm1, %v3915_v62, %v3916_v15 }
 0x877   : > { %v3821_v17 = vpop.f32.mrf.mxu0  ;;  %v3988_v52 = vrot.slane %v3887_v44, 1  ;;  %v3972_v20 = vmul.f32 %v11125_v43, %v3929_v29  ;;  %v3999_v42 = vsel %vm1895_vm2, %v3989_v7, %v3990_v58 }
 0x878   : > { %v11129_v41 = vpop.f32.mrf.mxu1  ;;  %v3917_v2 = vrot.slane %v3821_v17, 7  ;;  %v4037_v17 = vmul.f32 %v11138_v40, %v3999_v42 }
 0x879   : > { %v3823_v49 = vpop.f32.mrf.mxu0  ;;  %v4000_v9 = vsel %vm1895_vm2, %v3988_v52, %v3989_v7  ;;  %v3993_v16 = vrot.slane %v11129_v41, 1  ;;  %v3980_v53 = vadd.f32 %v3972_v20, %v3817_v33  ;;  %v4001_v44 = vsel %vm1895_vm2, %v3987_v26, %v3988_v52 }
 0x87a   : > { %v3900_v31 = vpop.f32.mrf.mxu1  ;;  %v3928_v35 = vsel %vm1606_vm1, %v3916_v15, %v3917_v2  ;;  %v4036_v47 = vmul.f32 %v11113_v51, %v4000_v9 }
 0x87b   : > { %v3825_v37 = vpop.f32.mrf.mxu0  ;;  %v3991_v24 = vrot.slane %v3900_v31, 1  ;;  %v3973_v0 = vmul.f32 %v11131_v63, %v3928_v35 }
 0x87c   : > { %v3918_v21 = vrot.slane %v3825_v37, 7  ;;  %v11135_v10 = vpop.f32.mrf.mxu1  ;;  %v4044_v52 = vadd.f32 %v4036_v47, %v3980_v53 }
 0x87d   : > { %v3827_v38 = vpop.f32.mrf.mxu0  ;;  %v3998_v48 = vsel %vm1895_vm2, %v3990_v58, %v3991_v24  ;;  %v3981_v37 = vadd.f32 %v3973_v0, %v3823_v49 }
 0x87e   : > { %v3927_v12 = vsel %vm1606_vm1, %v3917_v2, %v3918_v21  ;;  %v3903_v6 = vpop.f32.mrf.mxu1  ;;  %v4038_v15 = vmul.f32 %v11121_v36, %v3998_v48 }
 0x87f   : > { %v3831_v30 = vpop.f32.mrf.mxu0  ;;  %v3974_v13 = vmul.f32 %v11115_v11, %v3927_v12  ;;  %v3992_v25 = vrot.slane %v3903_v6, 1  ;;  %v4045_v20 = vadd.f32 %v4037_v17, %v3981_v37 }
 0x880   : > { %v3919_v19 = vrot.slane %v3831_v30, 7  ;;  %v3994_v30 = vrot.slane %v11135_v10, 1 }
 0x881   : > { %v3833_v61 = vpop.f32.mrf.mxu0  ;;  %v3982_v59 = vadd.f32 %v3974_v13, %v3827_v38  ;;  %v3996_v55 = vsel %vm1895_vm2, %v3992_v25, %v3993_v16  ;;  %v3997_v33 = vsel %vm1895_vm2, %v3991_v24, %v3992_v25  ;;  %v11178_v38 = vpop.permute.xlu0 %3963 }
 0x882   : > { %v3926_v23 = vsel %vm1606_vm1, %v3918_v21, %v3919_v19  ;;  %v4040_v29 = vmul.f32 %v11145_v34, %v3996_v55  ;;  %v11193_v24 = vpop.permute.xlu1 %4032 }
 0x883   : > { %v3835_v8 = vpop.f32.mrf.mxu0  ;;  %v3975_v57 = vmul.f32 %v11127_v39, %v3926_v23  ;;  %v4046_v12 = vadd.f32 %v4038_v15, %v3982_v59 }
 0x884   : > { %v3920_v1 = vrot.slane %v3835_v8, 7  ;;  %v4039_v8 = vmul.f32 %v11133_v60, %v3997_v33 }
 0x885   : > { %v3837_v14 = vpop.f32.mrf.mxu0  ;;  %v3983_v2 = vadd.f32 %v3975_v57, %v3833_v61  ;;  %v7162_v61 = vld [vmem:[#allocation10] ss:$0 sm:$0xff] }
 0x886   : > { %v3925_v54 = vsel %vm1606_vm1, %v3919_v19, %v3920_v1  ;;  %v4061_v23 = vadd.f32 %v7162_v61, %v4046_v12  ;;  %v4059_v9 = vadd.f32 %v7162_v61, %v4044_v52  ;;  %v4060_v48 = vadd.f32 %v7162_v61, %v4045_v20  ;;  %v8179_v52 = vld [vmem:[#allocation13 + $0x150] ss:$24 sps:$4 sm:$0xff]   ;;  %v8181_v12 = vld [vmem:[#allocation13 + $0x154] ss:$24 sps:$4 sm:$0xff]  }
 0x887   : > { %v3976_v18 = vmul.f32 %v11149_v22, %v3925_v54  ;;  %v3841_v3 = vpop.f32.mrf.mxu0  ;;  %4854 = vmatprep.subr.bf16.mxu0 %v8181_v12  ;;  %v8203_v20 = vld [vmem:[#allocation13 + $0x90] ss:$24 sps:$4 sm:$0xff]  }
 0x888   : > { %v3921_v5 = vrot.slane %v3841_v3, 7  ;;  %v3995_v3 = vsel %vm1895_vm2, %v3993_v16, %v3994_v30  ;;  %v4069_v47 = vmax.f32 %v4061_v23, 0.0  ;;  %v4067_v55 = vmax.f32 %v4059_v9, 0.0 }
 0x889   : > { %v3843_v56 = vpop.f32.mrf.mxu0  ;;  %v3984_v41 = vadd.f32 %v3976_v18, %v3837_v14  ;;  %v4047_v14 = vadd.f32 %v4039_v8, %v3983_v2  ;;  %v11198_v18 = vpop.permute.xlu0 %4028  ;;  %v8193_v8 = vld [vmem:[#allocation13 + $0xf4] ss:$24 sps:$4 sm:$0xff]  }
 0x88a   : > { %v3924_v19 = vsel %vm1606_vm1, %v3920_v1, %v3921_v5  ;;  %v4035_v1 = vmul.f32 %v11111_v28, %v4001_v44 }
 0x88b   : > { %v3845_v31 = vpop.f32.mrf.mxu0  ;;  %v4048_v58 = vadd.f32 %v4040_v29, %v3984_v41  ;;  %v3977_v35 = vmul.f32 %v11178_v38, %v3924_v19  ;;  %v4062_v53 = vadd.f32 %v7162_v61, %v4047_v14  ;;  %v4068_v41 = vmax.f32 %v4060_v48, 0.0  ;;  %v8177_v19 = vld [vmem:[#allocation19] sm:$0xff]  }
 0x88c   : > { %v3922_v21 = vrot.slane %v3845_v31, 7 }
 0x88d   : > { %v3847_v25 = vpop.f32.mrf.mxu0  ;;  %v4063_v42 = vadd.f32 %v7162_v61, %v4048_v58  ;;  %v4070_v37 = vmax.f32 %v4062_v53, 0.0  ;;  %v4075_v16 = vpack.c.bf16 %v4069_v47, %v4068_v41  ;;  %v8191_v58 = vld [vmem:[#allocation13 + $0xf0] ss:$24 sps:$4 sm:$0xff]  }
 0x88e   : > { %v3930_v49 = vsel %vm1606_vm1, %v3922_v21, %v3915_v62  ;;  %v3923_v6 = vsel %vm1606_vm1, %v3921_v5, %v3922_v21  ;;  %v4002_v62 = vsel %vm1895_vm2, %v3994_v30, %v3987_v26  ;;  %v3985_v5 = vadd.f32 %v3977_v35, %v3843_v56  ;;  %v8211_v35 = vld [vmem:[#allocation13 + $0x64] ss:$24 sps:$4 sm:$0xff]  }
 0x88f   : > { %v3971_v7 = vmul.f32 %v11109_v32, %v3930_v49  ;;  %v3978_v10 = vmul.f32 %v11173_v46, %v3923_v6  ;;  %v4042_v57 = vmul.f32 %v11193_v24, %v4002_v62  ;;  %v4071_v44 = vmax.f32 %v4063_v42, 0.0  ;;  %v8187_v49 = vld [vmem:[#allocation13 + $0x124] ss:$24 sps:$4 sm:$0xff]   ;;  %v8185_v6 = vld [vmem:[#allocation13 + $0x120] ss:$24 sps:$4 sm:$0xff]  }
 0x891   : > { %v3979_v13 = vadd.f32 %v3971_v7, %v11119_v50  ;;  %v3986_v54 = vadd.f32 %v3978_v10, %v3847_v25  ;;  %v4041_v50 = vmul.f32 %v11198_v18, %v3995_v3  ;;  %v4076_v21 = vpack.c.bf16 %v4071_v44, %v4070_v37  ;;  %v8199_v7 = vld [vmem:[#allocation13 + $0xc4] ss:$24 sps:$4 sm:$0xff]   ;;  %v8197_v10 = vld [vmem:[#allocation13 + $0xc0] ss:$24 sps:$4 sm:$0xff]  }
 0x893   : > { %v4043_v0 = vadd.f32 %v4035_v1, %v3979_v13  ;;  %v4050_v59 = vadd.f32 %v4042_v57, %v3986_v54  ;;  %v4049_v31 = vadd.f32 %v4041_v50, %v3985_v5  ;;  %v8209_v1 = vld [vmem:[#allocation13 + $0x60] ss:$24 sps:$4 sm:$0xff]  }
 0x895   : > { %v4058_v26 = vadd.f32 %v7162_v61, %v4043_v0  ;;  %v4065_v33 = vadd.f32 %v7162_v61, %v4050_v59  ;;  %v4064_v30 = vadd.f32 %v7162_v61, %v4049_v31  ;;  %v8205_v61 = vld [vmem:[#allocation13 + $0x94] ss:$24 sps:$4 sm:$0xff]  }
 0x897   : > { %v4066_v17 = vmax.f32 %v4058_v26, 0.0  ;;  %v4073_v56 = vmax.f32 %v4065_v33, 0.0  ;;  %v4072_v2 = vmax.f32 %v4064_v30, 0.0 }
 0x899   : > { %v4074_v15 = vpack.c.bf16 %v4067_v55, %v4066_v17  ;;  %v4077_v29 = vpack.c.bf16 %v4073_v56, %v4072_v2 }
 0x89b   : > { %4271 = vmatmul.mubr.bf16.vlgmr.msra.gmra.mxu0 %v4074_v15  ;;  %7754 = vmatprep.mubr.bf16.mxu1 %v4074_v15 }
 0x89c   : > { %7755 = vmatmul.mubr.bf16.vlgmr.msra.gmra.mxu1 %v4075_v16  ;;  %4280 = vmatprep.mubr.bf16.mxu0 %v12278_v27 }
 0x89d   : > { %7758 = vmatprep.mubr.bf16.mxu1 %v4076_v21  ;;  %4855 = vmatpush1.bf16.msra.mxu0 %v8179_v52 }
 0x89e   : > { %4856 = vmatprep.subr.bf16.mxu0 %v8187_v49 }
 0x8a1   : > { %4857 = vmatpush1.bf16.msra.mxu0 %v8185_v6 }
 0x8a2   : > { %4858 = vmatprep.subr.bf16.mxu0 %v8193_v8 }
 0x8a3   : > { %4281 = vmatmul.mubr.bf16.gmra.mxu0 %v4075_v16 }
 0x8a4   : > { %7759 = vmatmul.mubr.bf16.gmra.mxu1 %v4077_v29  ;;  %4290 = vmatprep.mubr.bf16.mxu0 %v12278_v27 }
 0x8a5   : > { %7770 = vmatprep.mubr.msk.bf16.mxu1 %vm2817_vm3, %v8177_v19  ;;  %4859 = vmatpush1.bf16.msra.mxu0 %v8191_v58 }
 0x8a6   : > { %4860 = vmatprep.subr.bf16.mxu0 %v8199_v7 }
 0x8a9   : > { %4861 = vmatpush1.bf16.msra.mxu0 %v8197_v10 }
 0x8aa   : > { %4862 = vmatprep.subr.bf16.mxu0 %v8205_v61 }
 0x8ab   : > { %4291 = vmatmul.mubr.bf16.gmra.mxu0 %v4076_v21 }
 0x8ac   : > { %4300 = vmatprep.mubr.bf16.mxu0 %v12278_v27 }
 0x8ad   : > { %4863 = vmatpush1.bf16.msra.mxu0 %v8203_v20 }
 0x8ae   : > { %4864 = vmatprep.subr.bf16.mxu0 %v8211_v35 }
 0x8b1   : > { %4865 = vmatpush1.bf16.msra.mxu0 %v8209_v1 }
 0x8b3   : > { %4301 = vmatmul.mubr.bf16.gmra.mxu0 %v4077_v29 }
 0x8b4   : > { %4886 = vmatprep.mubr.bf16.mxu0 %v12278_v27 }
 0x95b   : > { %v11209_v62 = vpop.f32.mrf.mxu0 }
 0x95c   : > { %v7756_v14 = vpop.f32.mrf.mxu1  ;;  %v4376_v44 = vrot.slane %v11209_v62, 7 }
 0x95d   : > { %v11211_v13 = vpop.f32.mrf.mxu0  ;;  %v4410_v15 = vrot.slane %v7756_v14, 1 }
 0x95e   : > { %v11213_v25 = vpop.f32.mrf.mxu1 }
 0x95f   : > { %v4276_v23 = vpop.f32.mrf.mxu0  ;;  %v4408_v20 = vrot.slane %v11213_v25, 1 }
 0x960   : > { %v7757_v54 = vpop.f32.mrf.mxu1  ;;  %v4377_v47 = vrot.slane %v4276_v23, 7 }
 0x961   : > { %v4278_v9 = vpop.f32.mrf.mxu0  ;;  %v4411_v17 = vrot.slane %v7757_v54, 1 }
 0x962   : > { %v4348_v3 = vpop.f32.mrf.mxu1  ;;  %v4390_v16 = vsel %vm1606_vm1, %v4376_v44, %v4377_v47 }
 0x963   : > { %v4282_v42 = vpop.f32.mrf.mxu0  ;;  %v4420_v2 = vsel %vm1895_vm2, %v4410_v15, %v4411_v17  ;;  %v4393_v52 = vmul.f32 %v4390_v16, %v11125_v43  ;;  %v4409_v35 = vrot.slane %v4348_v3, 1 }
 0x964   : > { %v7760_v0 = vpop.f32.mrf.mxu1  ;;  %v4378_v31 = vrot.slane %v4282_v42, 7 }
 0x965   : > { %v4284_v48 = vpop.f32.mrf.mxu0  ;;  %v4414_v29 = vrot.slane %v7760_v0, 1  ;;  %v4401_v3 = vadd.f32 %v4393_v52, %v4278_v9 }
 0x966   : > { %v4361_v57 = vpop.f32.mrf.mxu1  ;;  %v4389_v12 = vsel %vm1606_vm1, %v4377_v47, %v4378_v31 }
 0x967   : > { %v4286_v5 = vpop.f32.mrf.mxu0  ;;  %v4412_v49 = vrot.slane %v4361_v57, 1  ;;  %v4394_v62 = vmul.f32 %v4389_v12, %v11131_v63 }
 0x968   : > { %v7761_v53 = vpop.f32.mrf.mxu1  ;;  %v4379_v50 = vrot.slane %v4286_v5, 7 }
 0x969   : > { %v4288_v26 = vpop.f32.mrf.mxu0  ;;  %v4415_v58 = vrot.slane %v7761_v53, 1  ;;  %v4419_v23 = vsel %vm1895_vm2, %v4411_v17, %v4412_v49  ;;  %v4402_v9 = vadd.f32 %v4394_v62, %v4284_v48 }
 0x96a   : > { %v4364_v59 = vpop.f32.mrf.mxu1  ;;  %v4388_v30 = vsel %vm1606_vm1, %v4378_v31, %v4379_v50 }
 0x96b   : > { %v4292_v55 = vpop.f32.mrf.mxu0  ;;  %v4413_v33 = vrot.slane %v4364_v59, 1  ;;  %v4395_v7 = vmul.f32 %v4388_v30, %v11115_v11  ;;  %v4427_v59 = vmul.f32 %v4419_v23, %v11121_v36 }
 0x96c   : > { %v4380_v41 = vrot.slane %v4292_v55, 7 }
 0x96d   : > { %v4294_v37 = vpop.f32.mrf.mxu0  ;;  %v4417_v10 = vsel %vm1895_vm2, %v4413_v33, %v4414_v29  ;;  %v4418_v14 = vsel %vm1895_vm2, %v4412_v49, %v4413_v33  ;;  %v4403_v57 = vadd.f32 %v4395_v7, %v4288_v26  ;;  %v4423_v26 = vsel %vm1895_vm2, %v4415_v58, %v4408_v20 }
 0x96e   : > { %v4387_v21 = vsel %vm1606_vm1, %v4379_v50, %v4380_v41  ;;  %v4429_v0 = vmul.f32 %v4417_v10, %v11145_v34  ;;  %v4428_v5 = vmul.f32 %v4418_v14, %v11133_v60  ;;  %v4422_v34 = vsel %vm1895_vm2, %v4408_v20, %v4409_v35 }
 0x96f   : > { %v4296_v56 = vpop.f32.mrf.mxu0  ;;  %v4396_v6 = vmul.f32 %v4387_v21, %v11127_v39  ;;  %v4426_v39 = vmul.f32 %v4420_v2, %v11138_v40  ;;  %v4421_v40 = vsel %vm1895_vm2, %v4409_v35, %v4410_v15  ;;  %v4435_v15 = vadd.f32 %v4427_v59, %v4403_v57 }
 0x970   : > { %v4381_v19 = vrot.slane %v4296_v56, 7  ;;  %v4425_v60 = vmul.f32 %v4421_v40, %v11113_v51  ;;  %v4424_v30 = vmul.f32 %v4422_v34, %v11111_v28  ;;  %v4431_v51 = vmul.f32 %v4423_v26, %v11193_v24 }
 0x971   : > { %v4298_v8 = vpop.f32.mrf.mxu0  ;;  %v4404_v54 = vadd.f32 %v4396_v6, %v4294_v37  ;;  %v7187_v37 = vld [vmem:[#allocation12] ss:$0 sm:$0xff]  ;;  %v4434_v56 = vadd.f32 %v4426_v39, %v4402_v9 }
 0x972   : > { %v4386_v61 = vsel %vm1606_vm1, %v4380_v41, %v4381_v19  ;;  %v4433_v52 = vadd.f32 %v4425_v60, %v4401_v3  ;;  %v4450_v12 = vadd.f32 %v7187_v37, %v4435_v15  ;;  %v8184_v60 = vld [vmem:[#allocation13 + $0x15c] ss:$24 sps:$4 sm:$0xff]   ;;  %v8182_v15 = vld [vmem:[#allocation13 + $0x158] ss:$24 sps:$4 sm:$0xff]  }
 0x973   : > { %v4397_v43 = vmul.f32 %v4386_v61, %v11149_v22  ;;  %v4302_v1 = vpop.f32.mrf.mxu0  ;;  %v4416_v22 = vsel %vm1895_vm2, %v4414_v29, %v4415_v58  ;;  %v4436_v17 = vadd.f32 %v4428_v5, %v4404_v54 }
 0x974   : > { %v4382_v11 = vrot.slane %v4302_v1, 7  ;;  %v4430_v31 = vmul.f32 %v4416_v22, %v11198_v18  ;;  %v4448_v61 = vadd.f32 %v7187_v37, %v4433_v52  ;;  %v4458_v20 = vmax.f32 %v4450_v12, 0.0  ;;  %v8221_v52 = vld [vmem:[#allocation13] ss:$24 sps:$4 sm:$0xff]   ;;  %v8223_v12 = vld [vmem:[#allocation13 + $0x4] ss:$24 sps:$4 sm:$0xff]  }
 0x975   : > { %v4405_v42 = vadd.f32 %v4397_v43, %v4298_v8  ;;  %v4304_v25 = vpop.f32.mrf.mxu0  ;;  %v4451_v2 = vadd.f32 %v7187_v37, %v4436_v17 }
 0x976   : > { %v4385_v63 = vsel %vm1606_vm1, %v4381_v19, %v4382_v11  ;;  %v4466_v23 = vrot.slane %v4458_v20, 1 }
 0x977   : > { %v4437_v53 = vadd.f32 %v4429_v0, %v4405_v42  ;;  %v4398_v47 = vmul.f32 %v4385_v63, %v11178_v38  ;;  %v4306_v50 = vpop.f32.mrf.mxu0  ;;  %v4459_v7 = vmax.f32 %v4451_v2, 0.0  ;;  %v8215_v2 = vld [vmem:[#allocation13 + $0x30] ss:$24 sps:$4 sm:$0xff]  }
 0x978   : > { %v4383_v55 = vrot.slane %v4306_v50, 7 }
 0x979   : > { %v4406_v41 = vadd.f32 %v4398_v47, %v4304_v25  ;;  %v4452_v16 = vadd.f32 %v7187_v37, %v4437_v53  ;;  %v4308_v18 = vpop.f32.mrf.mxu0  ;;  %v4467_v62 = vrot.slane %v4459_v7, 1 }
 0x97a   : > { %v4391_v38 = vsel %vm1606_vm1, %v4383_v55, %v4376_v44  ;;  %v4384_v48 = vsel %vm1606_vm1, %v4382_v11, %v4383_v55  ;;  %v4456_v11 = vmax.f32 %v4448_v61, 0.0 }
 0x97b   : > { %v4438_v36 = vadd.f32 %v4430_v31, %v4406_v41  ;;  %v4392_v33 = vmul.f32 %v4391_v38, %v11109_v32  ;;  %v4399_v21 = vmul.f32 %v4384_v48, %v11173_v46  ;;  %v4460_v49 = vmax.f32 %v4452_v16, 0.0  ;;  %v8190_v38 = vld [vmem:[#allocation13 + $0x12c] ss:$24 sps:$4 sm:$0xff]   ;;  %v8188_v48 = vld [vmem:[#allocation13 + $0x128] ss:$24 sps:$4 sm:$0xff]  }
 0x97c   : > { %v4449_v32 = vadd.f32 %v7187_v37, %v4434_v56  ;;  %v4474_v63 = vsel %vm1895_vm2, %v4466_v23, %v4467_v62  ;;  %v4464_v47 = vrot.slane %v4456_v11, 1  ;;  %v8196_v16 = vld [vmem:[#allocation13 + $0xfc] ss:$24 sps:$4 sm:$0xff]   ;;  %v8206_v56 = vld [vmem:[#allocation13 + $0x98] ss:$24 sps:$4 sm:$0xff]  }
 0x97d   : > { %v4453_v29 = vadd.f32 %v7187_v37, %v4438_v36  ;;  %v4400_v19 = vadd.f32 %v4392_v33, %v11211_v13  ;;  %v4407_v44 = vadd.f32 %v4399_v21, %v4308_v18  ;;  %v4468_v35 = vrot.slane %v4460_v49, 1  ;;  %v8194_v36 = vld [vmem:[#allocation13 + $0xf8] ss:$24 sps:$4 sm:$0xff]   ;;  %v8202_v33 = vld [vmem:[#allocation13 + $0xcc] ss:$24 sps:$4 sm:$0xff]  }
 0x97e   : > { %v4457_v1 = vmax.f32 %v4449_v32, 0.0  ;;  %v4482_v34 = vmax.f32 %v4458_v20, %v4474_v63  ;;  %v8200_v21 = vld [vmem:[#allocation13 + $0xc8] ss:$24 sps:$4 sm:$0xff]   ;;  %v8214_v18 = vld [vmem:[#allocation13 + $0x6c] ss:$24 sps:$4 sm:$0xff]   ;;  %v4561_v32 = vld [vmem:[%s12008_s16 + $0x8] sm:$0xff] }
 0x97f   : > { %v4461_v6 = vmax.f32 %v4453_v29, 0.0  ;;  %v4432_v8 = vadd.f32 %v4424_v30, %v4400_v19  ;;  %v4439_v58 = vadd.f32 %v4431_v51, %v4407_v44  ;;  %v4473_v0 = vsel %vm1895_vm2, %v4467_v62, %v4468_v35  ;;  %v8208_v30 = vld [vmem:[#allocation13 + $0x9c] ss:$24 sps:$4 sm:$0xff]   ;;  %v8212_v51 = vld [vmem:[#allocation13 + $0x68] ss:$24 sps:$4 sm:$0xff]   ;;  %5036 = vperm.xlu0 %8056, %v4561_v32  }
 0x980   : > { %v4465_v57 = vrot.slane %v4457_v1, 1  ;;  %v4483_v5 = vmax.f32 %v4459_v7, %v4473_v0  ;;  %v8217_v29 = vld [vmem:[#allocation13 + $0x34] ss:$24 sps:$4 sm:$0xff]   ;;  %v8218_v19 = vld [vmem:[#allocation13 + $0x38] ss:$24 sps:$4 sm:$0xff]  }
 0x981   : > { %v4469_v46 = vrot.slane %v4461_v6, 1  ;;  %v4447_v10 = vadd.f32 %v7187_v37, %v4432_v8  ;;  %v4454_v28 = vadd.f32 %v7187_v37, %v4439_v58  ;;  %v8178_v37 = vld [vmem:[#allocation19 + $0x8] sm:$0xff]   ;;  %v8220_v44 = vld [vmem:[#allocation13 + $0x3c] ss:$24 sps:$4 sm:$0xff]   ;;  %4866 = vmatprep.subr.bf16.mxu0 %v8217_v29 }
 0x982   : > { %v4475_v53 = vsel %vm1895_vm2, %v4465_v57, %v4466_v23  ;;  %v4476_v55 = vsel %vm1895_vm2, %v4464_v47, %v4465_v57  ;;  %4867 = vmatpush1.bf16.msra.mxu0 %v8215_v2  ;;  %v8229_v8 = vld [vmem:[#allocation13 + $0x164] ss:$24 sps:$4 sm:$0xff]   ;;  %v4560_v58 = vld [vmem:[%s12008_s16] sm:$0xff]  ;;  %v8251_v62 = vld [vmem:[%s12281_s28 + $0x150] ss:$24 sps:$4 sm:$0xff]  }
 0x983   : > { %v4455_v24 = vmax.f32 %v4447_v10, 0.0  ;;  %v4462_v43 = vmax.f32 %v4454_v28, 0.0  ;;  %v4472_v14 = vsel %vm1895_vm2, %v4468_v35, %v4469_v46  ;;  %v4481_v59 = vmax.f32 %v4457_v1, %v4475_v53  ;;  %4868 = vmatprep.subr.bf16.mxu0 %v8223_v12  ;;  %5031 = vperm.xlu1 %8055, %v4560_v58   ;;  %v8253_v7 = vld [vmem:[%s12281_s28 + $0x154] ss:$24 sps:$4 sm:$0xff]   ;;  %v4563_v10 = vld [vmem:[%s12008_s16 + $0x18] sm:$0xff] }
 0x984   : > { %v4484_v22 = vmax.f32 %v4460_v49, %v4472_v14  ;;  %v4480_v41 = vmax.f32 %v4456_v11, %v4476_v55  ;;  %v8224_v49 = vld [vmem:[#allocation13 + $0x8] ss:$24 sps:$4 sm:$0xff]   ;;  %v8232_v1 = vld [vmem:[#allocation13 + $0x134] ss:$24 sps:$4 sm:$0xff]   ;;  %v8263_v0 = vld [vmem:[%s12281_s28 + $0xf0] ss:$24 sps:$4 sm:$0xff]  }
 0x985   : > { %v4470_v13 = vrot.slane %v4462_v43, 1  ;;  %v4463_v39 = vrot.slane %v4455_v24, 1  ;;  %v4492_v26 = vpack.c.bf16 %v4482_v34, %v4481_v59  ;;  %v8257_v14 = vld [vmem:[%s12281_s28 + $0x120] ss:$24 sps:$4 sm:$0xff]   ;;  %v8244_v57 = vld [vmem:[#allocation13 + $0x74] ss:$24 sps:$4 sm:$0xff]  }
 0x986   : > { %v4493_v50 = vpack.c.bf16 %v4484_v22, %v4483_v5  ;;  %4869 = vmatpush1.bf16.msra.mxu0 %v8221_v52  ;;  %v8233_v11 = vld [vmem:[#allocation13 + $0x100] ss:$24 sps:$4 sm:$0xff]   ;;  %v8242_v63 = vld [vmem:[#allocation13 + $0x70] ss:$24 sps:$4 sm:$0xff]   ;;  %v8250_v53 = vld [vmem:[#allocation13 + $0x14] ss:$24 sps:$4 sm:$0xff]  }
 0x987   : > { %v4471_v54 = vsel %vm1895_vm2, %v4469_v46, %v4470_v13  ;;  %v4478_v42 = vsel %vm1895_vm2, %v4470_v13, %v4463_v39  ;;  %v4477_v9 = vsel %vm1895_vm2, %v4463_v39, %v4464_v47  ;;  %4960 = vmatprep.subr.bf16.mxu0 %v8229_v8  ;;  %v4562_v46 = vld [vmem:[%s12008_s16 + $0x10] sm:$0xff]  ;;  %8057 = vset.pattern.permute.xlu1 %v12279_v45  ;;  %v8259_v13 = vld [vmem:[%s12281_s28 + $0x124] ss:$24 sps:$4 sm:$0xff]   ;;  %v8248_v47 = vld [vmem:[#allocation13 + $0x10] ss:$24 sps:$4 sm:$0xff]  }
 0x988   : > { %v4485_v25 = vmax.f32 %v4461_v6, %v4471_v54  ;;  %v4486_v3 = vmax.f32 %v4462_v43, %v4478_v42  ;;  %v4479_v17 = vmax.f32 %v4455_v24, %v4477_v9  ;;  %v8226_v6 = vld [vmem:[#allocation13 + $0xc] ss:$24 sps:$4 sm:$0xff]   ;;  %5041 = vperm.xlu0 %8056, %v4562_v46   ;;  %5082 = vperm.xlu1 %8057, %v4560_v58   ;;  %v8227_v24 = vld [vmem:[#allocation13 + $0x160] ss:$24 sps:$4 sm:$0xff]   ;;  %v8265_v42 = vld [vmem:[%s12281_s28 + $0xf4] ss:$24 sps:$4 sm:$0xff]  }
 0x989   : > { %v8235_v39 = vld [vmem:[#allocation13 + $0x104] ss:$24 sps:$4 sm:$0xff]   ;;  %v8238_v54 = vld [vmem:[#allocation13 + $0xd4] ss:$24 sps:$4 sm:$0xff]   ;;  %v8239_v22 = vld [vmem:[#allocation13 + $0xa0] ss:$24 sps:$4 sm:$0xff]  }
 0x98a   : > { %v4494_v40 = vpack.c.bf16 %v4486_v3, %v4485_v25  ;;  %v4491_v31 = vpack.c.bf16 %v4480_v41, %v4479_v17  ;;  %v8236_v25 = vld [vmem:[#allocation13 + $0xd0] ss:$24 sps:$4 sm:$0xff]   ;;  %v8241_v3 = vld [vmem:[#allocation13 + $0xa4] ss:$24 sps:$4 sm:$0xff]   ;;  %v8245_v5 = vld [vmem:[#allocation13 + $0x40] ss:$24 sps:$4 sm:$0xff]  }
 0x98b   : > { %v8254_v34 = vld [vmem:[%s12281_s28 + $0x158] ss:$24 sps:$4 sm:$0xff]   ;;  %v8262_v9 = vld [vmem:[%s12281_s28 + $0x12c] ss:$24 sps:$4 sm:$0xff]   ;;  %v8260_v59 = vld [vmem:[%s12281_s28 + $0x128] ss:$24 sps:$4 sm:$0xff]  }
 0x98c   : > { %7762 = vmatprep.subr.bf16.mxu1 %v4494_v40  ;;  %8059 = vset.pattern.permute.xlu0 %v12279_v45  ;;  %v8266_v55 = vld [vmem:[%s12281_s28 + $0xf8] ss:$24 sps:$4 sm:$0xff]   ;;  %v8271_v41 = vld [vmem:[%s12281_s28 + $0xc4] ss:$24 sps:$4 sm:$0xff]   ;;  %v8296_v52 = vld [vmem:[%s12281_s28 + $0x8] ss:$24 sps:$4 sm:$0xff]  }
 0x98d   : > { %7763 = vmatpush3.bf16.msra.mxu1 %v4494_v40  ;;  %5086 = vperm.xlu1 %8057, %v4561_v32   ;;  %v8247_v40 = vld [vmem:[#allocation13 + $0x44] ss:$24 sps:$4 sm:$0xff]   ;;  %v8269_v17 = vld [vmem:[%s12281_s28 + $0xc0] ss:$24 sps:$4 sm:$0xff]   ;;  %v8298_v29 = vld [vmem:[%s12281_s28 + $0xc] ss:$24 sps:$4 sm:$0xff]  }
 0x98e   : > { %7764 = vmatprep.subr.bf16.mxu1 %v4493_v50  ;;  %5090 = vperm.xlu0 %8059, %v4562_v46   ;;  %v8295_v2 = vld [vmem:[%s12281_s28 + $0x4] ss:$24 sps:$4 sm:$0xff]   ;;  %v8302_v8 = vld [vmem:[%s12281_s28 + $0x2d8] ss:$24 sps:$4 sm:$0xff]   ;;  %v8313_v46 = vld [vmem:[%s12281_s28 + $0x274] ss:$24 sps:$4 sm:$0xff]  }
 0x98f   : > { %v8304_v12 = vld [vmem:[%s12281_s28 + $0x2dc] ss:$24 sps:$4 sm:$0xff]   ;;  %v8310_v58 = vld [vmem:[%s12281_s28 + $0x2ac] ss:$24 sps:$4 sm:$0xff]   ;;  %v8305_v32 = vld [vmem:[%s12281_s28 + $0x2a0] ss:$24 sps:$4 sm:$0xff]  }
 0x991   : > { %7765 = vmatpush3.bf16.msra.mxu1 %v4493_v50  ;;  %8058 = vset.pattern.permute.xlu1 %v12278_v27  ;;  %v8256_v50 = vld [vmem:[%s12281_s28 + $0x15c] ss:$24 sps:$4 sm:$0xff]  }
 0x992   : > { %7766 = vmatprep.subr.bf16.mxu1 %v4492_v26  ;;  %5046 = vperm.xlu1 %8058, %v4563_v10  }
 0x995   : > { %7767 = vmatpush3.bf16.msra.mxu1 %v4492_v26  ;;  %v8268_v26 = vld [vmem:[%s12281_s28 + $0xfc] ss:$24 sps:$4 sm:$0xff]  }
 0x996   : > { %7768 = vmatprep.subr.bf16.mxu1 %v4491_v31  ;;  %8060 = vset.pattern.permute.xlu1 %v12279_v45  ;;  %v8230_v45 = vld [vmem:[#allocation13 + $0x130] ss:$24 sps:$4 sm:$0xff]  }
 0x997   : > { %5094 = vperm.xlu1 %8060, %v4563_v10   ;;  %v8316_v10 = vld [vmem:[%s12281_s28 + $0x27c] ss:$24 sps:$4 sm:$0xff]  }
 0x999   : > { %7769 = vmatpush3.bf16.msra.mxu1 %v4491_v31  ;;  %v8272_v31 = vld [vmem:[%s12281_s28 + $0xc8] ss:$24 sps:$4 sm:$0xff]  }
 0x99a   : > { %4907 = vmatprep.subr.bf16.mxu1 %v8184_v60  ;;  %v8274_v60 = vld [vmem:[%s12281_s28 + $0xcc] ss:$24 sps:$4 sm:$0xff]  }
 0x99c   : > { %7771 = vmatmul.mubr.msk.bf16.vlgmr.msra.gmra.mxu1 %vm2817_vm3, %v8178_v37  ;;  %v8275_v37 = vld [vmem:[%s12281_s28 + $0x90] ss:$24 sps:$4 sm:$0xff]  }
 0x99d   : > { %4908 = vmatpush1.bf16.msra.mxu1 %v8182_v15  ;;  %4939 = vmatprep.mubr.bf16.mxu1 %v12278_v27  ;;  %v8277_v15 = vld [vmem:[%s12281_s28 + $0x94] ss:$24 sps:$4 sm:$0xff]  }
 0x99e   : > { %4909 = vmatprep.subr.bf16.mxu1 %v8190_v38  ;;  %v8278_v38 = vld [vmem:[%s12281_s28 + $0x98] ss:$24 sps:$4 sm:$0xff]  }
 0x9a1   : > { %4910 = vmatpush1.bf16.msra.mxu1 %v8188_v48  ;;  %v8280_v48 = vld [vmem:[%s12281_s28 + $0x9c] ss:$24 sps:$4 sm:$0xff]  }
 0x9a2   : > { %4911 = vmatprep.subr.bf16.mxu1 %v8196_v16  ;;  %v8281_v16 = vld [vmem:[%s12281_s28 + $0x60] ss:$24 sps:$4 sm:$0xff]  }
 0x9a5   : > { %4912 = vmatpush1.bf16.msra.mxu1 %v8194_v36  ;;  %v8283_v36 = vld [vmem:[%s12281_s28 + $0x64] ss:$24 sps:$4 sm:$0xff]  }
 0x9a6   : > { %4913 = vmatprep.subr.bf16.mxu1 %v8202_v33  ;;  %v8284_v33 = vld [vmem:[%s12281_s28 + $0x68] ss:$24 sps:$4 sm:$0xff]  }
 0x9a9   : > { %4914 = vmatpush1.bf16.msra.mxu1 %v8200_v21  ;;  %v8286_v21 = vld [vmem:[%s12281_s28 + $0x6c] ss:$24 sps:$4 sm:$0xff]  }
 0x9aa   : > { %4915 = vmatprep.subr.bf16.mxu1 %v8208_v30  ;;  %v8287_v30 = vld [vmem:[%s12281_s28 + $0x30] ss:$24 sps:$4 sm:$0xff]  }
 0x9ad   : > { %4916 = vmatpush1.bf16.msra.mxu1 %v8206_v56  ;;  %v8289_v56 = vld [vmem:[%s12281_s28 + $0x34] ss:$24 sps:$4 sm:$0xff]  }
 0x9ae   : > { %4917 = vmatprep.subr.bf16.mxu1 %v8214_v18  ;;  %v8290_v18 = vld [vmem:[%s12281_s28 + $0x38] ss:$24 sps:$4 sm:$0xff]  }
 0x9b1   : > { %4918 = vmatpush1.bf16.msra.mxu1 %v8212_v51  ;;  %v8292_v51 = vld [vmem:[%s12281_s28 + $0x3c] ss:$24 sps:$4 sm:$0xff]  }
 0x9b2   : > { %4919 = vmatprep.subr.bf16.mxu1 %v8220_v44  ;;  %v8301_v44 = vld [vmem:[%s12281_s28 + $0x2d4] ss:$24 sps:$4 sm:$0xff]  }
 0x9b5   : > { %4920 = vmatpush1.bf16.msra.mxu1 %v8218_v19  ;;  %v8293_v19 = vld [vmem:[%s12281_s28] ss:$24 sps:$4 sm:$0xff]  }
 0x9b6   : > { %4921 = vmatprep.subr.bf16.mxu1 %v8226_v6  ;;  %v8307_v6 = vld [vmem:[%s12281_s28 + $0x2a4] ss:$24 sps:$4 sm:$0xff]  }
 0x9b9   : > { %4922 = vmatpush1.bf16.msra.mxu1 %v8224_v49  ;;  %v8299_v49 = vld [vmem:[%s12281_s28 + $0x2d0] ss:$24 sps:$4 sm:$0xff]  }
 0x9ba   : > { %5721 = vmatprep.subr.bf16.mxu1 %v8253_v7  ;;  %v8308_v7 = vld [vmem:[%s12281_s28 + $0x2a8] ss:$24 sps:$4 sm:$0xff]  }
 0xa5c   : > { %v7772_v28 = vpop.f32.mrf.mxu1 }
 0xa5e   : > { %v4545_v61 = vpop.f32.mrf.mxu1 }
 0xa60   : > { %v7773_v20 = vpop.f32.mrf.mxu1 }
 0xa61   : > { %v4565_v23 = vpack.c.bf16 %v7773_v20, %v7772_v28  ;;  %v8311_v28 = vld [vmem:[%s12281_s28 + $0x270] ss:$24 sps:$4 sm:$0xff]   ;;  %v8317_v20 = vld [vmem:[%s12281_s28 + $0x240] ss:$24 sps:$4 sm:$0xff]  }
 0xa62   : > { %v4548_v35 = vpop.f32.mrf.mxu1 }
 0xa63   : > { %v4564_v43 = vpack.c.bf16 %v4548_v35, %v4545_v61  ;;  %v8314_v61 = vld [vmem:[%s12281_s28 + $0x278] ss:$24 sps:$4 sm:$0xff]   ;;  %v8319_v35 = vld [vmem:[%s12281_s28 + $0x244] ss:$24 sps:$4 sm:$0xff]  }
 0xa65   : > { %4887 = vmatmul.mubr.bf16.vlgmr.msra.gmra.mxu0 %v4564_v43  ;;  %4940 = vmatmul.mubr.bf16.vlgmr.msra.gmra.mxu1 %v4564_v43 }
 0xa66   : > { %4961 = vmatpush1.bf16.msra.mxu0 %v8227_v24  ;;  %4896 = vmatprep.mubr.bf16.mxu0 %v12278_v27  ;;  %v8320_v24 = vld [vmem:[%s12281_s28 + $0x248] ss:$24 sps:$4 sm:$0xff]  }
 0xa67   : > { %4962 = vmatprep.subr.bf16.mxu0 %v8232_v1  ;;  %4949 = vmatprep.mubr.bf16.mxu1 %v12278_v27  ;;  %v8323_v1 = vld [vmem:[%s12281_s28 + $0x210] ss:$24 sps:$4 sm:$0xff]  }
 0xa68   : > { %5722 = vmatpush1.bf16.msra.mxu1 %v8251_v62  ;;  %v8325_v62 = vld [vmem:[%s12281_s28 + $0x214] ss:$24 sps:$4 sm:$0xff]  }
 0xa69   : > { %5723 = vmatprep.subr.bf16.mxu1 %v8259_v13  ;;  %v8326_v13 = vld [vmem:[%s12281_s28 + $0x218] ss:$24 sps:$4 sm:$0xff]  }
 0xa6a   : > { %4963 = vmatpush1.bf16.msra.mxu0 %v8230_v45  ;;  %v8328_v45 = vld [vmem:[%s12281_s28 + $0x21c] ss:$24 sps:$4 sm:$0xff]  }
 0xa6b   : > { %4964 = vmatprep.subr.bf16.mxu0 %v8235_v39  ;;  %v8331_v39 = vld [vmem:[%s12281_s28 + $0x1e4] ss:$24 sps:$4 sm:$0xff]  }
 0xa6c   : > { %5724 = vmatpush1.bf16.msra.mxu1 %v8257_v14  ;;  %v8334_v14 = vld [vmem:[%s12281_s28 + $0x1ec] ss:$24 sps:$4 sm:$0xff]  }
 0xa6d   : > { %4897 = vmatmul.mubr.bf16.gmra.mxu0 %v4565_v23  ;;  %4950 = vmatmul.mubr.bf16.gmra.mxu1 %v4565_v23 }
 0xa6e   : > { %4965 = vmatpush1.bf16.msra.mxu0 %v8233_v11  ;;  %4992 = vmatprep.mubr.bf16.mxu0 %v12278_v27  ;;  %v8329_v11 = vld [vmem:[%s12281_s28 + $0x1e0] ss:$24 sps:$4 sm:$0xff]  }
 0xa6f   : > { %4966 = vmatprep.subr.bf16.mxu0 %v8238_v54  ;;  %5725 = vmatprep.subr.bf16.mxu1 %v8265_v42  ;;  %v8337_v54 = vld [vmem:[%s12281_s28 + $0x1b4] ss:$24 sps:$4 sm:$0xff]  }
 0xa70   : > { %5726 = vmatpush1.bf16.msra.mxu1 %v8263_v0  ;;  %v8340_v42 = vld [vmem:[%s12281_s28 + $0x1bc] ss:$24 sps:$4 sm:$0xff]   ;;  %v8335_v0 = vld [vmem:[%s12281_s28 + $0x1b0] ss:$24 sps:$4 sm:$0xff]  }
 0xa71   : > { %5727 = vmatprep.subr.bf16.mxu1 %v8271_v41 }
 0xa72   : > { %4967 = vmatpush1.bf16.msra.mxu0 %v8236_v25  ;;  %v8338_v25 = vld [vmem:[%s12281_s28 + $0x1b8] ss:$24 sps:$4 sm:$0xff]  }
 0xa73   : > { %4968 = vmatprep.subr.bf16.mxu0 %v8241_v3  ;;  %v8343_v3 = vld [vmem:[%s12281_s28 + $0x184] ss:$24 sps:$4 sm:$0xff]  }
 0xa74   : > { %5728 = vmatpush1.bf16.msra.mxu1 %v8269_v17 }
 0xa75   : > { %5729 = vmatprep.subr.bf16.mxu1 %v8277_v15 }
 0xa76   : > { %4969 = vmatpush1.bf16.msra.mxu0 %v8239_v22  ;;  %v8346_v22 = vld [vmem:[%s12281_s28 + $0x18c] ss:$24 sps:$4 sm:$0xff]  }
 0xa77   : > { %4970 = vmatprep.subr.bf16.mxu0 %v8244_v57  ;;  %v8341_v57 = vld [vmem:[%s12281_s28 + $0x180] ss:$24 sps:$4 sm:$0xff]  }
 0xa78   : > { %5730 = vmatpush1.bf16.msra.mxu1 %v8275_v37  ;;  %v11503_v37 = vpop.permute.xlu0 %5036 }
 0xa79   : > { %5731 = vmatprep.subr.bf16.mxu1 %v8283_v36 }
 0xa7a   : > { %4971 = vmatpush1.bf16.msra.mxu0 %v8242_v63  ;;  %v8344_v63 = vld [vmem:[%s12281_s28 + $0x188] ss:$24 sps:$4 sm:$0xff]  }
 0xa7b   : > { %4972 = vmatprep.subr.bf16.mxu0 %v8247_v40  ;;  %v8349_v40 = vld [vmem:[%s12281_s28 + $0x164] ss:$24 sps:$4 sm:$0xff]  }
 0xa7c   : > { %5732 = vmatpush1.bf16.msra.mxu1 %v8281_v16 }
 0xa7d   : > { %5733 = vmatprep.subr.bf16.mxu1 %v8289_v56 }
 0xa7e   : > { %4973 = vmatpush1.bf16.msra.mxu0 %v8245_v5 }
 0xa7f   : > { %4974 = vmatprep.subr.bf16.mxu0 %v8250_v53 }
 0xa80   : > { %5734 = vmatpush1.bf16.msra.mxu1 %v8287_v30 }
 0xa81   : > { %5735 = vmatprep.subr.bf16.mxu1 %v8295_v2 }
 0xa82   : > { %4975 = vmatpush1.bf16.msra.mxu0 %v8248_v47 }
 0xa83   : > { %5774 = vmatprep.subr.bf16.mxu0 %v8256_v50 }
 0xa84   : > { %5736 = vmatpush1.bf16.msra.mxu1 %v8293_v19 }
 0xa85   : > { %4993 = vmatmul.mubr.bf16.vlgmr.msra.gmra.mxu0 %v4564_v43  ;;  %5737 = vmatprep.subr.bf16.mxu1 %v8301_v44  ;;  %v8322_v43 = vld [vmem:[%s12281_s28 + $0x24c] ss:$24 sps:$4 sm:$0xff]  }
 0xa86   : > { %5002 = vmatprep.mubr.bf16.mxu0 %v12278_v27  ;;  %5775 = vmatpush1.bf16.msra.mxu0 %v8254_v34 }
 0xa87   : > { %5776 = vmatprep.subr.bf16.mxu0 %v8262_v9 }
 0xa88   : > { %5738 = vmatpush2.bf16.msra.mxu1 %v8299_v49  ;;  %v11521_v49 = vsub.s32 1, %v9638_v4 }
 0xa89   : > { %5739 = vmatprep.subr.bf16.mxu1 %v8307_v6 }
 0xa8a   : > { %5777 = vmatpush1.bf16.msra.mxu0 %v8260_v59 }
 0xa8b   : > { %5778 = vmatprep.subr.bf16.mxu0 %v8268_v26 }
 0xa8c   : > { %5740 = vmatpush2.bf16.msra.mxu1 %v8305_v32  ;;  %v11527_v32 = vpop.permute.xlu0 %5041 }
 0xa8d   : > { %5003 = vmatmul.mubr.bf16.gmra.mxu0 %v4565_v23  ;;  %5741 = vmatprep.subr.bf16.mxu1 %v8313_v46  ;;  %v8332_v23 = vld [vmem:[%s12281_s28 + $0x1e8] ss:$24 sps:$4 sm:$0xff]  }
 0xa8e   : > { %5779 = vmatpush1.bf16.msra.mxu0 %v8266_v55  ;;  %v11499_v55 = vpop.permute.xlu1 %5031 }
 0xa8f   : > { %5780 = vmatprep.subr.bf16.mxu0 %v8274_v60 }
 0xa90   : > { %5742 = vmatpush2.bf16.msra.mxu1 %v8311_v28 }
 0xa91   : > { %5743 = vmatprep.subr.bf16.mxu1 %v8319_v35 }
 0xa92   : > { %5781 = vmatpush1.bf16.msra.mxu0 %v8272_v31  ;;  %v11501_v41 = vpop.permute.xlu1 %5082 }
 0xa93   : > { %5782 = vmatprep.subr.bf16.mxu0 %v8280_v48 }
 0xa94   : > { %5744 = vmatpush2.bf16.msra.mxu1 %v8317_v20 }
 0xa95   : > { %5745 = vmatprep.subr.bf16.mxu1 %v8325_v62 }
 0xa96   : > { %5783 = vmatpush1.bf16.msra.mxu0 %v8278_v38  ;;  %v11509_v2 = vpop.permute.xlu1 %5086 }
 0xa97   : > { %5784 = vmatprep.subr.bf16.mxu0 %v8286_v21 }
 0xa98   : > { %5746 = vmatpush2.bf16.msra.mxu1 %v8323_v1 }
 0xa99   : > { %5747 = vmatprep.subr.bf16.mxu1 %v8331_v39 }
 0xa9a   : > { %5785 = vmatpush1.bf16.msra.mxu0 %v8284_v33 }
 0xa9b   : > { %5786 = vmatprep.subr.bf16.mxu0 %v8292_v51 }
 0xa9c   : > { %5748 = vmatpush2.bf16.msra.mxu1 %v8329_v11 }
 0xa9d   : > { %5749 = vmatprep.subr.bf16.mxu1 %v8337_v54 }
 0xa9e   : > { %5787 = vmatpush1.bf16.msra.mxu0 %v8290_v18 }
 0xa9f   : > { %5788 = vmatprep.subr.bf16.mxu0 %v8298_v29 }
 0xaa0   : > { %5750 = vmatpush2.bf16.msra.mxu1 %v8335_v0 }
 0xaa1   : > { %5751 = vmatprep.subr.bf16.mxu1 %v8343_v3 }
 0xaa2   : > { %5789 = vmatpush1.bf16.msra.mxu0 %v8296_v52 }
 0xaa3   : > { %5790 = vmatprep.subr.bf16.mxu0 %v8304_v12  ;;  %v11518_v12 = vsub.s32 0, %v9638_v4  ;;  %v8396_v4 = vld [vmem:[%s12016_s24 + $0x70] ss:$8 sps:$4 sm:$0xff]  }
 0xaa4   : > { %5752 = vmatpush2.bf16.msra.mxu1 %v8341_v57 }
 0xaa5   : > { %5827 = vmatprep.subr.bf16.mxu1 %v8349_v40 }
 0xaa6   : > { %5791 = vmatpush2.bf16.msra.mxu0 %v8302_v8 }
 0xaa7   : > { %5792 = vmatprep.subr.bf16.mxu0 %v8310_v58 }
 0xaaa   : > { %5793 = vmatpush2.bf16.msra.mxu0 %v8308_v7 }
 0xaab   : > { %5794 = vmatprep.subr.bf16.mxu0 %v8316_v10  ;;  %v5113_v10 = vld [vmem:[#allocation15] sm:$0x3] }
 0xaac   : > { %v11541_v39 = vrot.slane %v5113_v10, %v11518_v12 }
 0xaae   : > { %5795 = vmatpush2.bf16.msra.mxu0 %v8314_v61 }
 0xaaf   : > { %5796 = vmatprep.subr.bf16.mxu0 %v8322_v43 }
 0xab2   : > { %5797 = vmatpush2.bf16.msra.mxu0 %v8320_v24 }
 0xab3   : > { %5798 = vmatprep.subr.bf16.mxu0 %v8328_v45 }
 0xab6   : > { %5799 = vmatpush2.bf16.msra.mxu0 %v8326_v13 }
 0xab7   : > { %5800 = vmatprep.subr.bf16.mxu0 %v8334_v14 }
 0xaba   : > { %5801 = vmatpush2.bf16.msra.mxu0 %v8332_v23  ;;  %v11543_v23 = vpop.permute.xlu1 %5046 }
 0xabb   : > { %5802 = vmatprep.subr.bf16.mxu0 %v8340_v42 }
 0xabe   : > { %5803 = vmatpush2.bf16.msra.mxu0 %v8338_v25  ;;  %v5122_v25 = vrot.slane %v5113_v10, %v11521_v49 }
 0xabf   : > { %5804 = vmatprep.subr.bf16.mxu0 %v8346_v22 }
 0xac2   : > { %5805 = vmatpush2.bf16.msra.mxu0 %v8344_v63 }
 0xb25   : > { %v4888_v5 = vpop.f32.mrf.mxu0  ;;  %v4941_v9 = vpop.f32.mrf.mxu1 }
 0xb26   : > { %v5013_v36 = vrot.slane %v4888_v5, 7 }
 0xb27   : > { %v4890_v53 = vpop.f32.mrf.mxu0  ;;  %v4943_v26 = vpop.f32.mrf.mxu1 }
 0xb28   : > { %v5014_v56 = vrot.slane %v4890_v53, 7 }
 0xb29   : > { %v4892_v47 = vpop.f32.mrf.mxu0  ;;  %v4945_v31 = vpop.f32.mrf.mxu1 }
 0xb2a   : > { %v5015_v38 = vrot.slane %v4892_v47, 7 }
 0xb2b   : > { %v4894_v50 = vpop.f32.mrf.mxu0  ;;  %v4947_v21 = vpop.f32.mrf.mxu1 }
 0xb2c   : > { %v5016_v33 = vrot.slane %v4894_v50, 7  ;;  %v5025_v19 = vsel %vm1606_vm1, %v5013_v36, %v5015_v38 }
 0xb2d   : > { %v4898_v34 = vpop.f32.mrf.mxu0  ;;  %v4951_v58 = vpop.f32.mrf.mxu1  ;;  %v5051_v62 = vmul.f32 %v11503_v37, %v5025_v19 }
 0xb2e   : > { %v5017_v30 = vrot.slane %v4898_v34, 7  ;;  %v5026_v6 = vsel %vm1606_vm1, %v5014_v56, %v5016_v33 }
 0xb2f   : > { %v4900_v59 = vpop.f32.mrf.mxu0  ;;  %v5052_v13 = vmul.f32 %v11503_v37, %v5026_v6  ;;  %v4953_v11 = vpop.f32.mrf.mxu1  ;;  %v5059_v34 = vadd.f32 %v5051_v62, %v4945_v31 }
 0xb30   : > { %v5018_v18 = vrot.slane %v4900_v59, 7  ;;  %v5023_v8 = vsel %vm1606_vm1, %v5015_v38, %v5017_v30  ;;  %v11558_v38 = vpop.permute.xlu0 %5090 }
 0xb31   : > { %v4902_v17 = vpop.f32.mrf.mxu0  ;;  %v5053_v45 = vmul.f32 %v11527_v32, %v5023_v8  ;;  %v5060_v59 = vadd.f32 %v5052_v13, %v4947_v21 }
 0xb32   : > { %v5019_v15 = vrot.slane %v4902_v17, 7  ;;  %v5024_v28 = vsel %vm1606_vm1, %v5016_v33, %v5018_v18 }
 0xb33   : > { %v4904_v60 = vpop.f32.mrf.mxu0  ;;  %v5054_v3 = vmul.f32 %v11527_v32, %v5024_v28 }
 0xb34   : > { %v5020_v48 = vrot.slane %v4904_v60, 7  ;;  %v5027_v29 = vsel %vm1606_vm1, %v5019_v15, %v5013_v36  ;;  %v5021_v22 = vsel %vm1606_vm1, %v5017_v30, %v5019_v15  ;;  %v5061_v15 = vadd.f32 %v5053_v45, %v4951_v58 }
 0xb35   : > { %v5049_v61 = vmul.f32 %v11499_v55, %v5027_v29  ;;  %v5055_v30 = vmul.f32 %v11543_v23, %v5021_v22  ;;  %v5062_v29 = vadd.f32 %v5054_v3, %v4953_v11 }
 0xb36   : > { %v5028_v44 = vsel %vm1606_vm1, %v5020_v48, %v5014_v56  ;;  %v5022_v57 = vsel %vm1606_vm1, %v5018_v18, %v5020_v48 }
 0xb37   : > { %v5050_v35 = vmul.f32 %v11499_v55, %v5028_v44  ;;  %v5057_v5 = vadd.f32 %v5049_v61, %v4941_v9  ;;  %v5056_v31 = vmul.f32 %v11543_v23, %v5022_v57 }
 0xb39   : > { %v5058_v53 = vadd.f32 %v5050_v35, %v4943_v26  ;;  %v11562_v26 = vpop.permute.xlu1 %5094 }
 0xb45   : > { %v11505_v16 = vpop.f32.mrf.mxu0 }
 0xb46   : > { %v5065_v7 = vrot.slane %v11505_v16, 1  ;;  %v4955_v16 = vpop.f32.mrf.mxu1 }
 0xb47   : > { %v11507_v51 = vpop.f32.mrf.mxu0 }
 0xb48   : > { %v5066_v24 = vrot.slane %v11507_v51, 1 }
 0xb49   : > { %v4998_v52 = vpop.f32.mrf.mxu0 }
 0xb4a   : > { %v5067_v46 = vrot.slane %v4998_v52, 1 }
 0xb4b   : > { %v5000_v20 = vpop.f32.mrf.mxu0 }
 0xb4c   : > { %v5077_v43 = vsel %vm1895_vm2, %v5065_v7, %v5067_v46  ;;  %v5068_v1 = vrot.slane %v5000_v20, 1 }
 0xb4d   : > { %v5004_v14 = vpop.f32.mrf.mxu0  ;;  %v5097_v54 = vmul.f32 %v11501_v41, %v5077_v43 }
 0xb4e   : > { %v5078_v42 = vsel %vm1895_vm2, %v5066_v24, %v5068_v1  ;;  %v5069_v0 = vrot.slane %v5004_v14, 1 }
 0xb4f   : > { %v5098_v63 = vmul.f32 %v11501_v41, %v5078_v42  ;;  %v5006_v40 = vpop.f32.mrf.mxu0  ;;  %v5105_v36 = vadd.f32 %v5097_v54, %v5057_v5 }
 0xb50   : > { %v5075_v47 = vsel %vm1895_vm2, %v5067_v46, %v5069_v0  ;;  %v5070_v50 = vrot.slane %v5006_v40, 1  ;;  %v4957_v46 = vpop.f32.mrf.mxu1  ;;  %v8347_v40 = vld [vmem:[%s12281_s28 + $0x160] ss:$24 sps:$4 sm:$0xff]  }
 0xb51   : > { %v5099_v17 = vmul.f32 %v11509_v2, %v5075_v47  ;;  %v5008_v60 = vpop.f32.mrf.mxu0  ;;  %v5106_v48 = vadd.f32 %v5098_v63, %v5058_v53  ;;  %v5125_v10 = vadd.f32 %v11541_v39, %v5105_v36  ;;  %v5064_v43 = vadd.f32 %v5056_v31, %v4957_v46  ;;  %v8358_v36 = vld [vmem:[%s12281_s28 + $0xd4] ss:$24 sps:$4 sm:$0xff]   ;;  %v8362_v31 = vld [vmem:[%s12281_s28 + $0x70] ss:$24 sps:$4 sm:$0xff]  }
 0xb52   : > { %v5076_v33 = vsel %vm1895_vm2, %v5068_v1, %v5070_v50  ;;  %v5071_v9 = vrot.slane %v5008_v60, 1  ;;  %v8355_v60 = vld [vmem:[%s12281_s28 + $0x104] ss:$24 sps:$4 sm:$0xff]   ;;  %v8380_v46 = vld [vmem:[%s12281_s28 + $0x250] ss:$24 sps:$4 sm:$0xff]  }
 0xb53   : > { %v5107_v21 = vadd.f32 %v5099_v17, %v5059_v34  ;;  %v5100_v56 = vmul.f32 %v11509_v2, %v5076_v33  ;;  %v5010_v18 = vpop.f32.mrf.mxu0  ;;  %v5126_v20 = vadd.f32 %v5122_v25, %v5106_v48  ;;  %v5133_v42 = vmax.f32 %v5125_v10, 0.0  ;;  %v8352_v34 = vld [vmem:[%s12281_s28 + $0x134] ss:$24 sps:$4 sm:$0xff]   ;;  %v8356_v48 = vld [vmem:[%s12281_s28 + $0xd0] ss:$24 sps:$4 sm:$0xff]  }
 0xb54   : > { %v5072_v51 = vrot.slane %v5010_v18, 1  ;;  %v5073_v19 = vsel %vm1895_vm2, %v5069_v0, %v5071_v9  ;;  %v5079_v44 = vsel %vm1895_vm2, %v5071_v9, %v5065_v7  ;;  %v5063_v7 = vadd.f32 %v5055_v30, %v4955_v16  ;;  %v8361_v33 = vld [vmem:[%s12281_s28 + $0xa4] ss:$24 sps:$4 sm:$0xff]   ;;  %v8359_v9 = vld [vmem:[%s12281_s28 + $0xa0] ss:$24 sps:$4 sm:$0xff]  }
 0xb55   : > { %v5127_v52 = vadd.f32 %v11541_v39, %v5107_v21  ;;  %v5108_v6 = vadd.f32 %v5100_v56, %v5060_v59  ;;  %v5101_v8 = vmul.f32 %v11558_v38, %v5073_v19  ;;  %v5103_v58 = vmul.f32 %v11562_v26, %v5079_v44  ;;  %v8350_v59 = vld [vmem:[%s12281_s28 + $0x130] ss:$24 sps:$4 sm:$0xff]   ;;  %v8364_v30 = vld [vmem:[%s12281_s28 + $0x74] ss:$24 sps:$4 sm:$0xff]   ;;  %v8367_v21 = vld [vmem:[%s12281_s28 + $0x44] ss:$24 sps:$4 sm:$0xff]  }
 0xb56   : > { %v5074_v28 = vsel %vm1895_vm2, %v5070_v50, %v5072_v51  ;;  %v5080_v61 = vsel %vm1895_vm2, %v5072_v51, %v5066_v24  ;;  %v5134_v0 = vmax.f32 %v5126_v20, 0.0  ;;  %v8365_v56 = vld [vmem:[%s12281_s28 + $0x40] ss:$24 sps:$4 sm:$0xff]   ;;  %v8370_v18 = vld [vmem:[%s12281_s28 + $0x14] ss:$24 sps:$4 sm:$0xff]  }
 0xb57   : > { %v5102_v35 = vmul.f32 %v11558_v38, %v5074_v28  ;;  %v5104_v1 = vmul.f32 %v11562_v26, %v5080_v61  ;;  %v5135_v62 = vmax.f32 %v5127_v52, 0.0  ;;  %v5128_v13 = vadd.f32 %v5122_v25, %v5108_v6  ;;  %v8368_v51 = vld [vmem:[%s12281_s28 + $0x10] ss:$24 sps:$4 sm:$0xff]   ;;  %v8371_v19 = vld [vmem:[%s12281_s28 + $0x2e0] ss:$24 sps:$4 sm:$0xff]  }
 0xb58   : > { %v5109_v45 = vadd.f32 %v5101_v8, %v5061_v15  ;;  %v5111_v11 = vadd.f32 %v5103_v58, %v5063_v7  ;;  %v8353_v15 = vld [vmem:[%s12281_s28 + $0x100] ss:$24 sps:$4 sm:$0xff]   ;;  %v8376_v44 = vld [vmem:[%s12281_s28 + $0x2b4] ss:$24 sps:$4 sm:$0xff]   ;;  %v8374_v52 = vld [vmem:[%s12281_s28 + $0x2b0] ss:$24 sps:$4 sm:$0xff]  }
 0xb59   : > { %v5110_v14 = vadd.f32 %v5102_v35, %v5062_v29  ;;  %v5112_v54 = vadd.f32 %v5104_v1, %v5064_v43  ;;  %v5136_v3 = vmax.f32 %v5128_v13, 0.0  ;;  %v11581_v63 = vpack.c.bf16 %v5135_v62, %v5133_v42  ;;  %v8373_v29 = vld [vmem:[%s12281_s28 + $0x2e4] ss:$24 sps:$4 sm:$0xff]   ;;  %v8377_v8 = vld [vmem:[%s12281_s28 + $0x280] ss:$24 sps:$4 sm:$0xff]  }
 0xb5a   : > { %v5129_v5 = vadd.f32 %v11541_v39, %v5109_v45  ;;  %v5131_v53 = vadd.f32 %v11541_v39, %v5111_v11  ;;  %v8379_v6 = vld [vmem:[%s12281_s28 + $0x284] ss:$24 sps:$4 sm:$0xff]   ;;  %v8382_v58 = vld [vmem:[%s12281_s28 + $0x254] ss:$24 sps:$4 sm:$0xff]   ;;  %v8383_v28 = vld [vmem:[%s12281_s28 + $0x220] ss:$24 sps:$4 sm:$0xff]  }
 0xb5b   : > { %v5130_v22 = vadd.f32 %v5122_v25, %v5110_v14  ;;  %v5132_v57 = vadd.f32 %v5122_v25, %v5112_v54  ;;  %v5142_v24 = vpack.c.bf16 %v5136_v3, %v5134_v0  ;;  %v8385_v10 = vld [vmem:[%s12281_s28 + $0x224] ss:$24 sps:$4 sm:$0xff]   ;;  %v8388_v61 = vld [vmem:[%s12281_s28 + $0x1f4] ss:$24 sps:$4 sm:$0xff]   ;;  %v8386_v20 = vld [vmem:[%s12281_s28 + $0x1f0] ss:$24 sps:$4 sm:$0xff]  }
 0xb5c   : > { %v5137_v39 = vmax.f32 %v5129_v5, 0.0  ;;  %v5139_v17 = vmax.f32 %v5131_v53, 0.0  ;;  %v8391_v35 = vld [vmem:[%s12281_s28 + $0x1c4] ss:$24 sps:$4 sm:$0xff]   ;;  %v8389_v7 = vld [vmem:[%s12281_s28 + $0x1c0] ss:$24 sps:$4 sm:$0xff]  }
 0xb5d   : > { %v5138_v47 = vmax.f32 %v5130_v22, 0.0  ;;  %v5140_v50 = vmax.f32 %v5132_v57, 0.0  ;;  %5753 = vmatprep.mubr.bf16.mxu1 %v5142_v24  ;;  %5806 = vmatprep.mubr.bf16.mxu0 %v5142_v24  ;;  %v8394_v43 = vld [vmem:[%s12281_s28 + $0x194] ss:$24 sps:$4 sm:$0xff]   ;;  %v8392_v1 = vld [vmem:[%s12281_s28 + $0x190] ss:$24 sps:$4 sm:$0xff]  }
 0xb5e   : > { %5754 = vmatmul.mubr.bf16.vlgmr.msra.gmra.mxu1 %v11581_v63  ;;  %5807 = vmatmul.mubr.bf16.vlgmr.msra.gmra.mxu0 %v11581_v63  ;;  %v5143_v16 = vpack.c.bf16 %v5139_v17, %v5137_v39 }
 0xb5f   : > { %v11593_v25 = vpack.c.bf16 %v5140_v50, %v5138_v47  ;;  %5828 = vmatpush1.bf16.msra.mxu1 %v8347_v40 }
 0xb60   : > { %5829 = vmatprep.subr.bf16.mxu1 %v8352_v34 }
 0xb61   : > { %5763 = vmatprep.mubr.bf16.mxu1 %v11593_v25  ;;  %5816 = vmatprep.mubr.bf16.mxu0 %v11593_v25 }
 0xb63   : > { %5830 = vmatpush1.bf16.msra.mxu1 %v8350_v59 }
 0xb64   : > { %5831 = vmatprep.subr.bf16.mxu1 %v8355_v60 }
 0xb66   : > { %5764 = vmatmul.mubr.bf16.gmra.mxu1 %v5143_v16  ;;  %5817 = vmatmul.mubr.bf16.gmra.mxu0 %v5143_v16 }
 0xb67   : > { %5832 = vmatpush1.bf16.msra.mxu1 %v8353_v15  ;;  %5859 = vmatprep.mubr.bf16.mxu1 %v5142_v24 }
 0xb68   : > { %5833 = vmatprep.subr.bf16.mxu1 %v8358_v36  ;;  %6042 = vmatprep.mubr.bf16.mxu0 %v12278_v27 }
 0xb6b   : > { %5834 = vmatpush1.bf16.msra.mxu1 %v8356_v48 }
 0xb6c   : > { %5835 = vmatprep.subr.bf16.mxu1 %v8361_v33  ;;  %v5944_v33 = vld [vmem:[#allocation16] sm:$0x3] }
 0xb6f   : > { %5836 = vmatpush1.bf16.msra.mxu1 %v8359_v9 }
 0xb70   : > { %5837 = vmatprep.subr.bf16.mxu1 %v8364_v30 }
 0xb73   : > { %5838 = vmatpush1.bf16.msra.mxu1 %v8362_v31 }
 0xb74   : > { %5839 = vmatprep.subr.bf16.mxu1 %v8367_v21 }
 0xb77   : > { %5840 = vmatpush1.bf16.msra.mxu1 %v8365_v56 }
 0xb78   : > { %5841 = vmatprep.subr.bf16.mxu1 %v8370_v18 }
 0xb7b   : > { %5842 = vmatpush1.bf16.msra.mxu1 %v8368_v51 }
 0xb7c   : > { %5843 = vmatprep.subr.bf16.mxu1 %v8373_v29 }
 0xb7f   : > { %5844 = vmatpush2.bf16.msra.mxu1 %v8371_v19 }
 0xb80   : > { %5845 = vmatprep.subr.bf16.mxu1 %v8376_v44 }
 0xb83   : > { %5846 = vmatpush2.bf16.msra.mxu1 %v8374_v52 }
 0xb84   : > { %5847 = vmatprep.subr.bf16.mxu1 %v8379_v6  ;;  %v5949_v6 = vrot.slane %v5944_v33, %v11518_v12 }
 0xb87   : > { %5848 = vmatpush2.bf16.msra.mxu1 %v8377_v8  ;;  %v5953_v8 = vrot.slane %v5944_v33, %v11521_v49 }
 0xb88   : > { %5849 = vmatprep.subr.bf16.mxu1 %v8382_v58 }
 0xb8b   : > { %5850 = vmatpush2.bf16.msra.mxu1 %v8380_v46 }
 0xb8c   : > { %5851 = vmatprep.subr.bf16.mxu1 %v8385_v10 }
 0xb8f   : > { %5852 = vmatpush2.bf16.msra.mxu1 %v8383_v28 }
 0xb90   : > { %5853 = vmatprep.subr.bf16.mxu1 %v8388_v61 }
 0xb93   : > { %5854 = vmatpush2.bf16.msra.mxu1 %v8386_v20 }
 0xb94   : > { %5855 = vmatprep.subr.bf16.mxu1 %v8391_v35 }
 0xb97   : > { %5856 = vmatpush2.bf16.msra.mxu1 %v8389_v7 }
 0xb98   : > { %5857 = vmatprep.subr.bf16.mxu1 %v8394_v43 }
 0xb9b   : > { %5858 = vmatpush2.bf16.msra.mxu1 %v8392_v1 }
 0xb9e   : > { %5860 = vmatmul.mubr.bf16.vlgmr.msra.gmra.mxu1 %v11581_v63 }
 0xb9f   : > { %5869 = vmatprep.mubr.bf16.mxu1 %v11593_v25 }
 0xba6   : > { %5870 = vmatmul.mubr.bf16.gmra.mxu1 %v5143_v16 }
 0xc1e   : > { %v5755_v62 = vpop.f32.mrf.mxu1  ;;  %v5808_v42 = vpop.f32.mrf.mxu0 }
 0xc1f   : > { %v5880_v53 = vrot.slane %v5755_v62, 7 }
 0xc20   : > { %v5757_v13 = vpop.f32.mrf.mxu1  ;;  %v5810_v3 = vpop.f32.mrf.mxu0 }
 0xc21   : > { %v5881_v63 = vrot.slane %v5757_v13, 7 }
 0xc22   : > { %v5759_v45 = vpop.f32.mrf.mxu1  ;;  %v5812_v57 = vpop.f32.mrf.mxu0 }
 0xc23   : > { %v5882_v47 = vrot.slane %v5759_v45, 7 }
 0xc24   : > { %v5761_v14 = vpop.f32.mrf.mxu1  ;;  %v5814_v50 = vpop.f32.mrf.mxu0 }
 0xc25   : > { %v5883_v34 = vrot.slane %v5761_v14, 7  ;;  %v5892_v15 = vsel %vm1606_vm1, %v5880_v53, %v5882_v47 }
 0xc26   : > { %v5765_v11 = vpop.f32.mrf.mxu1  ;;  %v5818_v16 = vpop.f32.mrf.mxu0  ;;  %v5898_v44 = vmul.f32 %v5892_v15, %v11503_v37 }
 0xc27   : > { %v5884_v25 = vrot.slane %v5765_v11, 7  ;;  %v5893_v9 = vsel %vm1606_vm1, %v5881_v63, %v5883_v34 }
 0xc28   : > { %v5767_v54 = vpop.f32.mrf.mxu1  ;;  %v5899_v46 = vmul.f32 %v5893_v9, %v11503_v37 }
 0xc29   : > { %v5890_v30 = vsel %vm1606_vm1, %v5882_v47, %v5884_v25  ;;  %v5885_v18 = vrot.slane %v5767_v54, 7 }
 0xc2a   : > { %v5769_v0 = vpop.f32.mrf.mxu1  ;;  %v5900_v20 = vmul.f32 %v5890_v30, %v11527_v32 }
 0xc2b   : > { %v5886_v24 = vrot.slane %v5769_v0, 7  ;;  %v5891_v62 = vsel %vm1606_vm1, %v5883_v34, %v5885_v18 }
 0xc2c   : > { %v5771_v22 = vpop.f32.mrf.mxu1 }
 0xc2d   : > { %v5887_v40 = vrot.slane %v5771_v22, 7  ;;  %v5894_v39 = vsel %vm1606_vm1, %v5886_v24, %v5880_v53  ;;  %v5888_v10 = vsel %vm1606_vm1, %v5884_v25, %v5886_v24  ;;  %v5908_v53 = vadd.f32 %v5900_v20, %v5818_v16 }
 0xc2e   : > { %v5896_v31 = vmul.f32 %v5894_v39, %v11499_v55  ;;  %v5902_v14 = vmul.f32 %v5888_v10, %v11543_v23 }
 0xc2f   : > { %v5895_v17 = vsel %vm1606_vm1, %v5887_v40, %v5881_v63  ;;  %v5889_v37 = vsel %vm1606_vm1, %v5885_v18, %v5887_v40  ;;  %v5901_v40 = vmul.f32 %v5891_v62, %v11527_v32 }
 0xc30   : > { %v5897_v21 = vmul.f32 %v5895_v17, %v11499_v55  ;;  %v5820_v55 = vpop.f32.mrf.mxu0  ;;  %v5904_v35 = vadd.f32 %v5896_v31, %v5808_v42  ;;  %v5903_v63 = vmul.f32 %v5889_v37, %v11543_v23 }
 0xc31   : > { %v5909_v33 = vadd.f32 %v5901_v40, %v5820_v55 }
 0xc32   : > { %v5905_v7 = vadd.f32 %v5897_v21, %v5810_v3  ;;  %v5906_v3 = vadd.f32 %v5898_v44, %v5812_v57  ;;  %v5822_v22 = vpop.f32.mrf.mxu0 }
 0xc33   : > { %v5910_v39 = vadd.f32 %v5902_v14, %v5822_v22 }
 0xc34   : > { %v5824_v16 = vpop.f32.mrf.mxu0 }
 0xc35   : > { %v5911_v9 = vadd.f32 %v5903_v63, %v5824_v16  ;;  %v8411_v16 = vld [vmem:[%s12016_s24 + $0x150] ss:$8 sps:$4 sm:$0xff]  }
 0xc5e   : > { %v11687_v5 = vpop.f32.mrf.mxu1 }
 0xc5f   : > { %v5912_v36 = vrot.slane %v11687_v5, 1 }
 0xc60   : > { %v11689_v59 = vpop.f32.mrf.mxu1 }
 0xc61   : > { %v5913_v51 = vrot.slane %v11689_v59, 1 }
 0xc62   : > { %v5865_v60 = vpop.f32.mrf.mxu1 }
 0xc63   : > { %v5914_v48 = vrot.slane %v5865_v60, 1 }
 0xc64   : > { %v5867_v56 = vpop.f32.mrf.mxu1 }
 0xc65   : > { %v5924_v29 = vsel %vm1895_vm2, %v5912_v36, %v5914_v48  ;;  %v5915_v19 = vrot.slane %v5867_v56, 1 }
 0xc66   : > { %v5928_v52 = vmul.f32 %v5924_v29, %v11501_v41  ;;  %v5871_v58 = vpop.f32.mrf.mxu1 }
 0xc67   : > { %v5925_v28 = vsel %vm1895_vm2, %v5913_v51, %v5915_v19  ;;  %v5916_v61 = vrot.slane %v5871_v58, 1 }
 0xc68   : > { %v5929_v43 = vmul.f32 %v5925_v28, %v11501_v41  ;;  %v5873_v1 = vpop.f32.mrf.mxu1  ;;  %v5936_v11 = vadd.f32 %v5928_v52, %v5904_v35  ;;  %v5907_v41 = vadd.f32 %v5899_v46, %v5814_v50 }
 0xc69   : > { %v5922_v13 = vsel %vm1895_vm2, %v5914_v48, %v5916_v61  ;;  %v5917_v45 = vrot.slane %v5873_v1, 1 }
 0xc6a   : > { %v5937_v54 = vadd.f32 %v5929_v43, %v5905_v7  ;;  %v5930_v42 = vmul.f32 %v5922_v13, %v11509_v2  ;;  %v5875_v0 = vpop.f32.mrf.mxu1  ;;  %v5956_v17 = vadd.f32 %v5949_v6, %v5936_v11 }
 0xc6b   : > { %v5923_v24 = vsel %vm1895_vm2, %v5915_v19, %v5917_v45  ;;  %v5918_v5 = vrot.slane %v5875_v0, 1 }
 0xc6c   : > { %v5931_v47 = vmul.f32 %v5923_v24, %v11509_v2  ;;  %v5877_v34 = vpop.f32.mrf.mxu1  ;;  %v5938_v25 = vadd.f32 %v5930_v42, %v5906_v3  ;;  %v5957_v60 = vadd.f32 %v5953_v8, %v5937_v54  ;;  %v5964_v29 = vmax.f32 %v5956_v17, 0.0  ;;  %v8401_v17 = vld [vmem:[%s12016_s24 + $0x174] ss:$8 sps:$4 sm:$0xff]  }
 0xc6d   : > { %v5920_v59 = vsel %vm1895_vm2, %v5916_v61, %v5918_v5  ;;  %v5926_v57 = vsel %vm1895_vm2, %v5918_v5, %v5912_v36  ;;  %v5919_v50 = vrot.slane %v5877_v34, 1  ;;  %6593 = vmatprep.subr.bf16.mxu1 %v8401_v17  ;;  %v8450_v17 = vld [vmem:[%s12016_s24 + $0xe0] ss:$8 sps:$4 sm:$0xff]  }
 0xc6e   : > { %v5939_v15 = vadd.f32 %v5931_v47, %v5907_v41  ;;  %v5932_v32 = vmul.f32 %v5920_v59, %v11558_v38  ;;  %v5934_v23 = vmul.f32 %v5926_v57, %v11562_v26  ;;  %v5958_v31 = vadd.f32 %v5949_v6, %v5938_v25 }
 0xc6f   : > { %v5921_v2 = vsel %vm1895_vm2, %v5917_v45, %v5919_v50  ;;  %v5927_v48 = vsel %vm1895_vm2, %v5919_v50, %v5913_v51  ;;  %v5965_v52 = vmax.f32 %v5957_v60, 0.0  ;;  %v8395_v50 = vld [vmem:[%s12012_s20] sm:$0xff]  }
 0xc70   : > { %v5933_v36 = vmul.f32 %v5921_v2, %v11558_v38  ;;  %v5935_v30 = vmul.f32 %v5927_v48, %v11562_v26  ;;  %v5940_v21 = vadd.f32 %v5932_v32, %v5908_v53  ;;  %v5942_v56 = vadd.f32 %v5934_v23, %v5910_v39  ;;  %v8399_v39 = vld [vmem:[%s12016_s24 + $0x170] ss:$8 sps:$4 sm:$0xff]   ;;  %v8405_v60 = vld [vmem:[%s12016_s24 + $0x160] ss:$8 sps:$4 sm:$0xff]   ;;  %v8413_v32 = vld [vmem:[%s12016_s24 + $0x154] ss:$8 sps:$4 sm:$0xff]  }
 0xc71   : > { %v5959_v18 = vadd.f32 %v5953_v8, %v5939_v15  ;;  %v5966_v51 = vmax.f32 %v5958_v31, 0.0  ;;  %v5972_v26 = vrot.slane %v5964_v29, 1  ;;  %v5973_v62 = vrot.slane %v5965_v52, 1  ;;  %6594 = vmatpush1.bf16.msra.mxu1 %v8399_v39  ;;  %v8407_v15 = vld [vmem:[%s12016_s24 + $0x164] ss:$8 sps:$4 sm:$0xff]  }
 0xc72   : > { %v5941_v19 = vadd.f32 %v5933_v36, %v5909_v33  ;;  %v5943_v44 = vadd.f32 %v5935_v30, %v5911_v9  ;;  %v5960_v58 = vadd.f32 %v5949_v6, %v5940_v21  ;;  %v5962_v46 = vadd.f32 %v5949_v6, %v5942_v56  ;;  %6595 = vmatprep.subr.bf16.mxu1 %v8407_v15  ;;  %v8417_v23 = vld [vmem:[%s12016_s24 + $0x140] ss:$8 sps:$4 sm:$0xff]   ;;  %v8419_v2 = vld [vmem:[%s12016_s24 + $0x144] ss:$8 sps:$4 sm:$0xff]   ;;  %v8423_v48 = vld [vmem:[%s12016_s24 + $0x130] ss:$8 sps:$4 sm:$0xff]  }
 0xc73   : > { %v5967_v10 = vmax.f32 %v5959_v18, 0.0  ;;  %v5974_v45 = vrot.slane %v5966_v51, 1  ;;  %v8425_v33 = vld [vmem:[%s12016_s24 + $0x134] ss:$8 sps:$4 sm:$0xff]   ;;  %v8429_v9 = vld [vmem:[%s12016_s24 + $0x120] ss:$8 sps:$4 sm:$0xff]  }
 0xc74   : > { %v5961_v28 = vadd.f32 %v5953_v8, %v5941_v19  ;;  %v5963_v61 = vadd.f32 %v5953_v8, %v5943_v44  ;;  %v5968_v55 = vmax.f32 %v5960_v58, 0.0  ;;  %v5970_v20 = vmax.f32 %v5962_v46, 0.0  ;;  %v8431_v36 = vld [vmem:[%s12016_s24 + $0x124] ss:$8 sps:$4 sm:$0xff]   ;;  %v8435_v30 = vld [vmem:[%s12016_s24 + $0x110] ss:$8 sps:$4 sm:$0xff]  }
 0xc75   : > { %v5975_v35 = vrot.slane %v5967_v10, 1  ;;  %v5984_v63 = vsel %vm1895_vm2, %v5972_v26, %v5974_v45  ;;  %6596 = vmatpush1.bf16.msra.mxu1 %v8405_v60  ;;  %v8437_v31 = vld [vmem:[%s12016_s24 + $0x114] ss:$8 sps:$4 sm:$0xff]   ;;  %v8441_v21 = vld [vmem:[%s12016_s24 + $0x100] ss:$8 sps:$4 sm:$0xff]  }
 0xc76   : > { %v5969_v38 = vmax.f32 %v5961_v28, 0.0  ;;  %v5971_v7 = vmax.f32 %v5963_v61, 0.0  ;;  %v5976_v43 = vrot.slane %v5968_v55, 1  ;;  %v5978_v1 = vrot.slane %v5970_v20, 1  ;;  %6597 = vmatprep.subr.bf16.mxu1 %v8413_v32  ;;  %v8443_v56 = vld [vmem:[%s12016_s24 + $0x104] ss:$8 sps:$4 sm:$0xff]  }
 0xc77   : > { %v5985_v8 = vsel %vm1895_vm2, %v5973_v62, %v5975_v35  ;;  %v5988_v59 = vmax.f32 %v5964_v29, %v5984_v63  ;;  %v8447_v18 = vld [vmem:[%s12016_s24 + $0x1f0] ss:$8 sps:$4 sm:$0xff]   ;;  %v8449_v29 = vld [vmem:[%s12016_s24 + $0x1f4] ss:$8 sps:$4 sm:$0xff]   ;;  %v8453_v19 = vld [vmem:[%s12016_s24 + $0x1e0] ss:$8 sps:$4 sm:$0xff]  }
 0xc78   : > { %v5977_v37 = vrot.slane %v5969_v38, 1  ;;  %v5979_v13 = vrot.slane %v5971_v7, 1  ;;  %v5980_v14 = vsel %vm1895_vm2, %v5976_v43, %v5978_v1  ;;  %v5986_v6 = vsel %vm1895_vm2, %v5978_v1, %v5972_v26  ;;  %v8455_v44 = vld [vmem:[%s12016_s24 + $0x1e4] ss:$8 sps:$4 sm:$0xff]   ;;  %v8461_v58 = vld [vmem:[%s12016_s24 + $0x1d4] ss:$8 sps:$4 sm:$0xff]  }
 0xc79   : > { %v5992_v42 = vmax.f32 %v5968_v55, %v5980_v14  ;;  %v5994_v0 = vmax.f32 %v5970_v20, %v5986_v6  ;;  %v5982_v24 = vsel %vm1895_vm2, %v5974_v45, %v5976_v43  ;;  %v5989_v40 = vmax.f32 %v5965_v52, %v5985_v8  ;;  %6598 = vmatpush1.bf16.msra.mxu1 %v8411_v16  ;;  %v8459_v52 = vld [vmem:[%s12016_s24 + $0x1d0] ss:$8 sps:$4 sm:$0xff]   ;;  %v8465_v46 = vld [vmem:[%s12016_s24 + $0x1c0] ss:$8 sps:$4 sm:$0xff]   ;;  %v8473_v61 = vld [vmem:[%s12016_s24 + $0x1b4] ss:$8 sps:$4 sm:$0xff]  }
 0xc7a   : > { %v5981_v11 = vsel %vm1895_vm2, %v5977_v37, %v5979_v13  ;;  %v5987_v54 = vsel %vm1895_vm2, %v5979_v13, %v5973_v62  ;;  %v5983_v22 = vsel %vm1895_vm2, %v5975_v35, %v5977_v37  ;;  %v5990_v34 = vmax.f32 %v5966_v51, %v5982_v24  ;;  %6599 = vmatprep.subr.bf16.mxu1 %v8419_v2  ;;  %v8471_v28 = vld [vmem:[%s12016_s24 + $0x1b0] ss:$8 sps:$4 sm:$0xff]   ;;  %v6061_v6 = vld [vmem:[%s12015_s23] sm:$0xf]  ;;  %v8452_v39 = vld [vmem:[%s12016_s24 + $0xe4] ss:$8 sps:$4 sm:$0xff]  }
 0xc7b   : > { %v5993_v3 = vmax.f32 %v5969_v38, %v5981_v11  ;;  %v5995_v41 = vmax.f32 %v5971_v7, %v5987_v54  ;;  %v5991_v5 = vmax.f32 %v5967_v10, %v5983_v22  ;;  %v6000_v47 = vpack.c.bf16 %v5994_v0, %v5992_v42  ;;  %v8467_v10 = vld [vmem:[%s12016_s24 + $0x1c4] ss:$8 sps:$4 sm:$0xff]   ;;  %v8398_v11 = vld [vmem:[%s12016_s24 + $0x74] ss:$8 sps:$4 sm:$0xff]   ;;  %v8402_v0 = vld [vmem:[%s12016_s24 + $0x60] ss:$8 sps:$4 sm:$0xff]  }
 0xc7c   : > { %v5998_v57 = vpack.c.bf16 %v5990_v34, %v5988_v59  ;;  %v8404_v42 = vld [vmem:[%s12016_s24 + $0x64] ss:$8 sps:$4 sm:$0xff]   ;;  %v8414_v24 = vld [vmem:[%s12016_s24 + $0x40] ss:$8 sps:$4 sm:$0xff]   ;;  %v8432_v34 = vld [vmem:[%s12016_s24 + $0x10] ss:$8 sps:$4 sm:$0xff]  }
 0xc7d   : > { %v6001_v53 = vpack.c.bf16 %v5995_v41, %v5993_v3  ;;  %v5999_v25 = vpack.c.bf16 %v5991_v5, %v5989_v40  ;;  %6600 = vmatpush1.bf16.msra.mxu1 %v8417_v23  ;;  %v8410_v3 = vld [vmem:[%s12016_s24 + $0x54] ss:$8 sps:$4 sm:$0xff]   ;;  %v8408_v41 = vld [vmem:[%s12016_s24 + $0x50] ss:$8 sps:$4 sm:$0xff]   ;;  %v8416_v22 = vld [vmem:[%s12016_s24 + $0x44] ss:$8 sps:$4 sm:$0xff]  }
 0xc7e   : > { %6601 = vmatprep.subr.bf16.mxu1 %v8425_v33  ;;  %v8422_v5 = vld [vmem:[%s12016_s24 + $0x34] ss:$8 sps:$4 sm:$0xff]   ;;  %v8428_v40 = vld [vmem:[%s12016_s24 + $0x24] ss:$8 sps:$4 sm:$0xff]   ;;  %v8426_v63 = vld [vmem:[%s12016_s24 + $0x20] ss:$8 sps:$4 sm:$0xff]  }
 0xc7f   : > { %6022 = vmatprep.subr.bf16.mxu0 %v6001_v53  ;;  %v8420_v53 = vld [vmem:[%s12016_s24 + $0x30] ss:$8 sps:$4 sm:$0xff]   ;;  %v8438_v59 = vld [vmem:[%s12016_s24] ss:$8 sps:$4 sm:$0xff]   ;;  %v8458_v60 = vld [vmem:[%s12016_s24 + $0xd4] ss:$8 sps:$4 sm:$0xff]  }
 0xc80   : > { %6023 = vmatpush1.bf16.msra.mxu0 %v6000_v47  ;;  %v8434_v47 = vld [vmem:[%s12016_s24 + $0x14] ss:$8 sps:$4 sm:$0xff]   ;;  %v8456_v15 = vld [vmem:[%s12016_s24 + $0xd0] ss:$8 sps:$4 sm:$0xff]   ;;  %v8464_v16 = vld [vmem:[%s12016_s24 + $0xc4] ss:$8 sps:$4 sm:$0xff]  }
 0xc81   : > { %6024 = vmatprep.subr.bf16.mxu0 %v5999_v25  ;;  %6602 = vmatpush1.bf16.msra.mxu1 %v8423_v48  ;;  %v8440_v25 = vld [vmem:[%s12016_s24 + $0x4] ss:$8 sps:$4 sm:$0xff]   ;;  %v8462_v32 = vld [vmem:[%s12016_s24 + $0xc0] ss:$8 sps:$4 sm:$0xff]   ;;  %v8470_v23 = vld [vmem:[%s12016_s24 + $0xb4] ss:$8 sps:$4 sm:$0xff]  }
 0xc82   : > { %6603 = vmatprep.subr.bf16.mxu1 %v8431_v36  ;;  %v8468_v2 = vld [vmem:[%s12016_s24 + $0xb0] ss:$8 sps:$4 sm:$0xff]   ;;  %v8474_v48 = vld [vmem:[%s12016_s24 + $0xa0] ss:$8 sps:$4 sm:$0xff]   ;;  %v8476_v33 = vld [vmem:[%s12016_s24 + $0xa4] ss:$8 sps:$4 sm:$0xff]  }
 0xc83   : > { %v8479_v36 = vld [vmem:[%s12016_s24 + $0x1a4] ss:$8 sps:$4 sm:$0xff]  }
 0xc84   : > { %6025 = vmatpush1.bf16.msra.mxu0 %v5998_v57  ;;  %v8446_v57 = vld [vmem:[%s12016_s24 + $0xf4] ss:$8 sps:$4 sm:$0xff]  }
 0xc85   : > { %6604 = vmatpush1.bf16.msra.mxu1 %v8429_v9  ;;  %v8477_v9 = vld [vmem:[%s12016_s24 + $0x1a0] ss:$8 sps:$4 sm:$0xff]  }
 0xc86   : > { %6605 = vmatprep.subr.bf16.mxu1 %v8437_v31  ;;  %v8482_v31 = vld [vmem:[%s12016_s24 + $0x94] ss:$8 sps:$4 sm:$0xff]  }
 0xc87   : > { %7337 = vmatmul.mubr.msk.bf16.vlgmr.msra.gmra.mxu0 %vm1169_vm0, %v8395_v50  ;;  %v8444_v50 = vld [vmem:[%s12016_s24 + $0xf0] ss:$8 sps:$4 sm:$0xff]  }
 0xc88   : > { %6102 = vmatprep.mubr.bf16.mxu0 %v12278_v27 }
 0xc89   : > { %6606 = vmatpush1.bf16.msra.mxu1 %v8435_v30  ;;  %v8480_v30 = vld [vmem:[%s12016_s24 + $0x90] ss:$8 sps:$4 sm:$0xff]  }
 0xc8a   : > { %6607 = vmatprep.subr.bf16.mxu1 %v8443_v56  ;;  %v8485_v56 = vld [vmem:[%s12016_s24 + $0x194] ss:$8 sps:$4 sm:$0xff]  }
 0xc8d   : > { %6608 = vmatpush1.bf16.msra.mxu1 %v8441_v21  ;;  %v8483_v21 = vld [vmem:[%s12016_s24 + $0x190] ss:$8 sps:$4 sm:$0xff]  }
 0xc8e   : > { %6609 = vmatprep.subr.bf16.mxu1 %v8449_v29  ;;  %v8488_v29 = vld [vmem:[%s12016_s24 + $0x84] ss:$8 sps:$4 sm:$0xff]  }
 0xc91   : > { %6610 = vmatpush2.bf16.msra.mxu1 %v8447_v18  ;;  %v8486_v18 = vld [vmem:[%s12016_s24 + $0x80] ss:$8 sps:$4 sm:$0xff]  }
 0xc92   : > { %6611 = vmatprep.subr.bf16.mxu1 %v8455_v44  ;;  %v8491_v44 = vld [vmem:[%s12016_s24 + $0x184] ss:$8 sps:$4 sm:$0xff]  }
 0xc95   : > { %6612 = vmatpush2.bf16.msra.mxu1 %v8453_v19  ;;  %v8489_v19 = vld [vmem:[%s12016_s24 + $0x180] ss:$8 sps:$4 sm:$0xff]  }
 0xc96   : > { %6613 = vmatprep.subr.bf16.mxu1 %v8461_v58 }
 0xc99   : > { %6614 = vmatpush2.bf16.msra.mxu1 %v8459_v52 }
 0xc9a   : > { %6615 = vmatprep.subr.bf16.mxu1 %v8467_v10  ;;  %v8492_v10 = vld [vmem:[#allocation22 + $0x38] sm:$0xff]  }
 0xc9d   : > { %6616 = vmatpush2.bf16.msra.mxu1 %v8465_v46 }
 0xc9e   : > { %6617 = vmatprep.subr.bf16.mxu1 %v8473_v61 }
 0xca1   : > { %6618 = vmatpush2.bf16.msra.mxu1 %v8471_v28 }
 0xca2   : > { %6619 = vmatprep.subr.bf16.mxu1 %v8479_v36 }
 0xca5   : > { %6620 = vmatpush2.bf16.msra.mxu1 %v8477_v9 }
 0xca6   : > { %6621 = vmatprep.subr.bf16.mxu1 %v8485_v56 }
 0xca9   : > { %6622 = vmatpush2.bf16.msra.mxu1 %v8483_v21 }
 0xcaa   : > { %6623 = vmatprep.subr.bf16.mxu1 %v8491_v44 }
 0xcad   : > { %6624 = vmatpush2.bf16.msra.mxu1 %v8489_v19 }
 0xd47   : > { %v6044_v51 = vpop.f32.mrf.mxu0 }
 0xd48   : > { %v6053_v7 = vrot.slane %v6044_v51, 1 }
 0xd49   : > { %v6046_v55 = vpop.f32.mrf.mxu0 }
 0xd4a   : > { %v6054_v26 = vrot.slane %v6046_v55, 1 }
 0xd4b   : > { %v6048_v20 = vpop.f32.mrf.mxu0 }
 0xd4c   : > { %v6055_v35 = vrot.slane %v6048_v20, 1  ;;  %v6062_v62 = vpack.c.bf16 %v6048_v20, %v6044_v51 }
 0xd4d   : > { %v6050_v38 = vpop.f32.mrf.mxu0 }
 0xd4e   : > { %v6056_v43 = vrot.slane %v6050_v38, 1  ;;  %v6063_v1 = vpack.c.bf16 %v6050_v38, %v6046_v55  ;;  %v6057_v37 = vsel %vm1895_vm2, %v6053_v7, %v6055_v35  ;;  %v6059_v13 = vsel %vm1895_vm2, %v6055_v35, %v6053_v7  ;;  %v8493_v55 = vld [vmem:[#allocation22 + $0x30] sm:$0xff]   ;;  %v8494_v7 = vld [vmem:[#allocation22 + $0x28] sm:$0xff]  }
 0xd4f   : > { %v6064_v54 = vpack.c.bf16 %v6059_v13, %v6057_v37  ;;  %v8496_v37 = vld [vmem:[#allocation22 + $0x18] sm:$0xff]   ;;  %v8497_v13 = vld [vmem:[#allocation22 + $0x10] sm:$0xff]  }
 0xd50   : > { %6084 = vmatprep.subr.bf16.mxu0 %v6063_v1  ;;  %v6058_v45 = vsel %vm1895_vm2, %v6054_v26, %v6056_v43  ;;  %v6060_v14 = vsel %vm1895_vm2, %v6056_v43, %v6054_v26 }
 0xd51   : > { %6085 = vmatpush1.bf16.msra.mxu0 %v6062_v62  ;;  %v6065_v8 = vpack.c.bf16 %v6060_v14, %v6058_v45  ;;  %v8495_v62 = vld [vmem:[#allocation22 + $0x20] sm:$0xff]   ;;  %v8498_v45 = vld [vmem:[#allocation22 + $0x8] sm:$0xff]  }
 0xd52   : > { %v8499_v14 = vld [vmem:[#allocation22] sm:$0xff]  }
 0xd53   : > { %6125 = vmatprep.subr.bf16.mxu0 %v6065_v8  ;;  %v8501_v8 = vld [vmem:[#allocation22 + $0x60] sm:$0xff]  }
 0xd54   : > { %7338 = vmatmul.mubr.msk.bf16.vlgmr.msra.gmra.mxu0 %vm6066_vm4, %v6061_v6 }
 0xd55   : > { %6126 = vmatpush1.bf16.msra.mxu0 %v6064_v54  ;;  %6143 = vmatprep.mubr.bf16.mxu0 %v12278_v27  ;;  %v8503_v54 = vld [vmem:[#allocation22 + $0x50] sm:$0xff]  }
 0xd56   : > { %6552 = vmatprep.subr.bf16.mxu0 %v8398_v11  ;;  %v8502_v11 = vld [vmem:[#allocation22 + $0x58] sm:$0xff]  }
 0xd5c   : > { %7339 = vmatmul.mubr.msk.bf16.vlgmr.msra.gmra.mxu0 %vm6066_vm4, %v6061_v6  ;;  %v8500_v6 = vld [vmem:[#allocation22 + $0x68] sm:$0xff]  }
 0xd5d   : > { %6553 = vmatpush1.bf16.msra.mxu0 %v8396_v4  ;;  %v8504_v4 = vld [vmem:[#allocation22 + $0x48] sm:$0xff]  }
 0xd5e   : > { %6554 = vmatprep.subr.bf16.mxu0 %v8404_v42  ;;  %v8505_v42 = vld [vmem:[#allocation22 + $0x40] sm:$0xff]  }
 0xd61   : > { %6555 = vmatpush1.bf16.msra.mxu0 %v8402_v0  ;;  %v6220_v0 = vld [vmem:[#allocation21] sm:$0x3] }
 0xd62   : > { %6556 = vmatprep.subr.bf16.mxu0 %v8410_v3 }
 0xd65   : > { %6557 = vmatpush1.bf16.msra.mxu0 %v8408_v41 }
 0xd66   : > { %6558 = vmatprep.subr.bf16.mxu0 %v8416_v22  ;;  %v6225_v22 = vrot.slane %v6220_v0, %v11518_v12  ;;  %v7404_v12 = vld [vmem:[#allocation24] ss:$0 sm:$0xff] }
 0xd69   : > { %6559 = vmatpush1.bf16.msra.mxu0 %v8414_v24 }
 0xd6a   : > { %6560 = vmatprep.subr.bf16.mxu0 %v8422_v5  ;;  %v6229_v5 = vrot.slane %v6220_v0, %v11521_v49 }
 0xd6d   : > { %6561 = vmatpush1.bf16.msra.mxu0 %v8420_v53 }
 0xd6e   : > { %6562 = vmatprep.subr.bf16.mxu0 %v8428_v40 }
 0xd71   : > { %6563 = vmatpush1.bf16.msra.mxu0 %v8426_v63 }
 0xd72   : > { %6564 = vmatprep.subr.bf16.mxu0 %v8434_v47 }
 0xd75   : > { %6565 = vmatpush1.bf16.msra.mxu0 %v8432_v34 }
 0xd76   : > { %6566 = vmatprep.subr.bf16.mxu0 %v8440_v25 }
 0xd79   : > { %6567 = vmatpush1.bf16.msra.mxu0 %v8438_v59 }
 0xd7a   : > { %6568 = vmatprep.subr.bf16.mxu0 %v8446_v57 }
 0xd7d   : > { %6569 = vmatpush2.bf16.msra.mxu0 %v8444_v50 }
 0xd7e   : > { %6570 = vmatprep.subr.bf16.mxu0 %v8452_v39 }
 0xd81   : > { %6571 = vmatpush2.bf16.msra.mxu0 %v8450_v17 }
 0xd82   : > { %6572 = vmatprep.subr.bf16.mxu0 %v8458_v60 }
 0xd85   : > { %6573 = vmatpush2.bf16.msra.mxu0 %v8456_v15 }
 0xd86   : > { %6574 = vmatprep.subr.bf16.mxu0 %v8464_v16 }
 0xd89   : > { %6575 = vmatpush2.bf16.msra.mxu0 %v8462_v32 }
 0xd8a   : > { %6576 = vmatprep.subr.bf16.mxu0 %v8470_v23 }
 0xd8d   : > { %6577 = vmatpush2.bf16.msra.mxu0 %v8468_v2 }
 0xd8e   : > { %6578 = vmatprep.subr.bf16.mxu0 %v8476_v33 }
 0xd91   : > { %6579 = vmatpush2.bf16.msra.mxu0 %v8474_v48 }
 0xd92   : > { %6580 = vmatprep.subr.bf16.mxu0 %v8482_v31 }
 0xd95   : > { %6581 = vmatpush2.bf16.msra.mxu0 %v8480_v30 }
 0xd96   : > { %6582 = vmatprep.subr.bf16.mxu0 %v8488_v29 }
 0xd99   : > { %6583 = vmatpush2.bf16.msra.mxu0 %v8486_v18 }
 0xd9a   : > { %6761 = vmatprep.subr.bf16.mxu0 %v12278_v27 }
 0xe14   : > { %v6104_v52 = vpop.f32.mrf.mxu0 }
 0xe15   : > { %v6152_v28 = vpack.c.bf16 %v6104_v52, %v6104_v52 }
 0xe16   : > { %v6106_v58 = vpop.f32.mrf.mxu0 }
 0xe17   : > { %v6153_v46 = vpack.c.bf16 %v6106_v58, %v6106_v58 }
 0xe18   : > { %v6108_v61 = vpop.f32.mrf.mxu0 }
 0xe19   : > { %6584 = vmatprep.mubr.bf16.mxu0 %v6153_v46 }
 0xe1a   : > { %v6109_v51 = vpop.f32.mrf.mxu0  ;;  %6585 = vmatmul.mubr.bf16.vlgmr.msra.gmra.mxu0 %v6152_v28 }
 0xe1b   : > { %6762 = vmatpush1.bf16.msra.mxu0 %v8492_v10 }
 0xe1c   : > { %v6145_v20 = vpop.f32.mrf.mxu0  ;;  %6763 = vmatprep.subr.bf16.mxu0 %v12278_v27 }
 0xe1d   : > { %v6154_v26 = vpack.c.bf16 %v6145_v20, %v6145_v20 }
 0xe1e   : > { %v6147_v35 = vpop.f32.mrf.mxu0 }
 0xe1f   : > { %v6155_v38 = vpack.c.bf16 %v6147_v35, %v6147_v35  ;;  %6764 = vmatpush1.bf16.msra.mxu0 %v8493_v55 }
 0xe20   : > { %v6149_v43 = vpop.f32.mrf.mxu0  ;;  %6765 = vmatprep.subr.bf16.mxu0 %v12278_v27 }
 0xe21   : > { %6625 = vmatprep.mubr.bf16.mxu1 %v6155_v38 }
 0xe22   : > { %6626 = vmatmul.mubr.bf16.vlgmr.msra.gmra.mxu1 %v6154_v26  ;;  %v6150_v1 = vpop.f32.mrf.mxu0 }
 0xe23   : > { %6766 = vmatpush1.bf16.msra.mxu0 %v8494_v7 }
 0xe24   : > { %6767 = vmatprep.subr.bf16.mxu0 %v12278_v27 }
 0xe27   : > { %6768 = vmatpush1.bf16.msra.mxu0 %v8495_v62 }
 0xe28   : > { %6769 = vmatprep.subr.bf16.mxu0 %v12278_v27 }
 0xe2b   : > { %6770 = vmatpush1.bf16.msra.mxu0 %v8496_v37 }
 0xe2c   : > { %6771 = vmatprep.subr.bf16.mxu0 %v12278_v27 }
 0xe2f   : > { %6772 = vmatpush1.bf16.msra.mxu0 %v8497_v13 }
 0xe30   : > { %6773 = vmatprep.subr.bf16.mxu0 %v12278_v27 }
 0xe33   : > { %6774 = vmatpush1.bf16.msra.mxu0 %v8498_v45 }
 0xe34   : > { %6775 = vmatprep.subr.bf16.mxu0 %v12278_v27 }
 0xe37   : > { %6776 = vmatpush1.bf16.msra.mxu0 %v8499_v14 }
 0xe38   : > { %6781 = vmatprep.subr.bf16.mxu0 %v12278_v27 }
 0xe3b   : > { %6782 = vmatpush2.bf16.msra.mxu0 %v8500_v6 }
 0xe3c   : > { %6783 = vmatprep.subr.bf16.mxu0 %v12278_v27 }
 0xe3f   : > { %6784 = vmatpush2.bf16.msra.mxu0 %v8501_v8 }
 0xe40   : > { %6785 = vmatprep.subr.bf16.mxu0 %v12278_v27 }
 0xe43   : > { %6786 = vmatpush2.bf16.msra.mxu0 %v8502_v11 }
 0xe44   : > { %6787 = vmatprep.subr.bf16.mxu0 %v12278_v27 }
 0xe47   : > { %6788 = vmatpush2.bf16.msra.mxu0 %v8503_v54 }
 0xe48   : > { %6789 = vmatprep.subr.bf16.mxu0 %v12278_v27 }
 0xe4b   : > { %6790 = vmatpush2.bf16.msra.mxu0 %v8504_v4 }
 0xe4c   : > { %6791 = vmatprep.subr.bf16.mxu0 %v12278_v27 }
 0xe4f   : > { %6792 = vmatpush2.bf16.msra.mxu0 %v8505_v42 }
 0xeda   : > { %v6586_v3 = vpop.f32.mrf.mxu0 }
 0xedb   : > { %v6587_v40 = vadd.f32 %v6586_v3, %v6225_v22 }
 0xedc   : > { %v6588_v41 = vpop.f32.mrf.mxu0 }
 0xedd   : > { %v6589_v47 = vadd.f32 %v6588_v41, %v6229_v5 }
 0xede   : > { %v6590_v24 = vpop.f32.mrf.mxu0 }
 0xee0   : > { %v6591_v53 = vpop.f32.mrf.mxu0 }
 0xee2   : > { %v6627_v63 = vpop.f32.mrf.mxu1 }
 0xee3   : > { %v6628_v34 = vadd.f32 %v6627_v63, %v6587_v40 }
 0xee4   : > { %v6629_v25 = vpop.f32.mrf.mxu1 }
 0xee5   : > { %v6630_v59 = vadd.f32 %v6629_v25, %v6589_v47  ;;  %v6634_v57 = vmax.f32 %v6628_v34, 0.0 }
 0xee6   : > { %v6631_v27 = vpop.f32.mrf.mxu1 }
 0xee7   : > { %v6635_v50 = vmax.f32 %v6630_v59, 0.0  ;;  %v6636_v60 = vpack.c.bf16 %v6634_v57, %v6634_v57 }
 0xee8   : > { %v6632_v39 = vpop.f32.mrf.mxu1 }
 0xee9   : > { %v6637_v17 = vpack.c.bf16 %v6635_v50, %v6635_v50 }
 0xeeb   : > { %7419 = vmatprep.mubr.msk.bf16.mxu0 %vm6757_vm5, %v6637_v17 }
 0xeec   : > { %6794 = vmatmul.mubr.bf16.vlgmr.msra.gmra.mxu0 %v6636_v60 }
 0xfac   : > { %v6795_v49 = vpop.f32.mrf.mxu0 }
 0xfad   : > { %v6796_v15 = vadd.f32 %v7404_v12, %v6795_v49 }
 0xfae   : > { %v6797_v16 = vpop.f32.mrf.mxu0 }
 0xfaf   : > { %6801 = vst [vmem:[%s1047_s0] sm:$0xff] %v6796_v15 }
 0xfb0   : > { %v6798_v32 = vpop.f32.mrf.mxu0 }
 0xfb2   : > { %v6799_v23 = vpop.f32.mrf.mxu0 }
 0xfb3 PF: > { %s12283_s8 = sld [smem:[#allocation33_spill]] }
 0xfb9   : > { %s46_s8 = sadd.s32 1, %s12283_s8  }
 0xfba   : > { %p43_p10 = scmp.ge.s32.totalorder %s46_s8, 4  }
 0xfbc   :  { %45 = sbr.rel (!%p43_p10) target bundleno = 23 (0x17), region = 223 }
 0xfc1   :  { %6821 = vsyncpa [#allocation3], 1 }
 0xfc2   :  { %6823 = vsyncpa [#allocation3 + $0x1], 1 }
 0xfc3   :  { %6824 = vsyncpa [#allocation5], 1 }
 0xfc4   :  { %6825 = vsyncpa [#allocation8], 1 }
 0xfc5   :  { %6826 = vsyncpa [#allocation11], 1 }
 0xfc6   :  { %6827 = vsyncpa [#allocation14], 1 }
 0xfc7   :  { %6828 = vsyncpa [#allocation17], 1 }
 0xfc8   :  { %6829 = vsyncpa [#allocation20], 1 }
 0xfc9   :  { %6830 = vsyncpa [#allocation23], 1 }

</bundles_post_ra>
